<compile_context>
chip_gen: v7x
topology: tpu7x:2x2x1
jax: 0.10.0
libtpu: 0.0.40
codegen_flags: <defaults>
</compile_context>

<pallas_src>
import functools

import jax
import jax.numpy as jnp
from jax import lax
from jax.experimental import pallas as pl
from jax.experimental.pallas import tpu as pltpu


def _vq_kernel(x_ref, cb_ref, cb_lp_ref, cb2h_ref,
               xd_ref, loss_ref, perp_ref,
               count_acc, loss_acc, *, m_total):
    """Processes one (code_dim, TILE_T) block of the (N, C, T) input.

    x_ref     : (D, TT)  f32   input block (channels-minor slice)
    cb_ref    : (K, D)   f32   codebook (resident)
    cb_lp_ref : (K, D)   bf16  low-precision codebook for the distance matmul (resident)
    cb2h_ref  : (K, 1)   f32   0.5 * per-code squared norms (resident)
    xd_ref    : (D, TT)  f32   quantized output block
    loss_ref  : (1,)     f32   SMEM scalar output: commit loss
    perp_ref  : (1,)     f32   SMEM scalar output: perplexity
    count_acc : (K, 1)   f32   VMEM scratch: code-usage histogram accumulator
    loss_acc  : (1, 1)   f32   VMEM scratch: sum-of-squared-errors accumulator
    """
    n_i = pl.program_id(0)
    t_i = pl.program_id(1)
    is_first = jnp.logical_and(n_i == 0, t_i == 0)
    is_last = jnp.logical_and(n_i == pl.num_programs(0) - 1,
                              t_i == pl.num_programs(1) - 1)

    @pl.when(is_first)
    def _():
        count_acc[...] = jnp.zeros_like(count_acc)
        loss_acc[...] = jnp.zeros_like(loss_acc)

    x_blk = x_ref[...]                                    # (D, TT) f32
    K, D = cb_ref.shape
    TT = x_blk.shape[1]

    # Distance up to per-position constants and a global factor of 2 (both
    # argmin-invariant):  d_k(t) ~ 0.5*||c_k||^2 - c_k . x_t
    # MXU matmul with low-precision inputs, f32 accumulation.
    xc = lax.dot_general(cb_lp_ref[...], x_blk.astype(cb_lp_ref.dtype),
                         dimension_numbers=(((1,), (0,)), ((), ())),
                         preferred_element_type=jnp.float32)          # (K, TT)
    dist = cb2h_ref[...] - xc                                         # (K, TT)

    # First-occurrence argmin over codes (sublane axis), matching torch.min tie-break.
    # min_d is taken from the same values, so exact equality always has >= 1 hit per
    # column and the K sentinel can never survive.
    min_d = jnp.min(dist, axis=0, keepdims=True)                      # (1, TT)
    iota_k = lax.broadcasted_iota(jnp.int32, (K, TT), 0)              # (K, TT)
    idx = jnp.min(jnp.where(dist == min_d, iota_k, K), axis=0, keepdims=True)
    onehot = (iota_k == idx).astype(jnp.float32)                      # (K, TT)

    # Dequantize: x_d = codebook^T @ onehot (f32 -> bit-exact codebook rows).
    x_d = lax.dot_general(cb_ref[...], onehot,
                          dimension_numbers=(((0,), (0,)), ((), ())),
                          preferred_element_type=jnp.float32)         # (D, TT)
    xd_ref[...] = x_d

    # Accumulate commit-loss numerator and code histogram across the whole grid.
    diff = x_blk - x_d
    sq = diff * diff
    loss_acc[...] += jnp.sum(jnp.sum(sq, axis=1, keepdims=True),
                             axis=0, keepdims=True)                   # (1, 1)
    count_acc[...] += jnp.sum(onehot, axis=1, keepdims=True)          # (K, 1)

    @pl.when(is_last)
    def _():
        # Finalize once; keep all arithmetic in vector land, only the final rank-0
        # reductions feed the SMEM scalar stores.
        loss_vec = loss_acc[...] * jnp.float32(1.0 / (m_total * D))   # (1, 1)
        loss_ref[0] = jnp.sum(loss_vec)
        prob = count_acc[...] * jnp.float32(1.0 / m_total)            # histogram sums to m_total
        plogp = prob * jnp.log(prob + 1e-7)                           # (K, 1)
        perp_vec = jnp.exp(-jnp.sum(plogp, axis=0, keepdims=True))    # (1, 1)
        perp_ref[0] = jnp.sum(perp_vec)


def _pick_tile_t(T):
    # Largest lane-dense tile that divides T; fall back to full (unblocked) T for
    # small / odd lengths (a block equal to the full dim is always legal).
    for cand in (2048, 1024, 512, 256, 128):
        if T % cand == 0:
            return cand
    return T


def quantize_ema_reset_forward(x_nct, codebook, *, dist_dtype=jnp.bfloat16):
    """x_nct: (N, code_dim, T) float32; codebook: (nb_code, code_dim) float32."""
    N, C, T = x_nct.shape
    K, D = codebook.shape
    assert C == D, (C, D)

    x_nct = x_nct.astype(jnp.float32)
    codebook = codebook.astype(jnp.float32)

    tile_t = _pick_tile_t(T)
    n_t = T // tile_t
    m_total = N * T

    # Code-derived constants computed once, outside the grid.
    cb2_half = 0.5 * jnp.sum(codebook * codebook, axis=1, keepdims=True)  # (K, 1)
    cb_lp = codebook.astype(dist_dtype)                                   # bf16 copy for the MXU

    kernel = functools.partial(_vq_kernel, m_total=m_total)

    grid_spec = pltpu.PrefetchScalarGridSpec(
        num_scalar_prefetch=0,
        grid=(N, n_t),
        in_specs=[
            pl.BlockSpec((None, D, tile_t), lambda n, t: (n, 0, t)),  # x block (D, TT)
            pl.BlockSpec((K, D), lambda n, t: (0, 0)),                # codebook f32 (resident)
            pl.BlockSpec((K, D), lambda n, t: (0, 0)),                # codebook bf16 (resident)
            pl.BlockSpec((K, 1), lambda n, t: (0, 0)),                # 0.5*||c||^2 (resident)
        ],
        out_specs=[
            pl.BlockSpec((None, D, tile_t), lambda n, t: (n, 0, t)),  # x_d block
            pl.BlockSpec(memory_space=pltpu.MemorySpace.SMEM),        # commit loss scalar
            pl.BlockSpec(memory_space=pltpu.MemorySpace.SMEM),        # perplexity scalar
        ],
        scratch_shapes=[
            pltpu.VMEM((K, 1), jnp.float32),   # code-usage histogram accumulator
            pltpu.VMEM((1, 1), jnp.float32),   # sum-of-squared-errors accumulator
        ],
    )

    x_d, loss, perp = pl.pallas_call(
        kernel,
        grid_spec=grid_spec,
        out_shape=(
            jax.ShapeDtypeStruct((N, C, T), jnp.float32),
            jax.ShapeDtypeStruct((1,), jnp.float32),
            jax.ShapeDtypeStruct((1,), jnp.float32),
        ),
        # Both grid axes feed the shared loss/histogram accumulators, so the grid must
        # run serially on one core.
        # TODO(synk): for v7x dual-TC, shard the batch axis "parallel" with per-core
        # partial histograms and a cross-core reduction of loss/counts instead.
        compiler_params=pltpu.CompilerParams(
            dimension_semantics=("arbitrary", "arbitrary"),
            vmem_limit_bytes=32 * 1024 * 1024,
        ),
    )(x_nct, codebook, cb_lp, cb2_half)

    # Straight-through estimator: forward value is x_d (already in (N, C, T) layout).
    return x_d, loss[0], perp[0]


def _reference_forward(x_nct, codebook):
    # Pure-JAX f32 reference of the eval forward pass, for sanity checking.
    N, C, T = x_nct.shape
    x = jnp.transpose(x_nct, (0, 2, 1)).reshape(-1, C)
    dist = (jnp.sum(x ** 2, -1, keepdims=True)
            - 2.0 * x @ codebook.T
            + jnp.sum(codebook ** 2, -1)[None, :])
    idx = jnp.argmin(dist, axis=-1)
    x_d = codebook[idx]
    loss = jnp.mean((x - x_d) ** 2)
    count = jnp.sum(jax.nn.one_hot(idx, codebook.shape[0], dtype=jnp.float32), axis=0)
    prob = count / jnp.sum(count)
    perp = jnp.exp(-jnp.sum(prob * jnp.log(prob + 1e-7)))
    x_d = jnp.transpose(x_d.reshape(N, T, C), (0, 2, 1))
    return x_d, loss, perp


if __name__ == "__main__":
    # Module hyperparameters (synthetic, deterministic, small but tile-able so the
    # grid / accumulation path is actually exercised: grid = (2, 2)).
    nb_code = 512      # K (multiple of 256 keeps the MXU contraction dim full on v6e/v7x)
    code_dim = 32      # D (channel width of x)
    N, T = 2, 256      # batch, sequence length -> M = N*T = 512 flattened vectors

    key = jax.random.PRNGKey(0)
    k_x, k_cb = jax.random.split(key)
    x = jax.random.normal(k_x, (N, code_dim, T), dtype=jnp.float32)
    # deterministic codebook init (module zero-inits then EMA-fills; use small normal here)
    codebook = 0.02 * jax.random.normal(k_cb, (nb_code, code_dim), dtype=jnp.float32)

    x_d, commit_loss, perplexity = quantize_ema_reset_forward(x, codebook)
    jax.block_until_ready((x_d, commit_loss, perplexity))

    # Sanity check against the pure-JAX f32 reference.  The kernel's distance matmul
    # runs in bf16 (per perf guidance), so a tiny fraction of near-tie argmin picks may
    # differ: validate the per-position code agreement rate plus the scalar stats
    # instead of demanding bitwise-identical x_d everywhere.
    x_d_ref, loss_ref_v, perp_ref_v = _reference_forward(x, codebook)
    pos_match = jnp.all(jnp.abs(x_d - x_d_ref) < 1e-6, axis=1)          # (N, T)
    match_rate = float(jnp.mean(pos_match.astype(jnp.float32)))
    assert match_rate >= 0.95, f"code match rate too low: {match_rate}"
    assert jnp.allclose(commit_loss, loss_ref_v, atol=1e-3, rtol=1e-3), \
        (float(commit_loss), float(loss_ref_v))
    assert jnp.allclose(perplexity, perp_ref_v, rtol=0.05), \
        (float(perplexity), float(perp_ref_v))

    print("KERNEL_OK")
</pallas_src>

<mosaic_0001>
module attributes {stable_mosaic.version = 11 : i64} {
  func.func @_vq_kernel(%arg0: i32, %arg1: i32, %arg2: memref<1x32x256xf32, #tpu.memory_space<vmem>>, %arg3: memref<512x32xf32, #tpu.memory_space<vmem>>, %arg4: memref<512x32xbf16, #tpu.memory_space<vmem>>, %arg5: memref<512x1xf32, #tpu.memory_space<vmem>>, %arg6: memref<1x32x256xf32, #tpu.memory_space<vmem>>, %arg7: memref<1xf32, #tpu.memory_space<smem>>, %arg8: memref<1xf32, #tpu.memory_space<smem>>, %arg9: memref<512x1xf32, #tpu.memory_space<vmem>>, %arg10: memref<1x1xf32, #tpu.memory_space<vmem>>) attributes {dimension_semantics = [#tpu.dimension_semantics<arbitrary>, #tpu.dimension_semantics<arbitrary>], iteration_bounds = array<i64: 2, 1>, scalar_prefetch = 0 : i64, scratch_operands = 2 : i64, tpu.core_type = #tpu.core_type<tc>, window_params = [{transform_indices = @transform_0, window_bounds = array<i64: 1, 32, 256>}, {pipeline_mode = #tpu.pipeline_mode<synchronous>, transform_indices = @transform_1, window_bounds = array<i64: 512, 32>}, {pipeline_mode = #tpu.pipeline_mode<synchronous>, transform_indices = @transform_2, window_bounds = array<i64: 512, 32>}, {pipeline_mode = #tpu.pipeline_mode<synchronous>, transform_indices = @transform_3, window_bounds = array<i64: 512, 1>}, {transform_indices = @transform_4, window_bounds = array<i64: 1, 32, 256>}, {transform_indices = @transform_5, window_bounds = array<i64: 1>}, {transform_indices = @transform_6, window_bounds = array<i64: 1>}]} {
    %c0_i32 = arith.constant 0 : i32
    %0 = arith.cmpi eq, %arg0, %c0_i32 : i32
    %c0_i32_0 = arith.constant 0 : i32
    %1 = arith.cmpi eq, %arg1, %c0_i32_0 : i32
    %2 = arith.andi %0, %1 : i1
    %c1_i32 = arith.constant 1 : i32
    %3 = arith.cmpi eq, %arg0, %c1_i32 : i32
    %c0_i32_1 = arith.constant 0 : i32
    %4 = arith.cmpi eq, %arg1, %c0_i32_1 : i32
    %5 = arith.andi %3, %4 : i1
    %6 = arith.extui %2 : i1 to i32
    %c0_i32_2 = arith.constant 0 : i32
    %7 = arith.cmpi ne, %6, %c0_i32_2 : i32
    scf.if %7 {
      %cst_29 = arith.constant 0.000000e+00 : f32
      %50 = vector.broadcast %cst_29 : f32 to vector<512x1xf32>
      %c0_30 = arith.constant 0 : index
      %c0_31 = arith.constant 0 : index
      %51 = vector.load %arg9[%c0_30, %c0_31] : memref<512x1xf32, #tpu.memory_space<vmem>>, vector<512x1xf32>
      tpu.vector_store %arg9[%c0_30, %c0_31], %50 {strides = array<i32>} : memref<512x1xf32, #tpu.memory_space<vmem>>, vector<512x1xf32>,
      %cst_32 = arith.constant 0.000000e+00 : f32
      %52 = vector.broadcast %cst_32 : f32 to vector<1x1xf32>
      %c0_33 = arith.constant 0 : index
      %c0_34 = arith.constant 0 : index
      %53 = vector.load %arg10[%c0_33, %c0_34] : memref<1x1xf32, #tpu.memory_space<vmem>>, vector<1x1xf32>
      tpu.vector_store %arg10[%c0_33, %c0_34], %52 {strides = array<i32>} : memref<1x1xf32, #tpu.memory_space<vmem>>, vector<1x1xf32>,
    } else {
    }
    %c0 = arith.constant 0 : index
    %c0_3 = arith.constant 0 : index
    %c0_4 = arith.constant 0 : index
    %8 = vector.load %arg2[%c0, %c0_3, %c0_4] : memref<1x32x256xf32, #tpu.memory_space<vmem>>, vector<1x32x256xf32>
    %9 = vector.shape_cast %8 : vector<1x32x256xf32> to vector<32x256xf32>
    %c0_5 = arith.constant 0 : index
    %c0_6 = arith.constant 0 : index
    %10 = vector.load %arg4[%c0_5, %c0_6] : memref<512x32xbf16, #tpu.memory_space<vmem>>, vector<512x32xbf16>
    %11 = arith.truncf %9 : vector<32x256xf32> to vector<32x256xbf16>
    %cst = arith.constant dense<0.000000e+00> : vector<512x256xf32>
    %12 = tpu.matmul %10, %11, %cst {dimension_numbers = #tpu.dot_dimension_numbers<[1], [0], [0], [1], [0, 0, 1, 1], [], []>} : vector<512x32xbf16>, vector<32x256xbf16>, vector<512x256xf32> -> vector<512x256xf32>
    %c0_7 = arith.constant 0 : index
    %c0_8 = arith.constant 0 : index
    %13 = vector.load %arg5[%c0_7, %c0_8] : memref<512x1xf32, #tpu.memory_space<vmem>>, vector<512x1xf32>
    %14 = vector.broadcast %13 : vector<512x1xf32> to vector<512x256xf32>
    %15 = arith.subf %14, %12 : vector<512x256xf32>
    %cst_9 = arith.constant dense<0x7F800000> : vector<256xf32>
    %16 = vector.multi_reduction <minimumf>, %15, %cst_9 [0] : vector<512x256xf32> to vector<256xf32>
    %17 = vector.shape_cast %16 : vector<256xf32> to vector<1x256xf32>
    %18 = tpu.iota {dimensions = array<i32: 0>} : vector<512x256xi32>
    %19 = vector.broadcast %17 : vector<1x256xf32> to vector<512x256xf32>
    %20 = arith.cmpf oeq, %15, %19 : vector<512x256xf32>
    %c512_i32 = arith.constant 512 : i32
    %21 = vector.broadcast %c512_i32 : i32 to vector<512x256xi32>
    %22 = arith.select %20, %18, %21 : vector<512x256xi1>, vector<512x256xi32>
    %cst_10 = arith.constant dense<2147483647> : vector<256xi32>
    %23 = vector.multi_reduction <minsi>, %22, %cst_10 [0] : vector<512x256xi32> to vector<256xi32>
    %24 = vector.shape_cast %23 : vector<256xi32> to vector<1x256xi32>
    %25 = vector.broadcast %24 : vector<1x256xi32> to vector<512x256xi32>
    %26 = arith.cmpi eq, %18, %25 : vector<512x256xi32>
    %27 = arith.extui %26 : vector<512x256xi1> to vector<512x256xi32>
    %28 = arith.sitofp %27 : vector<512x256xi32> to vector<512x256xf32>
    %c0_11 = arith.constant 0 : index
    %c0_12 = arith.constant 0 : index
    %29 = vector.load %arg3[%c0_11, %c0_12] : memref<512x32xf32, #tpu.memory_space<vmem>>, vector<512x32xf32>
    %cst_13 = arith.constant dense<0.000000e+00> : vector<32x256xf32>
    %30 = tpu.matmul %29, %28, %cst_13 {dimension_numbers = #tpu.dot_dimension_numbers<[0], [0], [1], [1], [0, 1, 1, 1], [], []>} : vector<512x32xf32>, vector<512x256xf32>, vector<32x256xf32> -> vector<32x256xf32>
    %c0_14 = arith.constant 0 : index
    %c0_15 = arith.constant 0 : index
    %c0_16 = arith.constant 0 : index
    %31 = vector.load %arg6[%c0_14, %c0_15, %c0_16] : memref<1x32x256xf32, #tpu.memory_space<vmem>>, vector<1x32x256xf32>
    %32 = vector.shape_cast %31 : vector<1x32x256xf32> to vector<32x256xf32>
    %33 = vector.shape_cast %30 : vector<32x256xf32> to vector<1x32x256xf32>
    tpu.vector_store %arg6[%c0_14, %c0_15, %c0_16], %33 {strides = array<i32>} : memref<1x32x256xf32, #tpu.memory_space<vmem>>, vector<1x32x256xf32>,
    %34 = arith.subf %9, %30 : vector<32x256xf32>
    %35 = arith.mulf %34, %34 : vector<32x256xf32>
    %c0_17 = arith.constant 0 : index
    %c0_18 = arith.constant 0 : index
    %36 = vector.load %arg10[%c0_17, %c0_18] : memref<1x1xf32, #tpu.memory_space<vmem>>, vector<1x1xf32>
    %cst_19 = arith.constant dense<0.000000e+00> : vector<32xf32>
    %37 = vector.multi_reduction <add>, %35, %cst_19 [1] : vector<32x256xf32> to vector<32xf32>
    %38 = vector.shape_cast %37 : vector<32xf32> to vector<32x1xf32>
    %cst_20 = arith.constant dense<0.000000e+00> : vector<1xf32>
    %39 = vector.multi_reduction <add>, %38, %cst_20 [0] : vector<32x1xf32> to vector<1xf32>
    %40 = vector.shape_cast %39 : vector<1xf32> to vector<1x1xf32>
    %41 = arith.addf %36, %40 : vector<1x1xf32>
    %c0_21 = arith.constant 0 : index
    %c0_22 = arith.constant 0 : index
    %42 = vector.load %arg10[%c0_21, %c0_22] : memref<1x1xf32, #tpu.memory_space<vmem>>, vector<1x1xf32>
    tpu.vector_store %arg10[%c0_21, %c0_22], %41 {strides = array<i32>} : memref<1x1xf32, #tpu.memory_space<vmem>>, vector<1x1xf32>,
    %c0_23 = arith.constant 0 : index
    %c0_24 = arith.constant 0 : index
    %43 = vector.load %arg9[%c0_23, %c0_24] : memref<512x1xf32, #tpu.memory_space<vmem>>, vector<512x1xf32>
    %cst_25 = arith.constant dense<0.000000e+00> : vector<512xf32>
    %44 = vector.multi_reduction <add>, %28, %cst_25 [1] : vector<512x256xf32> to vector<512xf32>
    %45 = vector.shape_cast %44 : vector<512xf32> to vector<512x1xf32>
    %46 = arith.addf %43, %45 : vector<512x1xf32>
    %c0_26 = arith.constant 0 : index
    %c0_27 = arith.constant 0 : index
    %47 = vector.load %arg9[%c0_26, %c0_27] : memref<512x1xf32, #tpu.memory_space<vmem>>, vector<512x1xf32>
    tpu.vector_store %arg9[%c0_26, %c0_27], %46 {strides = array<i32>} : memref<512x1xf32, #tpu.memory_space<vmem>>, vector<512x1xf32>,
    %48 = arith.extui %5 : i1 to i32
    %c0_i32_28 = arith.constant 0 : i32
    %49 = arith.cmpi ne, %48, %c0_i32_28 : i32
    scf.if %49 {
      %c0_29 = arith.constant 0 : index
      %c0_30 = arith.constant 0 : index
      %50 = vector.load %arg10[%c0_29, %c0_30] : memref<1x1xf32, #tpu.memory_space<vmem>>, vector<1x1xf32>
      %cst_31 = arith.constant 6.10351563E-5 : f32
      %51 = vector.broadcast %cst_31 : f32 to vector<1x1xf32>
      %52 = arith.mulf %50, %51 : vector<1x1xf32>
      %53 = vector.shape_cast %52 : vector<1x1xf32> to vector<1x1x1xf32>
      %cst_32 = arith.constant dense<0.000000e+00> : vector<1xf32>
      %54 = vector.multi_reduction <add>, %53, %cst_32 [1, 2] : vector<1x1x1xf32> to vector<1xf32>
      %55 = vector.shape_cast %54 : vector<1xf32> to vector<1x1x1xf32>
      %56 = vector.extract %55[0, 0, 0] : f32 from vector<1x1x1xf32>
      %c0_33 = arith.constant 0 : index
      %57 = memref.load %arg7[%c0_33] : memref<1xf32, #tpu.memory_space<smem>>
      memref.store %56, %arg7[%c0_33] : memref<1xf32, #tpu.memory_space<smem>>
      %c0_34 = arith.constant 0 : index
      %c0_35 = arith.constant 0 : index
      %58 = vector.load %arg9[%c0_34, %c0_35] : memref<512x1xf32, #tpu.memory_space<vmem>>, vector<512x1xf32>
      %cst_36 = arith.constant 0.001953125 : f32
      %59 = vector.broadcast %cst_36 : f32 to vector<512x1xf32>
      %60 = arith.mulf %58, %59 : vector<512x1xf32>
      %cst_37 = arith.constant 1.000000e-07 : f32
      %61 = vector.broadcast %cst_37 : f32 to vector<512x1xf32>
      %62 = arith.addf %60, %61 : vector<512x1xf32>
      %63 = math.log %62 : vector<512x1xf32>
      %64 = arith.mulf %60, %63 : vector<512x1xf32>
      %cst_38 = arith.constant dense<0.000000e+00> : vector<1xf32>
      %65 = vector.multi_reduction <add>, %64, %cst_38 [0] : vector<512x1xf32> to vector<1xf32>
      %66 = vector.shape_cast %65 : vector<1xf32> to vector<1x1xf32>
      %cst_39 = arith.constant 0.000000e+00 : f32
      %67 = vector.broadcast %cst_39 : f32 to vector<1x1xf32>
      %68 = arith.subf %67, %66 : vector<1x1xf32>
      %69 = math.exp %68 : vector<1x1xf32>
      %70 = vector.shape_cast %69 : vector<1x1xf32> to vector<1x1x1xf32>
      %cst_40 = arith.constant dense<0.000000e+00> : vector<1xf32>
      %71 = vector.multi_reduction <add>, %70, %cst_40 [1, 2] : vector<1x1x1xf32> to vector<1xf32>
      %72 = vector.shape_cast %71 : vector<1xf32> to vector<1x1x1xf32>
      %73 = vector.extract %72[0, 0, 0] : f32 from vector<1x1x1xf32>
      %c0_41 = arith.constant 0 : index
      %74 = memref.load %arg8[%c0_41] : memref<1xf32, #tpu.memory_space<smem>>
      memref.store %73, %arg8[%c0_41] : memref<1xf32, #tpu.memory_space<smem>>
    } else {
    }
    return
  }
  func.func @transform_0(%arg0: i32, %arg1: i32) -> (i32, i32, i32) {
    %c0_i32 = arith.constant 0 : i32
    %c0_i32_0 = arith.constant 0 : i32
    return %arg0, %c0_i32, %arg1 : i32, i32, i32
  }
  func.func @transform_1(%arg0: i32, %arg1: i32) -> (i32, i32) {
    %c0_i32 = arith.constant 0 : i32
    %c0_i32_0 = arith.constant 0 : i32
    %c0_i32_1 = arith.constant 0 : i32
    return %c0_i32, %c0_i32_0 : i32, i32
  }
  func.func @transform_2(%arg0: i32, %arg1: i32) -> (i32, i32) {
    %c0_i32 = arith.constant 0 : i32
    %c0_i32_0 = arith.constant 0 : i32
    %c0_i32_1 = arith.constant 0 : i32
    return %c0_i32, %c0_i32_0 : i32, i32
  }
  func.func @transform_3(%arg0: i32, %arg1: i32) -> (i32, i32) {
    %c0_i32 = arith.constant 0 : i32
    %c0_i32_0 = arith.constant 0 : i32
    %c0_i32_1 = arith.constant 0 : i32
    return %c0_i32, %c0_i32_0 : i32, i32
  }
  func.func @transform_4(%arg0: i32, %arg1: i32) -> (i32, i32, i32) {
    %c0_i32 = arith.constant 0 : i32
    %c0_i32_0 = arith.constant 0 : i32
    return %arg0, %c0_i32, %arg1 : i32, i32, i32
  }
  func.func @transform_5(%arg0: i32, %arg1: i32) -> i32 {
    %c0_i32 = arith.constant 0 : i32
    %c0_i32_0 = arith.constant 0 : i32
    return %c0_i32 : i32
  }
  func.func @transform_6(%arg0: i32, %arg1: i32) -> i32 {
    %c0_i32 = arith.constant 0 : i32
    %c0_i32_0 = arith.constant 0 : i32
    return %c0_i32 : i32
  }
}

</mosaic_0001>

<bundles_post_ra>
// kernel: tpu_custom_call.1
= control target key start
LH: loop header
LB: loop body
LE: loop exit
PB: predicated region body
PF: predicated region fallthrough
CT: control target
= control target key end

     0   :  { %12 = vsyncpa [#allocation5], 0  ;;  %s9881_s0 = inlined_call_operand.vmem [shape: f32[2,32,256], index: 0, kind: input, shape index: {}]   ;;  %s9882_s1 = inlined_call_operand.vmem [shape: f32[512,32], index: 1, kind: input, shape index: {}]   ;;  %s9883_s2 = inlined_call_operand.vmem [shape: bf16[512,32], index: 2, kind: input, shape index: {}]   ;;  %s9884_s3 = inlined_call_operand.vmem [shape: f32[512,1], index: 3, kind: input, shape index: {}]   ;;  %s9885_s4 = inlined_call_operand.hbm [shape: f32[2,32,256], index: 4, kind: output, shape index: {0}]   ;;  %s9886_s5 = inlined_call_operand.hbm [shape: f32[1], index: 5, kind: output, shape index: {1}]   ;;  %s9887_s6 = inlined_call_operand.hbm [shape: f32[1], index: 6, kind: output, shape index: {2}]  }
   0x1   :  { %14 = vsyncpa [#allocation5 + $0x1], 0 }
   0x2   :  { %15 = vsyncpa [#allocation6], 0 }
   0x3   :  { %16 = vsyncpa [#allocation9], 0  ;;  %s5134_s21 = smov 0   ;;  %s5136_s22 = smov 0  }
   0x4   :  { %s5138_s23 = smov 0   ;;  %s5140_s24 = smov 0  }
   0x5   :  { %s5142_s25 = smov 0   ;;  %s5144_s26 = smov 0  }
   0x6 LB: > { %s4140_s27 = sadd.s32 4294967295, %s5088_s26   ;;  %s4141_s28 = sadd.s32 4294967294, %s5088_s26   ;;  %s5088_s26 = sphi %s5144_s26, %s22_s26   ;;  %s5084_s25 = sphi %s5142_s25, %s11203_s25   ;;  %s5080_s24 = sphi %s5140_s24, %s11202_s24   ;;  %s5076_s23 = sphi %s5138_s23, %s11201_s23   ;;  %s5072_s22 = sphi %s5136_s22, %s11200_s22   ;;  %s5068_s21 = sphi %s5134_s21, %s11199_s21  }
   0x7   : > { %s34_s29 = sadd.s32 1, %s5084_s25  ;;  %s134_s30 = sadd.s32 1, %s5076_s23 }
   0x8   : > { %p36_p0 = scmp.ge.s32.totalorder %s34_s29, 2  ;;  %p144_p1 = scmp.ne.s32.totalorder %s5076_s23, %s5072_s22 }
   0x9   : > { %p5170_p2 = scmp.eq.s32.totalorder %s4140_s27, 1  ;;  %p150_p3 = scmp.ne.s32.totalorder %s5072_s22, %s5068_s21 }
   0xa   : > { %s11205_s29 = smov (%p36_p0, %s34_s29), 0  ;;  %p151_p5 = scmp.eq.s32.totalorder %s4141_s28, 1 }
   0xb   : > { %p5180_p4 = por %p5170_p2, %p144_p1  ;;  %s129_s9 = ssub.s32 %s5084_s25, %s11205_s29 }
   0xc   : > { %p4144_p6 = scmp.ge.s32.totalorder %s5088_s26, 1  ;;  %p132_p7 = scmp.eq.s32.totalorder %s129_s9, 0 }
   0xd   : > { %p5187_p8 = por %p151_p5, %p150_p3  ;;  %p233_p9 = scmp.lt.s32.totalorder %s5088_s26, 3 }
   0xe   : > { %s5193_s11 = scalar_select %p132_p7, %s5076_s23, %s134_s30  }
   0xf   : > { %p234_p10 = pnand %p4144_p6, %p233_p9 }
  0x11   : > { %237 = sbr.rel (%p234_p10) target bundleno = 1439 (0x59f), region = 36 }
  0x18   : > { %s260_s12 = sand.u32 1, %s5072_s22   ;;  %p268_p11 = scmp.lt.s32.totalorder %s5080_s24, 1 }
  0x19   : > { %s4145_s13 = sshll.u32 %s260_s12, 6  ;;  %p279_p12 = scmp.eq.s32.totalorder %s5080_s24, 0 }
  0x1a   : > { %p283_p13 = scmp.eq.s32.totalorder %s5080_s24, 1  ;;  %s5207_s19 = scalar_lea.vmem [#allocation4], %s4145_s13  ;;  %vm288_vm0 = vcmask (%p279_p12), 7168   ;;  %vm353_vm1 = vcmask (%p279_p12), 0   ;;  %v5090_v0 = vmov (%p279_p12), 0.0  }
  0x1b   : > { %s269_s14 = scalar_select %p268_p11, %s5080_s24, 1 }
  0x1c   : > { %287 = sbr.rel (!%p279_p12) target bundleno = 61 (0x3d), region = 40  ;;  %289 = vst.msk [vmem:[#allocation2] sm:$0xff] (%p279_p12), %vm288_vm0, %v5090_v0  ;;  %290 = vst.msk [vmem:[#allocation2 + $0x8] sm:$0xff] (%p279_p12), %vm288_vm0, %v5090_v0 }
  0x1d   : > { %s4479_s15 = sshll.u32 %s269_s14, 6  ;;  %291 = vst.msk [vmem:[#allocation2 + $0x10] sm:$0xff] (%p279_p12), %vm288_vm0, %v5090_v0  ;;  %292 = vst.msk [vmem:[#allocation2 + $0x18] sm:$0xff] (%p279_p12), %vm288_vm0, %v5090_v0 }
  0x1e   : > { %s5205_s18 = scalar_lea.vmem %s9881_s0, %s4479_s15  ;;  %293 = vst.msk [vmem:[#allocation2 + $0x20] sm:$0xff] (%p279_p12), %vm288_vm0, %v5090_v0  ;;  %294 = vst.msk [vmem:[#allocation2 + $0x28] sm:$0xff] (%p279_p12), %vm288_vm0, %v5090_v0 }
  0x1f   : > { %295 = vst.msk [vmem:[#allocation2 + $0x30] sm:$0xff] (%p279_p12), %vm288_vm0, %v5090_v0  ;;  %296 = vst.msk [vmem:[#allocation2 + $0x38] sm:$0xff] (%p279_p12), %vm288_vm0, %v5090_v0 }
  0x20   : > { %297 = vst.msk [vmem:[#allocation2 + $0x40] sm:$0xff] (%p279_p12), %vm288_vm0, %v5090_v0  ;;  %298 = vst.msk [vmem:[#allocation2 + $0x48] sm:$0xff] (%p279_p12), %vm288_vm0, %v5090_v0 }
  0x21   : > { %299 = vst.msk [vmem:[#allocation2 + $0x50] sm:$0xff] (%p279_p12), %vm288_vm0, %v5090_v0  ;;  %300 = vst.msk [vmem:[#allocation2 + $0x58] sm:$0xff] (%p279_p12), %vm288_vm0, %v5090_v0 }
  0x22   : > { %301 = vst.msk [vmem:[#allocation2 + $0x60] sm:$0xff] (%p279_p12), %vm288_vm0, %v5090_v0  ;;  %302 = vst.msk [vmem:[#allocation2 + $0x68] sm:$0xff] (%p279_p12), %vm288_vm0, %v5090_v0 }
  0x23   : > { %303 = vst.msk [vmem:[#allocation2 + $0x70] sm:$0xff] %vm288_vm0, %v5090_v0  ;;  %304 = vst.msk [vmem:[#allocation2 + $0x78] sm:$0xff] %vm288_vm0, %v5090_v0 }
  0x24   : > { %305 = vst.msk [vmem:[#allocation2 + $0x80] sm:$0xff] %vm288_vm0, %v5090_v0  ;;  %306 = vst.msk [vmem:[#allocation2 + $0x88] sm:$0xff] %vm288_vm0, %v5090_v0 }
  0x25   : > { %307 = vst.msk [vmem:[#allocation2 + $0x90] sm:$0xff] %vm288_vm0, %v5090_v0  ;;  %308 = vst.msk [vmem:[#allocation2 + $0x98] sm:$0xff] %vm288_vm0, %v5090_v0 }
  0x26   : > { %309 = vst.msk [vmem:[#allocation2 + $0xa0] sm:$0xff] %vm288_vm0, %v5090_v0  ;;  %310 = vst.msk [vmem:[#allocation2 + $0xa8] sm:$0xff] %vm288_vm0, %v5090_v0 }
  0x27   : > { %311 = vst.msk [vmem:[#allocation2 + $0xb0] sm:$0xff] %vm288_vm0, %v5090_v0  ;;  %312 = vst.msk [vmem:[#allocation2 + $0xb8] sm:$0xff] %vm288_vm0, %v5090_v0 }
  0x28   : > { %313 = vst.msk [vmem:[#allocation2 + $0xc0] sm:$0xff] %vm288_vm0, %v5090_v0  ;;  %314 = vst.msk [vmem:[#allocation2 + $0xc8] sm:$0xff] %vm288_vm0, %v5090_v0 }
  0x29   : > { %315 = vst.msk [vmem:[#allocation2 + $0xd0] sm:$0xff] %vm288_vm0, %v5090_v0  ;;  %316 = vst.msk [vmem:[#allocation2 + $0xd8] sm:$0xff] %vm288_vm0, %v5090_v0 }
  0x2a   : > { %317 = vst.msk [vmem:[#allocation2 + $0xe0] sm:$0xff] %vm288_vm0, %v5090_v0  ;;  %318 = vst.msk [vmem:[#allocation2 + $0xe8] sm:$0xff] %vm288_vm0, %v5090_v0 }
  0x2b   : > { %319 = vst.msk [vmem:[#allocation2 + $0xf0] sm:$0xff] %vm288_vm0, %v5090_v0  ;;  %320 = vst.msk [vmem:[#allocation2 + $0xf8] sm:$0xff] %vm288_vm0, %v5090_v0 }
  0x2c   : > { %321 = vst.msk [vmem:[#allocation2 + $0x100] sm:$0xff] %vm288_vm0, %v5090_v0  ;;  %322 = vst.msk [vmem:[#allocation2 + $0x108] sm:$0xff] %vm288_vm0, %v5090_v0 }
  0x2d   : > { %323 = vst.msk [vmem:[#allocation2 + $0x110] sm:$0xff] %vm288_vm0, %v5090_v0  ;;  %324 = vst.msk [vmem:[#allocation2 + $0x118] sm:$0xff] %vm288_vm0, %v5090_v0 }
  0x2e   : > { %325 = vst.msk [vmem:[#allocation2 + $0x120] sm:$0xff] %vm288_vm0, %v5090_v0  ;;  %326 = vst.msk [vmem:[#allocation2 + $0x128] sm:$0xff] %vm288_vm0, %v5090_v0 }
  0x2f   : > { %327 = vst.msk [vmem:[#allocation2 + $0x130] sm:$0xff] %vm288_vm0, %v5090_v0  ;;  %328 = vst.msk [vmem:[#allocation2 + $0x138] sm:$0xff] %vm288_vm0, %v5090_v0 }
  0x30   : > { %329 = vst.msk [vmem:[#allocation2 + $0x140] sm:$0xff] %vm288_vm0, %v5090_v0  ;;  %330 = vst.msk [vmem:[#allocation2 + $0x148] sm:$0xff] %vm288_vm0, %v5090_v0 }
  0x31   : > { %331 = vst.msk [vmem:[#allocation2 + $0x150] sm:$0xff] %vm288_vm0, %v5090_v0  ;;  %332 = vst.msk [vmem:[#allocation2 + $0x158] sm:$0xff] %vm288_vm0, %v5090_v0 }
  0x32   : > { %333 = vst.msk [vmem:[#allocation2 + $0x160] sm:$0xff] %vm288_vm0, %v5090_v0  ;;  %334 = vst.msk [vmem:[#allocation2 + $0x168] sm:$0xff] %vm288_vm0, %v5090_v0 }
  0x33   : > { %335 = vst.msk [vmem:[#allocation2 + $0x170] sm:$0xff] %vm288_vm0, %v5090_v0  ;;  %336 = vst.msk [vmem:[#allocation2 + $0x178] sm:$0xff] %vm288_vm0, %v5090_v0 }
  0x34   : > { %337 = vst.msk [vmem:[#allocation2 + $0x180] sm:$0xff] %vm288_vm0, %v5090_v0  ;;  %338 = vst.msk [vmem:[#allocation2 + $0x188] sm:$0xff] %vm288_vm0, %v5090_v0 }
  0x35   : > { %339 = vst.msk [vmem:[#allocation2 + $0x190] sm:$0xff] %vm288_vm0, %v5090_v0  ;;  %340 = vst.msk [vmem:[#allocation2 + $0x198] sm:$0xff] %vm288_vm0, %v5090_v0 }
  0x36   : > { %341 = vst.msk [vmem:[#allocation2 + $0x1a0] sm:$0xff] %vm288_vm0, %v5090_v0  ;;  %342 = vst.msk [vmem:[#allocation2 + $0x1a8] sm:$0xff] %vm288_vm0, %v5090_v0 }
  0x37   : > { %343 = vst.msk [vmem:[#allocation2 + $0x1b0] sm:$0xff] %vm288_vm0, %v5090_v0  ;;  %344 = vst.msk [vmem:[#allocation2 + $0x1b8] sm:$0xff] %vm288_vm0, %v5090_v0 }
  0x38   : > { %345 = vst.msk [vmem:[#allocation2 + $0x1c0] sm:$0xff] %vm288_vm0, %v5090_v0  ;;  %346 = vst.msk [vmem:[#allocation2 + $0x1c8] sm:$0xff] %vm288_vm0, %v5090_v0 }
  0x39   : > { %347 = vst.msk [vmem:[#allocation2 + $0x1d0] sm:$0xff] %vm288_vm0, %v5090_v0  ;;  %348 = vst.msk [vmem:[#allocation2 + $0x1d8] sm:$0xff] %vm288_vm0, %v5090_v0 }
  0x3a   : > { %349 = vst.msk [vmem:[#allocation2 + $0x1e0] sm:$0xff] %vm288_vm0, %v5090_v0  ;;  %350 = vst.msk [vmem:[#allocation2 + $0x1e8] sm:$0xff] %vm288_vm0, %v5090_v0 }
  0x3b   : > { %351 = vst.msk [vmem:[#allocation2 + $0x1f0] sm:$0xff] %vm288_vm0, %v5090_v0  ;;  %352 = vst.msk [vmem:[#allocation2 + $0x1f8] sm:$0xff] %vm288_vm0, %v5090_v0 }
  0x3c   : > { %354 = vst.msk [vmem:[#allocation3] sm:$0x1] %vm353_vm1, %v5090_v0 }
  0x3d PF: > { %v356_v1 = vld [vmem:[%s5205_s18 + $0x8] sm:$0xff]  ;;  %v358_v2 = vld [vmem:[%s5205_s18 + $0x18] sm:$0xff]  ;;  %v355_v3 = vld [vmem:[%s5205_s18] sm:$0xff]  ;;  %v5091_v8 = vmov 0   ;;  %vm591_vm2 = vcmask 261120  }
  0x3e   : > { %v428_v4 = vpack.c.bf16 %v358_v2, %v356_v1  ;;  %v357_v5 = vld [vmem:[%s5205_s18 + $0x10] sm:$0xff]  ;;  %v360_v6 = vld [vmem:[%s5205_s18 + $0x28] sm:$0xff]  ;;  %v362_v7 = vld [vmem:[%s5205_s18 + $0x38] sm:$0xff]  ;;  %720 = vmatprep.mubr.bf16.mxu0 %v5091_v8  ;;  %930 = vmatprep.mubr.bf16.mxu1 %v5091_v8 }
  0x3f   : > { %v427_v9 = vpack.c.bf16 %v357_v5, %v355_v3  ;;  %v430_v10 = vpack.c.bf16 %v362_v7, %v360_v6  ;;  %v359_v11 = vld [vmem:[%s5205_s18 + $0x20] sm:$0xff]  ;;  %v361_v12 = vld [vmem:[%s5205_s18 + $0x30] sm:$0xff]  ;;  %4703 = vset.pattern.permute.xlu1 %v5091_v8  ;;  %4702 = vset.pattern.permute.xlu0 %v5091_v8  ;;  %v4809_v15 = vld [vmem:[%s9883_s2 + $0xa8] sm:$0xff]  }
  0x40   : > { %688 = vmatprep.subr.bf16.mxu0 %v428_v4  ;;  %4611 = vmatprep.subr.bf16.mxu1 %v428_v4  ;;  %v429_v13 = vpack.c.bf16 %v361_v12, %v359_v11  ;;  %v4808_v14 = vld [vmem:[%s9883_s2] sm:$0xff]   ;;  %v1043_v16 = vld [vmem:[%s9884_s3 + $0x10] sm:$0xff]  ;;  %v1044_v18 = vld [vmem:[%s9884_s3 + $0x18] sm:$0xff] }
  0x41   : > { %689 = vmatpush1.bf16.msra.mxu0 %v427_v9  ;;  %4613 = vmatpush1.bf16.msra.mxu1 %v427_v9  ;;  %v1041_v17 = vld [vmem:[%s9884_s3] sm:$0xff]  ;;  %v1042_v19 = vld [vmem:[%s9884_s3 + $0x8] sm:$0xff]  ;;  %v4811_v22 = vld [vmem:[%s9883_s2 + $0xb0] sm:$0xff]  }
  0x42   : > { %690 = vmatprep.subr.bf16.mxu0 %v430_v10  ;;  %4612 = vmatprep.subr.bf16.mxu1 %v430_v10  ;;  %v1046_v20 = vld [vmem:[%s9884_s3 + $0x28] sm:$0xff]  ;;  %v1045_v23 = vld [vmem:[%s9884_s3 + $0x20] sm:$0xff]  ;;  %v1048_v24 = vld [vmem:[%s9884_s3 + $0x38] sm:$0xff] }
  0x43   : > { %1117 = vperm.xlu1 %4703, %v1043_v16   ;;  %1107 = vperm.xlu0 %4702, %v1041_v17   ;;  %v4810_v21 = vld [vmem:[%s9883_s2 + $0x8] sm:$0xff]   ;;  %v1047_v25 = vld [vmem:[%s9884_s3 + $0x30] sm:$0xff]  ;;  %v4813_v27 = vld [vmem:[%s9883_s2 + $0xb8] sm:$0xff]  }
  0x44   : > { %v4812_v26 = vld [vmem:[%s9883_s2 + $0x10] sm:$0xff]   ;;  %v1050_v28 = vld [vmem:[%s9884_s3 + $0x48] sm:$0xff]  ;;  %v1049_v29 = vld [vmem:[%s9884_s3 + $0x40] sm:$0xff] }
  0x45   : > { %691 = vmatpush1.bf16.msra.mxu0 %v429_v13  ;;  %4614 = vmatpush1.bf16.msra.mxu1 %v429_v13  ;;  %v1052_v30 = vld [vmem:[%s9884_s3 + $0x58] sm:$0xff]  ;;  %v1051_v31 = vld [vmem:[%s9884_s3 + $0x50] sm:$0xff]  ;;  %v1054_v32 = vld [vmem:[%s9884_s3 + $0x68] sm:$0xff] }
  0x46   : > { %v4814_v33 = vld [vmem:[%s9883_s2 + $0x18] sm:$0xff]   ;;  %v4815_v34 = vld [vmem:[%s9883_s2 + $0xc0] sm:$0xff]   ;;  %v1055_v37 = vld [vmem:[%s9884_s3 + $0x70] sm:$0xff] }
  0x47   : > { %1122 = vperm.xlu1 %4703, %v1044_v18   ;;  %1112 = vperm.xlu0 %4702, %v1042_v19   ;;  %v1053_v35 = vld [vmem:[%s9884_s3 + $0x60] sm:$0xff]  ;;  %v1056_v36 = vld [vmem:[%s9884_s3 + $0x78] sm:$0xff]  ;;  %v1058_v38 = vld [vmem:[%s9884_s3 + $0x88] sm:$0xff] }
  0x48   : > { %4182 = vmatmul.mubr.msk.bf16.vlgmr.msra.gmra.mrb[0].mxu0 %vm591_vm2, %v4808_v14  ;;  %4203 = vmatmul.mubr.msk.bf16.vlgmr.msra.gmra.mrb[0].mxu1 %vm591_vm2, %v4809_v15  ;;  %v4816_v39 = vld [vmem:[%s9883_s2 + $0x20] sm:$0xff]   ;;  %v4817_v40 = vld [vmem:[%s9883_s2 + $0xc8] sm:$0xff]   ;;  %v1060_v42 = vld [vmem:[%s9884_s3 + $0x98] sm:$0xff] }
  0x49   : > { %730 = vmatprep.mubr.bf16.mxu0 %v5091_v8  ;;  %940 = vmatprep.mubr.bf16.mxu1 %v5091_v8  ;;  %v1057_v41 = vld [vmem:[%s9884_s3 + $0x80] sm:$0xff]  ;;  %v1059_v43 = vld [vmem:[%s9884_s3 + $0x90] sm:$0xff]  ;;  %v4818_v44 = vld [vmem:[%s9883_s2 + $0x28] sm:$0xff]  }
  0x4a   : > { %v1062_v45 = vld [vmem:[%s9884_s3 + $0xa8] sm:$0xff]  ;;  %v4819_v46 = vld [vmem:[%s9883_s2 + $0xd0] sm:$0xff]   ;;  %v1061_v47 = vld [vmem:[%s9884_s3 + $0xa0] sm:$0xff] }
  0x4b   : > { %1132 = vperm.xlu1 %4703, %v1046_v20   ;;  %1127 = vperm.xlu0 %4702, %v1045_v23   ;;  %v1064_v48 = vld [vmem:[%s9884_s3 + $0xb8] sm:$0xff]  ;;  %v1063_v49 = vld [vmem:[%s9884_s3 + $0xb0] sm:$0xff]  ;;  %v1066_v52 = vld [vmem:[%s9884_s3 + $0xc8] sm:$0xff] }
  0x4c   : > { %v4820_v50 = vld [vmem:[%s9883_s2 + $0x30] sm:$0xff]   ;;  %v4821_v51 = vld [vmem:[%s9883_s2 + $0xd8] sm:$0xff]   ;;  %v1065_v53 = vld [vmem:[%s9884_s3 + $0xc0] sm:$0xff] }
  0x4d   : > { %v1068_v54 = vld [vmem:[%s9884_s3 + $0xd8] sm:$0xff]  ;;  %v1067_v55 = vld [vmem:[%s9884_s3 + $0xd0] sm:$0xff]  ;;  %v1070_v56 = vld [vmem:[%s9884_s3 + $0xe8] sm:$0xff] }
  0x4e   : > { %v4822_v57 = vld [vmem:[%s9883_s2 + $0x38] sm:$0xff]   ;;  %v4823_v58 = vld [vmem:[%s9883_s2 + $0xe0] sm:$0xff]   ;;  %v1071_v61 = vld [vmem:[%s9884_s3 + $0xf0] sm:$0xff] }
  0x4f   : > { %1142 = vperm.xlu1 %4703, %v1048_v24   ;;  %1137 = vperm.xlu0 %4702, %v1047_v25   ;;  %v1069_v59 = vld [vmem:[%s9884_s3 + $0xe0] sm:$0xff]  ;;  %v1072_v60 = vld [vmem:[%s9884_s3 + $0xf8] sm:$0xff]  ;;  %v1074_v62 = vld [vmem:[%s9884_s3 + $0x108] sm:$0xff] }
  0x50   : > { %4183 = vmatmul.mubr.msk.bf16.gmra.mrb[4].mxu0 %vm591_vm2, %v4810_v21  ;;  %4204 = vmatmul.mubr.msk.bf16.gmra.mrb[4].mxu1 %vm591_vm2, %v4811_v22  ;;  %v4824_v63 = vld [vmem:[%s9883_s2 + $0x40] sm:$0xff]   ;;  %v4825_v0 = vld [vmem:[%s9883_s2 + $0xe8] sm:$0xff]   ;;  %v1076_v2 = vld [vmem:[%s9884_s3 + $0x118] sm:$0xff] }
  0x51   : > { %740 = vmatprep.mubr.bf16.mxu0 %v5091_v8  ;;  %950 = vmatprep.mubr.bf16.mxu1 %v5091_v8  ;;  %v1073_v1 = vld [vmem:[%s9884_s3 + $0x100] sm:$0xff]  ;;  %v1075_v3 = vld [vmem:[%s9884_s3 + $0x110] sm:$0xff]  ;;  %v1078_v4 = vld [vmem:[%s9884_s3 + $0x128] sm:$0xff] }
  0x52   : > { %v4826_v5 = vld [vmem:[%s9883_s2 + $0x48] sm:$0xff]   ;;  %v4827_v6 = vld [vmem:[%s9883_s2 + $0xf0] sm:$0xff]   ;;  %v1077_v7 = vld [vmem:[%s9884_s3 + $0x120] sm:$0xff] }
  0x53   : > { %1152 = vperm.xlu1 %4703, %v1050_v28   ;;  %1147 = vperm.xlu0 %4702, %v1049_v29   ;;  %v1080_v9 = vld [vmem:[%s9884_s3 + $0x138] sm:$0xff]  ;;  %v1079_v10 = vld [vmem:[%s9884_s3 + $0x130] sm:$0xff]  ;;  %v1082_v11 = vld [vmem:[%s9884_s3 + $0x148] sm:$0xff] }
  0x54   : > { %v4828_v12 = vld [vmem:[%s9883_s2 + $0x50] sm:$0xff]   ;;  %v4829_v13 = vld [vmem:[%s9883_s2 + $0xf8] sm:$0xff]   ;;  %v1081_v14 = vld [vmem:[%s9884_s3 + $0x140] sm:$0xff] }
  0x55   : > { %v1084_v15 = vld [vmem:[%s9884_s3 + $0x158] sm:$0xff]  ;;  %v1083_v16 = vld [vmem:[%s9884_s3 + $0x150] sm:$0xff]  ;;  %v1086_v17 = vld [vmem:[%s9884_s3 + $0x168] sm:$0xff] }
  0x56   : > { %v4830_v18 = vld [vmem:[%s9883_s2 + $0x58] sm:$0xff]   ;;  %v1085_v19 = vld [vmem:[%s9884_s3 + $0x160] sm:$0xff]  ;;  %v1087_v21 = vld [vmem:[%s9884_s3 + $0x170] sm:$0xff] }
  0x57   : > { %1162 = vperm.xlu1 %4703, %v1052_v30   ;;  %1157 = vperm.xlu0 %4702, %v1051_v31   ;;  %v1088_v20 = vld [vmem:[%s9884_s3 + $0x178] sm:$0xff]  ;;  %v1090_v22 = vld [vmem:[%s9884_s3 + $0x188] sm:$0xff]  ;;  %v4831_v23 = vld [vmem:[%s9883_s2 + $0x60] sm:$0xff]  }
  0x58   : > { %4184 = vmatmul.mubr.msk.bf16.gmra.mrb[8].mxu0 %vm591_vm2, %v4812_v26  ;;  %4205 = vmatmul.mubr.msk.bf16.gmra.mrb[8].mxu1 %vm591_vm2, %v4813_v27  ;;  %v1089_v24 = vld [vmem:[%s9884_s3 + $0x180] sm:$0xff]  ;;  %v1092_v25 = vld [vmem:[%s9884_s3 + $0x198] sm:$0xff]  ;;  %v1091_v26 = vld [vmem:[%s9884_s3 + $0x190] sm:$0xff] }
  0x59   : > { %750 = vmatprep.mubr.bf16.mxu0 %v5091_v8  ;;  %960 = vmatprep.mubr.bf16.mxu1 %v5091_v8  ;;  %v1094_v27 = vld [vmem:[%s9884_s3 + $0x1a8] sm:$0xff]  ;;  %v1093_v29 = vld [vmem:[%s9884_s3 + $0x1a0] sm:$0xff]  ;;  %v1096_v30 = vld [vmem:[%s9884_s3 + $0x1b8] sm:$0xff] }
  0x5a   : > { %v4832_v28 = vld [vmem:[%s9883_s2 + $0x68] sm:$0xff]   ;;  %v1095_v31 = vld [vmem:[%s9884_s3 + $0x1b0] sm:$0xff] }
  0x5b   : > { %1172 = vperm.xlu1 %4703, %v1054_v32   ;;  %1167 = vperm.xlu0 %4702, %v1053_v35   ;;  %v1098_v32 = vld [vmem:[%s9884_s3 + $0x1c8] sm:$0xff]  ;;  %v1100_v35 = vld [vmem:[%s9884_s3 + $0x1d8] sm:$0xff] }
  0x5f   : > { %1182 = vperm.xlu1 %4703, %v1056_v36   ;;  %1177 = vperm.xlu0 %4702, %v1055_v37   ;;  %v1099_v36 = vld [vmem:[%s9884_s3 + $0x1d0] sm:$0xff]  ;;  %v1102_v37 = vld [vmem:[%s9884_s3 + $0x1e8] sm:$0xff] }
  0x60   : > { %4185 = vmatmul.mubr.msk.bf16.gmra.mrb[12].mxu0 %vm591_vm2, %v4814_v33  ;;  %4206 = vmatmul.mubr.msk.bf16.gmra.mrb[12].mxu1 %vm591_vm2, %v4815_v34  ;;  %v4833_v33 = vld [vmem:[%s9883_s2 + $0x70] sm:$0xff]   ;;  %v1097_v34 = vld [vmem:[%s9884_s3 + $0x1c0] sm:$0xff] }
  0x61   : > { %760 = vmatprep.mubr.bf16.mxu0 %v5091_v8  ;;  %970 = vmatprep.mubr.bf16.mxu1 %v5091_v8 }
  0x63   : > { %1192 = vperm.xlu1 %4703, %v1058_v38   ;;  %1187 = vperm.xlu0 %4702, %v1057_v41   ;;  %v4834_v38 = vld [vmem:[%s9883_s2 + $0x78] sm:$0xff]   ;;  %v1103_v41 = vld [vmem:[%s9884_s3 + $0x1f0] sm:$0xff] }
  0x67   : > { %1202 = vperm.xlu1 %4703, %v1060_v42   ;;  %1197 = vperm.xlu0 %4702, %v1059_v43   ;;  %v4835_v42 = vld [vmem:[%s9883_s2 + $0x80] sm:$0xff]   ;;  %v4836_v43 = vld [vmem:[%s9883_s2 + $0x88] sm:$0xff]  }
  0x68   : > { %4186 = vmatmul.mubr.msk.bf16.gmra.mrb[16].mxu0 %vm591_vm2, %v4816_v39  ;;  %4207 = vmatmul.mubr.msk.bf16.gmra.mrb[16].mxu1 %vm591_vm2, %v4817_v40  ;;  %v1101_v39 = vld [vmem:[%s9884_s3 + $0x1e0] sm:$0xff]  ;;  %v1104_v40 = vld [vmem:[%s9884_s3 + $0x1f8] sm:$0xff] }
  0x69   : > { %770 = vmatprep.mubr.bf16.mxu0 %v5091_v8  ;;  %980 = vmatprep.mubr.bf16.mxu1 %v5091_v8 }
  0x6b   : > { %1212 = vperm.xlu1 %4703, %v1062_v45   ;;  %1207 = vperm.xlu0 %4702, %v1061_v47   ;;  %v4838_v45 = vld [vmem:[%s9883_s2 + $0x98] sm:$0xff]  }
  0x6f   : > { %1222 = vperm.xlu1 %4703, %v1064_v48   ;;  %1217 = vperm.xlu0 %4702, %v1063_v49  }
  0x70   : > { %4187 = vmatmul.mubr.msk.bf16.gmra.mrb[20].mxu0 %vm591_vm2, %v4818_v44  ;;  %4208 = vmatmul.mubr.msk.bf16.gmra.mrb[20].mxu1 %vm591_vm2, %v4819_v46  ;;  %v4837_v44 = vld [vmem:[%s9883_s2 + $0x90] sm:$0xff]  }
  0x71   : > { %780 = vmatprep.mubr.bf16.mxu0 %v5091_v8  ;;  %990 = vmatprep.mubr.bf16.mxu1 %v5091_v8 }
  0x73   : > { %1232 = vperm.xlu1 %4703, %v1066_v52   ;;  %1227 = vperm.xlu0 %4702, %v1065_v53  }
  0x77   : > { %1242 = vperm.xlu1 %4703, %v1068_v54   ;;  %1237 = vperm.xlu0 %4702, %v1067_v55  }
  0x78   : > { %4188 = vmatmul.mubr.msk.bf16.gmra.mrb[24].mxu0 %vm591_vm2, %v4820_v50  ;;  %4209 = vmatmul.mubr.msk.bf16.gmra.mrb[24].mxu1 %vm591_vm2, %v4821_v51  ;;  %v4839_v50 = vld [vmem:[%s9883_s2 + $0xa0] sm:$0xff]  }
  0x79   : > { %790 = vmatprep.mubr.bf16.mxu0 %v5091_v8  ;;  %1000 = vmatprep.mubr.bf16.mxu1 %v5091_v8 }
  0x7b   : > { %1252 = vperm.xlu1 %4703, %v1070_v56   ;;  %1247 = vperm.xlu0 %4702, %v1069_v59  }
  0x7f   : > { %1262 = vperm.xlu1 %4703, %v1072_v60   ;;  %1257 = vperm.xlu0 %4702, %v1071_v61  }
  0x80   : > { %4189 = vmatmul.mubr.msk.bf16.gmra.mrb[28].mxu0 %vm591_vm2, %v4822_v57  ;;  %4210 = vmatmul.mubr.msk.bf16.gmra.mrb[28].mxu1 %vm591_vm2, %v4823_v58 }
  0x81   : > { %800 = vmatprep.mubr.bf16.mxu0 %v5091_v8  ;;  %1010 = vmatprep.mubr.bf16.mxu1 %v5091_v8 }
  0x83   : > { %1272 = vperm.xlu1 %4703, %v1074_v62   ;;  %1267 = vperm.xlu0 %4702, %v1073_v1  }
  0x87   : > { %1282 = vperm.xlu1 %4703, %v1076_v2   ;;  %1277 = vperm.xlu0 %4702, %v1075_v3  }
  0x88   : > { %4190 = vmatmul.mubr.msk.bf16.gmra.mrb[32].mxu0 %vm591_vm2, %v4824_v63  ;;  %4211 = vmatmul.mubr.msk.bf16.gmra.mrb[32].mxu1 %vm591_vm2, %v4825_v0 }
  0x89   : > { %810 = vmatprep.mubr.bf16.mxu0 %v5091_v8  ;;  %1020 = vmatprep.mubr.bf16.mxu1 %v5091_v8 }
  0x8b   : > { %1292 = vperm.xlu1 %4703, %v1078_v4   ;;  %1287 = vperm.xlu0 %4702, %v1077_v7  }
  0x8f   : > { %1302 = vperm.xlu1 %4703, %v1080_v9   ;;  %1297 = vperm.xlu0 %4702, %v1079_v10  }
  0x90   : > { %4191 = vmatmul.mubr.msk.bf16.gmra.mrb[36].mxu0 %vm591_vm2, %v4826_v5  ;;  %4212 = vmatmul.mubr.msk.bf16.gmra.mrb[36].mxu1 %vm591_vm2, %v4827_v6 }
  0x91   : > { %820 = vmatprep.mubr.bf16.mxu0 %v5091_v8  ;;  %1030 = vmatprep.mubr.bf16.mxu1 %v5091_v8 }
  0x93   : > { %1312 = vperm.xlu1 %4703, %v1082_v11   ;;  %1307 = vperm.xlu0 %4702, %v1081_v14  }
  0x97   : > { %1322 = vperm.xlu1 %4703, %v1084_v15   ;;  %1317 = vperm.xlu0 %4702, %v1083_v16  }
  0x98   : > { %4192 = vmatmul.mubr.msk.bf16.gmra.mrb[40].mxu0 %vm591_vm2, %v4828_v12  ;;  %4213 = vmatmul.mubr.msk.bf16.gmra.mrb[40].mxu1 %vm591_vm2, %v4829_v13 }
  0x99   : > { %830 = vmatprep.mubr.bf16.mxu0 %v5091_v8 }
  0x9b   : > { %1332 = vperm.xlu1 %4703, %v1086_v17   ;;  %1327 = vperm.xlu0 %4702, %v1085_v19  }
  0x9f   : > { %1342 = vperm.xlu1 %4703, %v1088_v20   ;;  %1337 = vperm.xlu0 %4702, %v1087_v21  }
  0xa0   : > { %4193 = vmatmul.mubr.msk.bf16.gmra.mrb[44].mxu0 %vm591_vm2, %v4830_v18 }
  0xa1   : > { %840 = vmatprep.mubr.bf16.mxu0 %v5091_v8 }
  0xa3   : > { %1352 = vperm.xlu1 %4703, %v1090_v22   ;;  %1347 = vperm.xlu0 %4702, %v1089_v24  }
  0xa7   : > { %1362 = vperm.xlu1 %4703, %v1092_v25   ;;  %1357 = vperm.xlu0 %4702, %v1091_v26  }
  0xa8   : > { %4194 = vmatmul.mubr.msk.bf16.gmra.mrb[48].mxu0 %vm591_vm2, %v4831_v23 }
  0xa9   : > { %850 = vmatprep.mubr.bf16.mxu0 %v5091_v8 }
  0xab   : > { %1372 = vperm.xlu1 %4703, %v1094_v27   ;;  %1367 = vperm.xlu0 %4702, %v1093_v29  }
  0xaf   : > { %1382 = vperm.xlu1 %4703, %v1096_v30   ;;  %1377 = vperm.xlu0 %4702, %v1095_v31  }
  0xb0   : > { %4195 = vmatmul.mubr.msk.bf16.gmra.mrb[52].mxu0 %vm591_vm2, %v4832_v28 }
  0xb1   : > { %860 = vmatprep.mubr.bf16.mxu0 %v5091_v8 }
  0xb3   : > { %1392 = vperm.xlu1 %4703, %v1098_v32   ;;  %1387 = vperm.xlu0 %4702, %v1097_v34  }
  0xb7   : > { %1402 = vperm.xlu1 %4703, %v1100_v35   ;;  %1397 = vperm.xlu0 %4702, %v1099_v36  }
  0xb8   : > { %4196 = vmatmul.mubr.msk.bf16.gmra.mrb[56].mxu0 %vm591_vm2, %v4833_v33 }
  0xb9   : > { %870 = vmatprep.mubr.bf16.mxu0 %v5091_v8 }
  0xbb   : > { %1412 = vperm.xlu1 %4703, %v1102_v37   ;;  %1407 = vperm.xlu0 %4702, %v1101_v39  }
  0xbf   : > { %1422 = vperm.xlu1 %4703, %v1104_v40   ;;  %1417 = vperm.xlu0 %4702, %v1103_v41  }
  0xc0   : > { %4197 = vmatmul.mubr.msk.bf16.gmra.mrb[60].mxu0 %vm591_vm2, %v4834_v38 }
  0xc1   : > { %880 = vmatprep.mubr.bf16.mxu0 %v5091_v8 }
  0xc2   : > { %v1118_v46 = vpop.permute.xlu1 %1117  ;;  %v1108_v47 = vpop.permute.xlu0 %1107 }
  0xc6   : > { %v1123_v48 = vpop.permute.xlu1 %1122  ;;  %v1113_v49 = vpop.permute.xlu0 %1112 }
  0xc8   : > { %4198 = vmatmul.mubr.msk.bf16.gmra.mrb[64].mxu0 %vm591_vm2, %v4835_v42 }
  0xc9   : > { %890 = vmatprep.mubr.bf16.mxu0 %v5091_v8 }
  0xca   : > { %v1133_v51 = vpop.permute.xlu1 %1132  ;;  %v1128_v52 = vpop.permute.xlu0 %1127 }
  0xce   : > { %v5701_v53 = vpop.permute.xlu1 %1142  ;;  %v5703_v54 = vpop.permute.xlu0 %1137 }
  0xd0   : > { %4199 = vmatmul.mubr.msk.bf16.gmra.mrb[68].mxu0 %vm591_vm2, %v4836_v43 }
  0xd1   : > { %900 = vmatprep.mubr.bf16.mxu0 %v5091_v8 }
  0xd2   : > { %v5705_v55 = vpop.permute.xlu1 %1152  ;;  %v5707_v56 = vpop.permute.xlu0 %1147 }
  0xd6   : > { %v5709_v57 = vpop.permute.xlu1 %1162 }
  0xd8   : > { %4200 = vmatmul.mubr.msk.bf16.gmra.mrb[72].mxu0 %vm591_vm2, %v4837_v44 }
  0xd9   : > { %910 = vmatprep.mubr.bf16.mxu0 %v5091_v8 }
  0xda   : > { %v5713_v58 = vpop.permute.xlu1 %1172 }
  0xde   : > { %v5717_v60 = vpop.permute.xlu1 %1182 }
  0xe0   : > { %4201 = vmatmul.mubr.msk.bf16.gmra.mrb[76].mxu0 %vm591_vm2, %v4838_v45 }
  0xe1   : > { %920 = vmatprep.mubr.bf16.mxu0 %v5091_v8  ;;  %v5711_v8 = vpop.permute.xlu0 %1157 }
  0xe2   : > { %v5721_v62 = vpop.permute.xlu1 %1192 }
  0xe5   : > { %v5715_v59 = vpop.permute.xlu0 %1167 }
  0xe6   : > { %v5725_v0 = vpop.permute.xlu1 %1202 }
  0xe8   : > { %4202 = vmatmul.mubr.msk.bf16.gmra.mrb[80].mxu0 %vm591_vm2, %v4839_v50 }
  0xe9   : > { %v5719_v61 = vpop.permute.xlu0 %1177 }
  0xea   : > { %v5729_v2 = vpop.permute.xlu1 %1212 }
  0xed   : > { %v5723_v63 = vpop.permute.xlu0 %1187 }
  0xee   : > { %v5741_v13 = vpop.permute.xlu1 %1222 }
  0xf1   : > { %v5727_v1 = vpop.permute.xlu0 %1197 }
  0xf2   : > { %v5777_v35 = vpop.permute.xlu1 %1232 }
  0xf5   : > { %v5731_v3 = vpop.permute.xlu0 %1207 }
  0xf9   : > { %v5743_v14 = vpop.permute.xlu0 %1217 }
  0xfd   : > { %v5779_v36 = vpop.permute.xlu0 %1227 }
 0x11b   : > { %v722_v4 = vpop.f32.mrb[0].mxu0  ;;  %v5733_v5 = vpop.f32.mrb[0].mxu1 }
 0x11c   : > { %v724_v6 = vpop.f32.mrb[1].mxu0  ;;  %v5735_v7 = vpop.f32.mrb[1].mxu1  ;;  %v5747_v17 = vsub.f32 %v1108_v47, %v722_v4 }
 0x11d   : > { %v726_v9 = vpop.f32.mrb[2].mxu0  ;;  %v5737_v11 = vpop.f32.mrb[2].mxu1  ;;  %v5753_v21 = vsub.f32 %v1108_v47, %v724_v6 }
 0x11e   : > { %v728_v10 = vpop.f32.mrb[3].mxu0  ;;  %v5739_v12 = vpop.f32.mrb[3].mxu1  ;;  %10363 = vst [vmem:[#allocation13_spill] sm:$0xff] %v5747_v17  ;;  %v5757_v24 = vsub.f32 %v1113_v49, %v726_v9 }
 0x11f   : > { %10365 = vst [vmem:[#allocation15_spill] sm:$0xff] %v5753_v21  ;;  %v5763_v28 = vsub.f32 %v1113_v49, %v728_v10  ;;  %v5803_v9 = vpop.permute.xlu0 %1237 }
 0x120   : > { %10367 = vst [vmem:[#allocation17_spill] sm:$0xff] %v5757_v24 }
 0x121   : > { %10369 = vst [vmem:[#allocation19_spill] sm:$0xff] %v5763_v28 }
 0x123   : > { %v732_v15 = vpop.f32.mrb[4].mxu0  ;;  %v5745_v16 = vpop.f32.mrb[4].mxu1 }
 0x124   : > { %v5749_v18 = vsub.f32 %v1118_v46, %v732_v15  ;;  %v734_v19 = vpop.f32.mrb[5].mxu0  ;;  %v5751_v20 = vpop.f32.mrb[5].mxu1 }
 0x125   : > { %v5755_v22 = vsub.f32 %v1118_v46, %v734_v19  ;;  %v736_v23 = vpop.f32.mrb[6].mxu0  ;;  %v5769_v31 = vpop.f32.mrb[6].mxu1 }
 0x126   : > { %10364 = vst [vmem:[#allocation14_spill] sm:$0xff] %v5749_v18  ;;  %v1553_v25 = vmin.f32 %v5747_v17, %v5749_v18  ;;  %v5761_v26 = vsub.f32 %v1123_v48, %v736_v23  ;;  %v738_v27 = vpop.f32.mrb[7].mxu0  ;;  %v5773_v33 = vpop.f32.mrb[7].mxu1 }
 0x127   : > { %10366 = vst [vmem:[#allocation16_spill] sm:$0xff] %v5755_v22  ;;  %v1622_v29 = vmin.f32 %v5753_v21, %v5755_v22  ;;  %v5767_v30 = vsub.f32 %v1123_v48, %v738_v27 }
 0x128   : > { %10368 = vst [vmem:[#allocation18_spill] sm:$0xff] %v5761_v26  ;;  %v1554_v32 = vmin.f32 %v5757_v24, %v5761_v26 }
 0x129   : > { %10370 = vst [vmem:[#allocation20_spill] sm:$0xff] %v5767_v30  ;;  %v1623_v34 = vmin.f32 %v5763_v28, %v5767_v30 }
 0x12b   : > { %v742_v37 = vpop.f32.mrb[8].mxu0  ;;  %v5781_v38 = vpop.f32.mrb[8].mxu1 }
 0x12c   : > { %v5783_v39 = vsub.f32 %v1128_v52, %v742_v37  ;;  %v744_v40 = vpop.f32.mrb[9].mxu0  ;;  %v5785_v41 = vpop.f32.mrb[9].mxu1 }
 0x12d   : > { %v5787_v42 = vsub.f32 %v1128_v52, %v744_v40  ;;  %v746_v43 = vpop.f32.mrb[10].mxu0  ;;  %v5789_v44 = vpop.f32.mrb[10].mxu1 }
 0x12e   : > { %10371 = vst [vmem:[#allocation21_spill] sm:$0xff] %v5783_v39  ;;  %v1555_v45 = vmin.f32 %v1553_v25, %v5783_v39  ;;  %v5792_v46 = vsub.f32 %v1133_v51, %v746_v43  ;;  %v748_v47 = vpop.f32.mrb[11].mxu0  ;;  %v5797_v50 = vpop.f32.mrb[11].mxu1 }
 0x12f   : > { %10372 = vst [vmem:[#allocation22_spill] sm:$0xff] %v5787_v42  ;;  %v1624_v48 = vmin.f32 %v1622_v29, %v5787_v42  ;;  %v5795_v49 = vsub.f32 %v1133_v51, %v748_v47  ;;  %v5801_v52 = vpop.permute.xlu1 %1242 }
 0x130   : > { %10373 = vst [vmem:[#allocation23_spill] sm:$0xff] %v5792_v46  ;;  %v1556_v4 = vmin.f32 %v1554_v32, %v5792_v46 }
 0x131   : > { %10374 = vst [vmem:[#allocation24_spill] sm:$0xff] %v5795_v49  ;;  %v1625_v6 = vmin.f32 %v1623_v34, %v5795_v49  ;;  %v5831_v49 = vpop.permute.xlu0 %1247 }
 0x133   : > { %v752_v10 = vpop.f32.mrb[12].mxu0  ;;  %v5805_v15 = vpop.f32.mrb[12].mxu1 }
 0x134   : > { %v5808_v19 = vsub.f32 %v5703_v54, %v752_v10  ;;  %v754_v23 = vpop.f32.mrb[13].mxu0  ;;  %v5810_v25 = vpop.f32.mrb[13].mxu1 }
 0x135   : > { %v5813_v51 = vsub.f32 %v5703_v54, %v754_v23  ;;  %v756_v27 = vpop.f32.mrb[14].mxu0  ;;  %v5815_v29 = vpop.f32.mrb[14].mxu1 }
 0x136   : > { %10375 = vst [vmem:[#allocation25_spill] sm:$0xff] %v5808_v19  ;;  %v1557_v32 = vmin.f32 %v1555_v45, %v5808_v19  ;;  %v5819_v34 = vsub.f32 %v5701_v53, %v756_v27  ;;  %v758_v37 = vpop.f32.mrb[15].mxu0  ;;  %v5825_v47 = vpop.f32.mrb[15].mxu1 }
 0x137   : > { %10376 = vst [vmem:[#allocation26_spill] sm:$0xff] %v5813_v51  ;;  %v1626_v40 = vmin.f32 %v1624_v48, %v5813_v51  ;;  %v5823_v43 = vsub.f32 %v5701_v53, %v758_v37  ;;  %v5829_v23 = vpop.permute.xlu1 %1252 }
 0x138   : > { %10377 = vst [vmem:[#allocation27_spill] sm:$0xff] %v5819_v34  ;;  %v1558_v10 = vmin.f32 %v1556_v4, %v5819_v34  ;;  %v5859_v34 = vpop.permute.xlu0 %1257 }
 0x139   : > { %10378 = vst [vmem:[#allocation28_spill] sm:$0xff] %v5823_v43  ;;  %v1627_v54 = vmin.f32 %v1625_v6, %v5823_v43 }
 0x13b   : > { %v762_v45 = vpop.f32.mrb[16].mxu0  ;;  %v5833_v42 = vpop.f32.mrb[16].mxu1 }
 0x13c   : > { %v5836_v27 = vsub.f32 %v5707_v56, %v762_v45  ;;  %v764_v48 = vpop.f32.mrb[17].mxu0  ;;  %v5838_v51 = vpop.f32.mrb[17].mxu1 }
 0x13d   : > { %v5841_v53 = vsub.f32 %v5707_v56, %v764_v48  ;;  %v766_v37 = vpop.f32.mrb[18].mxu0  ;;  %v5843_v4 = vpop.f32.mrb[18].mxu1 }
 0x13e   : > { %10379 = vst [vmem:[#allocation29_spill] sm:$0xff] %v5836_v27  ;;  %v1559_v6 = vmin.f32 %v1557_v32, %v5836_v27  ;;  %v5847_v43 = vsub.f32 %v5705_v55, %v766_v37  ;;  %v768_v30 = vpop.f32.mrb[19].mxu0  ;;  %v5849_v22 = vpop.f32.mrb[19].mxu1 }
 0x13f   : > { %10380 = vst [vmem:[#allocation30_spill] sm:$0xff] %v5841_v53  ;;  %v1628_v45 = vmin.f32 %v1626_v40, %v5841_v53  ;;  %v5853_v28 = vsub.f32 %v5705_v55, %v768_v30  ;;  %v5857_v48 = vpop.permute.xlu1 %1262  ;;  %v5887_v26 = vpop.permute.xlu0 %1267 }
 0x140   : > { %10381 = vst [vmem:[#allocation31_spill] sm:$0xff] %v5847_v43  ;;  %v1560_v21 = vmin.f32 %v1558_v10, %v5847_v43 }
 0x141   : > { %10382 = vst [vmem:[#allocation32_spill] sm:$0xff] %v5853_v28  ;;  %v1629_v56 = vmin.f32 %v1627_v54, %v5853_v28 }
 0x143   : > { %v772_v32 = vpop.f32.mrb[20].mxu0  ;;  %v5861_v27 = vpop.f32.mrb[20].mxu1 }
 0x144   : > { %v5864_v37 = vsub.f32 %v5711_v8, %v772_v32  ;;  %v774_v19 = vpop.f32.mrb[21].mxu0  ;;  %v5866_v46 = vpop.f32.mrb[21].mxu1 }
 0x145   : > { %v5869_v55 = vsub.f32 %v5711_v8, %v774_v19  ;;  %v776_v30 = vpop.f32.mrb[22].mxu0  ;;  %v5871_v40 = vpop.f32.mrb[22].mxu1 }
 0x146   : > { %10383 = vst [vmem:[#allocation33_spill] sm:$0xff] %v5864_v37  ;;  %v1561_v10 = vmin.f32 %v1559_v6, %v5864_v37  ;;  %v5875_v54 = vsub.f32 %v5709_v57, %v776_v30  ;;  %v778_v28 = vpop.f32.mrb[23].mxu0  ;;  %v5877_v53 = vpop.f32.mrb[23].mxu1 }
 0x147   : > { %10384 = vst [vmem:[#allocation34_spill] sm:$0xff] %v5869_v55  ;;  %v1630_v32 = vmin.f32 %v1628_v45, %v5869_v55  ;;  %v5881_v43 = vsub.f32 %v5709_v57, %v778_v28  ;;  %v5885_v19 = vpop.permute.xlu1 %1272 }
 0x148   : > { %10385 = vst [vmem:[#allocation35_spill] sm:$0xff] %v5875_v54  ;;  %v1562_v39 = vmin.f32 %v1560_v21, %v5875_v54  ;;  %10387 = vst [vmem:[#allocation37_spill] sm:$0xff] %v5885_v19 }
 0x149   : > { %10386 = vst [vmem:[#allocation36_spill] sm:$0xff] %v5881_v43  ;;  %v1631_v8 = vmin.f32 %v1629_v56, %v5881_v43 }
 0x14b   : > { %v782_v6 = vpop.f32.mrb[24].mxu0  ;;  %v5889_v37 = vpop.f32.mrb[24].mxu1 }
 0x14c   : > { %v5892_v30 = vsub.f32 %v5715_v59, %v782_v6  ;;  %v784_v18 = vpop.f32.mrb[25].mxu0  ;;  %v5894_v24 = vpop.f32.mrb[25].mxu1 }
 0x14d   : > { %v5897_v57 = vsub.f32 %v5715_v59, %v784_v18  ;;  %v786_v28 = vpop.f32.mrb[26].mxu0  ;;  %v5899_v21 = vpop.f32.mrb[26].mxu1 }
 0x14e   : > { %10388 = vst [vmem:[#allocation38_spill] sm:$0xff] %v5892_v30  ;;  %10390 = vst [vmem:[#allocation40_spill] sm:$0xff] %v5899_v21  ;;  %v1563_v45 = vmin.f32 %v1561_v10, %v5892_v30  ;;  %v5903_v56 = vsub.f32 %v5713_v58, %v786_v28  ;;  %v788_v43 = vpop.f32.mrb[27].mxu0  ;;  %v5905_v55 = vpop.f32.mrb[27].mxu1 }
 0x14f   : > { %10389 = vst [vmem:[#allocation39_spill] sm:$0xff] %v5897_v57  ;;  %10392 = vst [vmem:[#allocation42_spill] sm:$0xff] %v5905_v55  ;;  %v1632_v6 = vmin.f32 %v1630_v32, %v5897_v57  ;;  %v5909_v54 = vsub.f32 %v5713_v58, %v788_v43  ;;  %v5913_v18 = vpop.permute.xlu1 %1282  ;;  %v5915_v21 = vpop.permute.xlu0 %1277 }
 0x150   : > { %10391 = vst [vmem:[#allocation41_spill] sm:$0xff] %v5903_v56  ;;  %v1564_v17 = vmin.f32 %v1562_v39, %v5903_v56  ;;  %10394 = vst [vmem:[#allocation44_spill] sm:$0xff] %v5913_v18 }
 0x151   : > { %10393 = vst [vmem:[#allocation43_spill] sm:$0xff] %v5909_v54  ;;  %v1633_v59 = vmin.f32 %v1631_v8, %v5909_v54  ;;  %10395 = vst [vmem:[#allocation45_spill] sm:$0xff] %v5915_v21 }
 0x153   : > { %v792_v10 = vpop.f32.mrb[28].mxu0  ;;  %v5917_v30 = vpop.f32.mrb[28].mxu1 }
 0x154   : > { %v5920_v28 = vsub.f32 %v5719_v61, %v792_v10  ;;  %v794_v55 = vpop.f32.mrb[29].mxu0  ;;  %v5922_v19 = vpop.f32.mrb[29].mxu1 }
 0x155   : > { %v5925_v58 = vsub.f32 %v5719_v61, %v794_v55  ;;  %v796_v43 = vpop.f32.mrb[30].mxu0  ;;  %v5927_v39 = vpop.f32.mrb[30].mxu1 }
 0x156   : > { %10396 = vst [vmem:[#allocation46_spill] sm:$0xff] %v5920_v28  ;;  %10398 = vst [vmem:[#allocation48_spill] sm:$0xff] %v5927_v39  ;;  %v1565_v32 = vmin.f32 %v1563_v45, %v5920_v28  ;;  %v5931_v8 = vsub.f32 %v5717_v60, %v796_v43  ;;  %v798_v54 = vpop.f32.mrb[31].mxu0  ;;  %v5933_v57 = vpop.f32.mrb[31].mxu1 }
 0x157   : > { %10397 = vst [vmem:[#allocation47_spill] sm:$0xff] %v5925_v58  ;;  %10400 = vst [vmem:[#allocation50_spill] sm:$0xff] %v5933_v57  ;;  %v1634_v10 = vmin.f32 %v1632_v6, %v5925_v58  ;;  %v5937_v56 = vsub.f32 %v5717_v60, %v798_v54  ;;  %v5941_v55 = vpop.permute.xlu1 %1292  ;;  %v5943_v39 = vpop.permute.xlu0 %1287 }
 0x158   : > { %10399 = vst [vmem:[#allocation49_spill] sm:$0xff] %v5931_v8  ;;  %v1566_v18 = vmin.f32 %v1564_v17, %v5931_v8  ;;  %10402 = vst [vmem:[#allocation52_spill] sm:$0xff] %v5941_v55 }
 0x159   : > { %10401 = vst [vmem:[#allocation51_spill] sm:$0xff] %v5937_v56  ;;  %v1635_v61 = vmin.f32 %v1633_v59, %v5937_v56  ;;  %10403 = vst [vmem:[#allocation53_spill] sm:$0xff] %v5943_v39 }
 0x15b   : > { %v802_v45 = vpop.f32.mrb[32].mxu0  ;;  %v5945_v28 = vpop.f32.mrb[32].mxu1 }
 0x15c   : > { %v5948_v43 = vsub.f32 %v5723_v63, %v802_v45  ;;  %v804_v57 = vpop.f32.mrb[33].mxu0  ;;  %v5950_v21 = vpop.f32.mrb[33].mxu1 }
 0x15d   : > { %v5953_v60 = vsub.f32 %v5723_v63, %v804_v57  ;;  %v806_v54 = vpop.f32.mrb[34].mxu0  ;;  %v5955_v17 = vpop.f32.mrb[34].mxu1 }
 0x15e   : > { %10404 = vst [vmem:[#allocation54_spill] sm:$0xff] %v5948_v43  ;;  %10406 = vst [vmem:[#allocation56_spill] sm:$0xff] %v5955_v17  ;;  %v1567_v6 = vmin.f32 %v1565_v32, %v5948_v43  ;;  %v5959_v59 = vsub.f32 %v5721_v62, %v806_v54  ;;  %v808_v56 = vpop.f32.mrb[35].mxu0  ;;  %v5961_v58 = vpop.f32.mrb[35].mxu1 }
 0x15f   : > { %10405 = vst [vmem:[#allocation55_spill] sm:$0xff] %v5953_v60  ;;  %10408 = vst [vmem:[#allocation58_spill] sm:$0xff] %v5961_v58  ;;  %v1636_v45 = vmin.f32 %v1634_v10, %v5953_v60  ;;  %v5965_v8 = vsub.f32 %v5721_v62, %v808_v56  ;;  %v5969_v57 = vpop.permute.xlu1 %1302  ;;  %v5971_v17 = vpop.permute.xlu0 %1297 }
 0x160   : > { %10407 = vst [vmem:[#allocation57_spill] sm:$0xff] %v5959_v59  ;;  %v1568_v55 = vmin.f32 %v1566_v18, %v5959_v59  ;;  %10410 = vst [vmem:[#allocation60_spill] sm:$0xff] %v5969_v57 }
 0x161   : > { %10409 = vst [vmem:[#allocation59_spill] sm:$0xff] %v5965_v8  ;;  %v1637_v63 = vmin.f32 %v1635_v61, %v5965_v8  ;;  %10411 = vst [vmem:[#allocation61_spill] sm:$0xff] %v5971_v17 }
 0x163   : > { %v812_v32 = vpop.f32.mrb[36].mxu0  ;;  %v5973_v43 = vpop.f32.mrb[36].mxu1 }
 0x164   : > { %v5976_v54 = vsub.f32 %v5727_v1, %v812_v32  ;;  %v814_v58 = vpop.f32.mrb[37].mxu0  ;;  %v5978_v39 = vpop.f32.mrb[37].mxu1 }
 0x165   : > { %v5981_v62 = vsub.f32 %v5727_v1, %v814_v58  ;;  %v816_v56 = vpop.f32.mrb[38].mxu0  ;;  %v5983_v18 = vpop.f32.mrb[38].mxu1 }
 0x166   : > { %10412 = vst [vmem:[#allocation62_spill] sm:$0xff] %v5976_v54  ;;  %10414 = vst [vmem:[#allocation64_spill] sm:$0xff] %v5983_v18  ;;  %v1569_v10 = vmin.f32 %v1567_v6, %v5976_v54  ;;  %v5987_v61 = vsub.f32 %v5725_v0, %v816_v56  ;;  %v818_v8 = vpop.f32.mrb[39].mxu0  ;;  %v5989_v60 = vpop.f32.mrb[39].mxu1 }
 0x167   : > { %10413 = vst [vmem:[#allocation63_spill] sm:$0xff] %v5981_v62  ;;  %10416 = vst [vmem:[#allocation66_spill] sm:$0xff] %v5989_v60  ;;  %v1638_v32 = vmin.f32 %v1636_v45, %v5981_v62  ;;  %v5993_v59 = vsub.f32 %v5725_v0, %v818_v8  ;;  %v5997_v58 = vpop.permute.xlu1 %1312  ;;  %v5999_v17 = vpop.permute.xlu0 %1307 }
 0x168   : > { %10415 = vst [vmem:[#allocation65_spill] sm:$0xff] %v5987_v61  ;;  %v1570_v57 = vmin.f32 %v1568_v55, %v5987_v61  ;;  %10418 = vst [vmem:[#allocation68_spill] sm:$0xff] %v5997_v58 }
 0x169   : > { %10417 = vst [vmem:[#allocation67_spill] sm:$0xff] %v5993_v59  ;;  %v1639_v1 = vmin.f32 %v1637_v63, %v5993_v59  ;;  %10419 = vst [vmem:[#allocation69_spill] sm:$0xff] %v5999_v17 }
 0x16b   : > { %v822_v6 = vpop.f32.mrb[40].mxu0  ;;  %v6001_v54 = vpop.f32.mrb[40].mxu1 }
 0x16c   : > { %v6004_v56 = vsub.f32 %v5731_v3, %v822_v6  ;;  %v824_v18 = vpop.f32.mrb[41].mxu0  ;;  %v6006_v60 = vpop.f32.mrb[41].mxu1 }
 0x16d   : > { %v6009_v0 = vsub.f32 %v5731_v3, %v824_v18  ;;  %v826_v8 = vpop.f32.mrb[42].mxu0  ;;  %v6011_v55 = vpop.f32.mrb[42].mxu1 }
 0x16e   : > { %10420 = vst [vmem:[#allocation70_spill] sm:$0xff] %v6004_v56  ;;  %10422 = vst [vmem:[#allocation72_spill] sm:$0xff] %v6011_v55  ;;  %v1571_v45 = vmin.f32 %v1569_v10, %v6004_v56  ;;  %v6015_v63 = vsub.f32 %v5729_v2, %v826_v8  ;;  %v828_v59 = vpop.f32.mrb[43].mxu0  ;;  %v6017_v62 = vpop.f32.mrb[43].mxu1 }
 0x16f   : > { %10421 = vst [vmem:[#allocation71_spill] sm:$0xff] %v6009_v0  ;;  %v1640_v6 = vmin.f32 %v1638_v32, %v6009_v0  ;;  %v6021_v61 = vsub.f32 %v5729_v2, %v828_v59  ;;  %v1318_v3 = vpop.permute.xlu0 %1317  ;;  %v1323_v17 = vpop.permute.xlu1 %1322 }
 0x170   : > { %10423 = vst [vmem:[#allocation73_spill] sm:$0xff] %v6015_v63  ;;  %v1572_v58 = vmin.f32 %v1570_v57, %v6015_v63  ;;  %v6026_v10 = vsub.f32 %v1318_v3, %v5735_v7  ;;  %v6029_v8 = vsub.f32 %v1323_v17, %v5739_v12  ;;  %v6035_v2 = vsub.f32 %v1318_v3, %v5733_v5 }
 0x171   : > { %10424 = vst [vmem:[#allocation74_spill] sm:$0xff] %v6021_v61  ;;  %v1641_v18 = vmin.f32 %v1639_v1, %v6021_v61  ;;  %v6038_v59 = vsub.f32 %v1323_v17, %v5737_v11 }
 0x172   : > { %10425 = vst [vmem:[#allocation75_spill] sm:$0xff] %v6026_v10  ;;  %10426 = vst [vmem:[#allocation76_spill] sm:$0xff] %v6029_v8  ;;  %v1662_v5 = vmin.f32 %v6029_v8, %v6026_v10 }
 0x173   : > { %v832_v55 = vpop.f32.mrb[44].mxu0  ;;  %10427 = vst [vmem:[#allocation77_spill] sm:$0xff] %v6035_v2  ;;  %10428 = vst [vmem:[#allocation78_spill] sm:$0xff] %v6038_v59  ;;  %v1328_v0 = vpop.permute.xlu0 %1327  ;;  %v1593_v17 = vmin.f32 %v6038_v59, %v6035_v2  ;;  %v10544_v59 = vld [vmem:[#allocation65_spill] sm:$0xff] }
 0x174   : > { %v6032_v56 = vsub.f32 %v5743_v14, %v832_v55  ;;  %v834_v32 = vpop.f32.mrb[45].mxu0  ;;  %v6054_v11 = vsub.f32 %v1328_v0, %v5751_v20 }
 0x175   : > { %v6041_v57 = vsub.f32 %v5743_v14, %v834_v32  ;;  %v836_v1 = vpop.f32.mrb[46].mxu0  ;;  %v10545_v2 = vld [vmem:[#allocation70_spill] sm:$0xff] }
 0x176   : > { %v1573_v7 = vmin.f32 %v1571_v45, %v6032_v56  ;;  %v6045_v61 = vsub.f32 %v5741_v13, %v836_v1  ;;  %v838_v12 = vpop.f32.mrb[47].mxu0  ;;  %10431 = vst [vmem:[#allocation81_spill] sm:$0xff] %v6054_v11  ;;  %v6060_v45 = vsub.f32 %v1328_v0, %v5745_v16 }
 0x177   : > { %10429 = vst [vmem:[#allocation79_spill] sm:$0xff] %v6041_v57  ;;  %v1642_v55 = vmin.f32 %v1640_v6, %v6041_v57  ;;  %v6049_v63 = vsub.f32 %v5741_v13, %v838_v12  ;;  %v1333_v6 = vpop.permute.xlu1 %1332  ;;  %v1664_v13 = vmin.f32 %v1662_v5, %v6054_v11  ;;  %v1338_v11 = vpop.permute.xlu0 %1337 }
 0x178   : > { %v1574_v14 = vmin.f32 %v1572_v58, %v6045_v61  ;;  %10432 = vst [vmem:[#allocation82_spill] sm:$0xff] %v6060_v45  ;;  %v6065_v1 = vsub.f32 %v1333_v6, %v5773_v33  ;;  %v1595_v58 = vmin.f32 %v1593_v17, %v6060_v45  ;;  %v6072_v8 = vsub.f32 %v1333_v6, %v5769_v31 }
 0x179   : > { %10430 = vst [vmem:[#allocation80_spill] sm:$0xff] %v6049_v63  ;;  %v1643_v3 = vmin.f32 %v1641_v18, %v6049_v63  ;;  %v6087_v31 = vsub.f32 %v1338_v11, %v5785_v41 }
 0x17a   : > { %10433 = vst [vmem:[#allocation83_spill] sm:$0xff] %v6065_v1  ;;  %10435 = vst [vmem:[#allocation85_spill] sm:$0xff] %v6072_v8  ;;  %v1666_v17 = vmin.f32 %v1664_v13, %v6065_v1  ;;  %v1597_v6 = vmin.f32 %v1595_v58, %v6072_v8  ;;  %v10543_v8 = vld [vmem:[#allocation62_spill] sm:$0xff] }
 0x17b   : > { %v842_v32 = vpop.f32.mrb[48].mxu0  ;;  %10439 = vst [vmem:[#allocation89_spill] sm:$0xff] %v6087_v31 }
 0x17c   : > { %v6068_v20 = vsub.f32 %v5779_v36, %v842_v32  ;;  %v844_v12 = vpop.f32.mrb[49].mxu0 }
 0x17d   : > { %v6075_v16 = vsub.f32 %v5779_v36, %v844_v12  ;;  %v846_v0 = vpop.f32.mrb[50].mxu0 }
 0x17e   : > { %10434 = vst [vmem:[#allocation84_spill] sm:$0xff] %v6068_v20  ;;  %v1575_v18 = vmin.f32 %v1573_v7, %v6068_v20  ;;  %v6079_v5 = vsub.f32 %v5777_v35, %v846_v0  ;;  %v848_v33 = vpop.f32.mrb[51].mxu0  ;;  %v6092_v7 = vsub.f32 %v1338_v11, %v5781_v38  ;;  %v1343_v0 = vpop.permute.xlu1 %1342 }
 0x17f   : > { %10436 = vst [vmem:[#allocation86_spill] sm:$0xff] %v6075_v16  ;;  %v1644_v32 = vmin.f32 %v1642_v55, %v6075_v16  ;;  %v6083_v10 = vsub.f32 %v5777_v35, %v848_v33  ;;  %v1668_v55 = vmin.f32 %v1666_v17, %v6087_v31  ;;  %v6097_v35 = vsub.f32 %v1343_v0, %v5797_v50  ;;  %v1348_v17 = vpop.permute.xlu0 %1347 }
 0x180   : > { %10437 = vst [vmem:[#allocation87_spill] sm:$0xff] %v6079_v5  ;;  %v1576_v36 = vmin.f32 %v1574_v14, %v6079_v5  ;;  %10440 = vst [vmem:[#allocation90_spill] sm:$0xff] %v6092_v7  ;;  %v1599_v14 = vmin.f32 %v1597_v6, %v6092_v7  ;;  %v6104_v58 = vsub.f32 %v1343_v0, %v5789_v44  ;;  %v10542_v7 = vld [vmem:[#allocation57_spill] sm:$0xff] }
 0x181   : > { %10438 = vst [vmem:[#allocation88_spill] sm:$0xff] %v6083_v10  ;;  %v1645_v12 = vmin.f32 %v1643_v3, %v6083_v10  ;;  %10441 = vst [vmem:[#allocation91_spill] sm:$0xff] %v6097_v35  ;;  %v1670_v6 = vmin.f32 %v1668_v55, %v6097_v35  ;;  %v6119_v44 = vsub.f32 %v1348_v17, %v5810_v25 }
 0x182   : > { %10443 = vst [vmem:[#allocation93_spill] sm:$0xff] %v6104_v58  ;;  %v1601_v0 = vmin.f32 %v1599_v14, %v6104_v58  ;;  %v10499_v58 = vld [vmem:[#allocation52_spill] sm:$0xff] }
 0x183   : > { %v852_v45 = vpop.f32.mrb[52].mxu0  ;;  %10447 = vst [vmem:[#allocation97_spill] sm:$0xff] %v6119_v44 }
 0x184   : > { %v6100_v13 = vsub.f32 %v5803_v9, %v852_v45  ;;  %v854_v41 = vpop.f32.mrb[53].mxu0 }
 0x185   : > { %v6107_v38 = vsub.f32 %v5803_v9, %v854_v41  ;;  %v856_v11 = vpop.f32.mrb[54].mxu0 }
 0x186   : > { %10442 = vst [vmem:[#allocation92_spill] sm:$0xff] %v6100_v13  ;;  %v1577_v3 = vmin.f32 %v1575_v18, %v6100_v13  ;;  %v6111_v33 = vsub.f32 %v5801_v52, %v856_v11  ;;  %v858_v50 = vpop.f32.mrb[55].mxu0  ;;  %v6124_v18 = vsub.f32 %v1348_v17, %v5805_v15  ;;  %v1353_v11 = vpop.permute.xlu1 %1352 }
 0x187   : > { %10444 = vst [vmem:[#allocation94_spill] sm:$0xff] %v6107_v38  ;;  %v1646_v45 = vmin.f32 %v1644_v32, %v6107_v38  ;;  %v6115_v31 = vsub.f32 %v5801_v52, %v858_v50  ;;  %v1672_v32 = vmin.f32 %v1670_v6, %v6119_v44  ;;  %v6129_v52 = vsub.f32 %v1353_v11, %v5825_v47  ;;  %v1358_v6 = vpop.permute.xlu0 %1357 }
 0x188   : > { %10445 = vst [vmem:[#allocation95_spill] sm:$0xff] %v6111_v33  ;;  %v1578_v9 = vmin.f32 %v1576_v36, %v6111_v33  ;;  %10448 = vst [vmem:[#allocation98_spill] sm:$0xff] %v6124_v18  ;;  %v1603_v36 = vmin.f32 %v1601_v0, %v6124_v18  ;;  %v6136_v14 = vsub.f32 %v1353_v11, %v5815_v29 }
 0x189   : > { %10446 = vst [vmem:[#allocation96_spill] sm:$0xff] %v6115_v31  ;;  %v1647_v41 = vmin.f32 %v1645_v12, %v6115_v31  ;;  %10449 = vst [vmem:[#allocation99_spill] sm:$0xff] %v6129_v52  ;;  %v1674_v29 = vmin.f32 %v1672_v32, %v6129_v52 }
 0x18a   : > { %10451 = vst [vmem:[#allocation101_spill] sm:$0xff] %v6136_v14 }
 0x18b   : > { %v862_v1 = vpop.f32.mrb[56].mxu0 }
 0x18c   : > { %v6132_v55 = vsub.f32 %v5831_v49, %v862_v1  ;;  %v864_v25 = vpop.f32.mrb[57].mxu0 }
 0x18d   : > { %v6139_v15 = vsub.f32 %v5831_v49, %v864_v25  ;;  %v866_v12 = vpop.f32.mrb[58].mxu0  ;;  %v6155_v49 = vsub.f32 %v1358_v6, %v5838_v51  ;;  %v6162_v25 = vsub.f32 %v1358_v6, %v5833_v42  ;;  %v2682_v42 = vld [vmem:[%s9882_s1 + $0x80] sm:$0xff] }
 0x18e   : > { %10450 = vst [vmem:[#allocation100_spill] sm:$0xff] %v6132_v55  ;;  %v6142_v50 = vmin.f32 %v1577_v3, %v6132_v55  ;;  %v6145_v17 = vsub.f32 %v5829_v23, %v866_v12  ;;  %v868_v47 = vpop.f32.mrb[59].mxu0  ;;  %v1605_v3 = vmin.f32 %v1603_v36, %v6136_v14  ;;  %v2666_v36 = vld [vmem:[%s9882_s1] sm:$0xff] }
 0x18f   : > { %10452 = vst [vmem:[#allocation102_spill] sm:$0xff] %v6139_v15  ;;  %v6148_v1 = vmin.f32 %v1646_v45, %v6139_v15  ;;  %v6151_v0 = vsub.f32 %v5829_v23, %v868_v47  ;;  %10455 = vst [vmem:[#allocation105_spill] sm:$0xff] %v6155_v49  ;;  %v1363_v45 = vpop.permute.xlu1 %1362  ;;  %v1676_v23 = vmin.f32 %v1674_v29, %v6155_v49 }
 0x190   : > { %10453 = vst [vmem:[#allocation103_spill] sm:$0xff] %v6145_v17  ;;  %v6158_v11 = vmin.f32 %v1578_v9, %v6145_v17  ;;  %10456 = vst [vmem:[#allocation106_spill] sm:$0xff] %v6162_v25  ;;  %v6169_v32 = vsub.f32 %v1363_v45, %v5849_v22  ;;  %v1607_v47 = vmin.f32 %v1605_v3, %v6162_v25 }
 0x191   : > { %10454 = vst [vmem:[#allocation104_spill] sm:$0xff] %v6151_v0  ;;  %v6165_v12 = vmin.f32 %v1647_v41, %v6151_v0  ;;  %v1368_v41 = vpop.permute.xlu0 %1367  ;;  %v4704_v29 = vpack.i.bf16 %v2666_v36, %v2682_v42  ;;  %v2714_v42 = vld [vmem:[%s9882_s1 + $0x180] sm:$0xff] }
 0x192   : > { %10457 = vst [vmem:[#allocation107_spill] sm:$0xff] %v6169_v32  ;;  %v6188_v49 = vsub.f32 %v1368_v41, %v5866_v46 }
 0x193   : > { %v872_v44 = vpop.f32.mrb[60].mxu0  ;;  %4705 = vxpose.xlu0.b32.start [1/16] (narrow) %v4704_v29, 32 }
 0x194   : > { %v6172_v51 = vsub.f32 %v5859_v34, %v872_v44  ;;  %v874_v9 = vpop.f32.mrb[61].mxu0  ;;  %v6185_v44 = vsub.f32 %v1363_v45, %v5843_v4  ;;  %10461 = vst [vmem:[#allocation111_spill] sm:$0xff] %v6188_v49  ;;  %v1678_v4 = vmin.f32 %v1676_v23, %v6169_v32  ;;  %v6202_v45 = vsub.f32 %v1368_v41, %v5861_v27 }
 0x195   : > { %v6182_v6 = vsub.f32 %v5859_v34, %v874_v9  ;;  %v876_v22 = vpop.f32.mrb[62].mxu0  ;;  %v1373_v9 = vpop.permute.xlu1 %1372 }
 0x196   : > { %10458 = vst [vmem:[#allocation108_spill] sm:$0xff] %v6172_v51  ;;  %10460 = vst [vmem:[#allocation110_spill] sm:$0xff] %v6185_v44  ;;  %v1581_v52 = vmin.f32 %v6142_v50, %v6172_v51  ;;  %v6193_v35 = vsub.f32 %v5857_v48, %v876_v22  ;;  %v878_v14 = vpop.f32.mrb[63].mxu0  ;;  %v2667_v50 = vld [vmem:[%s9882_s1 + $0x8] sm:$0xff]  ;;  %v1609_v23 = vmin.f32 %v1607_v47, %v6185_v44  ;;  %v1378_v41 = vpop.permute.xlu0 %1377 }
 0x197   : > { %10459 = vst [vmem:[#allocation109_spill] sm:$0xff] %v6182_v6  ;;  %v1650_v3 = vmin.f32 %v6148_v1, %v6182_v6  ;;  %v6198_v34 = vsub.f32 %v5857_v48, %v878_v14  ;;  %10464 = vst [vmem:[#allocation114_spill] sm:$0xff] %v6202_v45  ;;  %v2683_v1 = vld [vmem:[%s9882_s1 + $0x88] sm:$0xff]  ;;  %v1680_v27 = vmin.f32 %v1678_v4, %v6188_v49  ;;  %v10673_v38 = vld [vmem:[#allocation103_spill] sm:$0xff] }
 0x198   : > { %10462 = vst [vmem:[#allocation112_spill] sm:$0xff] %v6193_v35  ;;  %v1582_v46 = vmin.f32 %v6158_v11, %v6193_v35  ;;  %v4706_v14 = vpack.i.bf16 %v2667_v50, %v2683_v1  ;;  %v6217_v36 = vsub.f32 %v1373_v9, %v5877_v53  ;;  %v2698_v11 = vld [vmem:[%s9882_s1 + $0x100] sm:$0xff]  ;;  %v1611_v29 = vmin.f32 %v1609_v23, %v6202_v45  ;;  %v2668_v1 = vld [vmem:[%s9882_s1 + $0x10] sm:$0xff] }
 0x199   : > { %10463 = vst [vmem:[#allocation113_spill] sm:$0xff] %v6198_v34  ;;  %v1651_v48 = vmin.f32 %v6165_v12, %v6198_v34  ;;  %v4756_v12 = vpack.i.bf16 %v2698_v11, %v2714_v42  ;;  %v6227_v47 = vsub.f32 %v1373_v9, %v5871_v40  ;;  %v6230_v53 = vsub.f32 %v1378_v41, %v5894_v24 }
 0x19a   : > { %10465 = vst [vmem:[#allocation115_spill] sm:$0xff] %v6217_v36  ;;  %4707 = vxpose.xlu0.b32.cont [2/16] (narrow) %v4706_v14, 32  ;;  %v2684_v14 = vld [vmem:[%s9882_s1 + $0x90] sm:$0xff]  ;;  %v1682_v24 = vmin.f32 %v1680_v27, %v6217_v36  ;;  %v6246_v11 = vsub.f32 %v1378_v41, %v5889_v37 }
 0x19b   : > { %v882_v22 = vpop.f32.mrb[64].mxu0  ;;  %10466 = vst [vmem:[#allocation116_spill] sm:$0xff] %v6227_v47  ;;  %10467 = vst [vmem:[#allocation117_spill] sm:$0xff] %v6230_v53  ;;  %4757 = vxpose.xlu1.b32.start [1/16] (narrow) %v4756_v12, 32  ;;  %v4708_v9 = vpack.i.bf16 %v2668_v1, %v2684_v14  ;;  %v2715_v12 = vld [vmem:[%s9882_s1 + $0x188] sm:$0xff]  ;;  %v1613_v41 = vmin.f32 %v1611_v29, %v6227_v47 }
 0x19c   : > { %v6233_v4 = vsub.f32 %v5887_v26, %v882_v22  ;;  %v884_v50 = vpop.f32.mrb[65].mxu0  ;;  %10470 = vst [vmem:[#allocation120_spill] sm:$0xff] %v6246_v11  ;;  %v10471_v22 = vld [vmem:[#allocation37_spill] sm:$0xff]  ;;  %v1661_v1 = vmin.f32 %v6230_v53, %v1682_v24  ;;  %v10474_v14 = vld [vmem:[#allocation42_spill] sm:$0xff] }
 0x19d   : > { %v6242_v23 = vsub.f32 %v5887_v26, %v884_v50  ;;  %v886_v40 = vpop.f32.mrb[66].mxu0  ;;  %v2699_v26 = vld [vmem:[%s9882_s1 + $0x108] sm:$0xff]  ;;  %v1383_v50 = vpop.permute.xlu1 %1382  ;;  %v1594_v24 = vmin.f32 %v6246_v11, %v1613_v41  ;;  %v2716_v53 = vld [vmem:[%s9882_s1 + $0x190] sm:$0xff]  ;;  %v2686_v11 = vld [vmem:[%s9882_s1 + $0xa0] sm:$0xff] }
 0x19e   : > { %10468 = vst [vmem:[#allocation118_spill] sm:$0xff] %v6233_v4  ;;  %v6249_v42 = vmin.f32 %v1581_v52, %v6233_v4  ;;  %v6252_v49 = vsub.f32 %v10471_v22, %v886_v40  ;;  %v888_v32 = vpop.f32.mrb[67].mxu0  ;;  %4709 = vxpose.xlu0.b32.cont [3/16] (narrow) %v4708_v9, 32  ;;  %v4758_v52 = vpack.i.bf16 %v2699_v26, %v2715_v12  ;;  %v1388_v9 = vpop.permute.xlu0 %1387  ;;  %v10476_v26 = vld [vmem:[#allocation40_spill] sm:$0xff] }
 0x19f   : > { %10469 = vst [vmem:[#allocation119_spill] sm:$0xff] %v6242_v23  ;;  %v6261_v27 = vmin.f32 %v1650_v3, %v6242_v23  ;;  %v6264_v37 = vsub.f32 %v10471_v22, %v888_v32  ;;  %v6269_v40 = vsub.f32 %v1383_v50, %v10474_v14  ;;  %v2669_v3 = vld [vmem:[%s9882_s1 + $0x18] sm:$0xff]  ;;  %v6285_v12 = vsub.f32 %v1383_v50, %v10476_v26  ;;  %v2700_v14 = vld [vmem:[%s9882_s1 + $0x110] sm:$0xff]  ;;  %v10480_v50 = vld [vmem:[#allocation45_spill] sm:$0xff] }
 0x1a0   : > { %10472 = vst [vmem:[#allocation37_spill] sm:$0xff] %v6252_v49  ;;  %v6272_v36 = vmin.f32 %v1582_v46, %v6252_v49  ;;  %v2685_v32 = vld [vmem:[%s9882_s1 + $0x98] sm:$0xff]  ;;  %4759 = vxpose.xlu1.b32.cont [2/16] (narrow) %v4758_v52, 32  ;;  %v6288_v46 = vsub.f32 %v1388_v9, %v5922_v19  ;;  %v4760_v52 = vpack.i.bf16 %v2700_v14, %v2716_v53  ;;  %v2670_v26 = vld [vmem:[%s9882_s1 + $0x20] sm:$0xff] }
 0x1a1   : > { %10473 = vst [vmem:[#allocation121_spill] sm:$0xff] %v6264_v37  ;;  %10475 = vst [vmem:[#allocation42_spill] sm:$0xff] %v6269_v40  ;;  %v6281_v22 = vmin.f32 %v1651_v48, %v6264_v37  ;;  %v4710_v29 = vpack.i.bf16 %v2669_v3, %v2685_v32  ;;  %v1663_v3 = vmin.f32 %v1661_v1, %v6269_v40  ;;  %v10483_v40 = vld [vmem:[#allocation44_spill] sm:$0xff] }
 0x1a2   : > { %10477 = vst [vmem:[#allocation40_spill] sm:$0xff] %v6285_v12  ;;  %10478 = vst [vmem:[#allocation122_spill] sm:$0xff] %v6288_v46  ;;  %v6298_v41 = vsub.f32 %v1388_v9, %v5917_v30  ;;  %v4712_v1 = vpack.i.bf16 %v2670_v26, %v2686_v11  ;;  %v1393_v30 = vpop.permute.xlu1 %1392  ;;  %v1596_v9 = vmin.f32 %v1594_v24, %v6285_v12  ;;  %v2717_v11 = vld [vmem:[%s9882_s1 + $0x198] sm:$0xff]  ;;  %v1398_v26 = vpop.permute.xlu0 %1397 }
 0x1a3   : > { %v892_v48 = vpop.f32.mrb[68].mxu0  ;;  %4711 = vxpose.xlu0.b32.cont [4/16] (narrow) %v4710_v29, 32  ;;  %v1665_v14 = vmin.f32 %v1663_v3, %v6288_v46  ;;  %v10488_v46 = vld [vmem:[#allocation48_spill] sm:$0xff] }
 0x1a4   : > { %10479 = vst [vmem:[#allocation123_spill] sm:$0xff] %v6298_v41  ;;  %v6301_v32 = vsub.f32 %v10480_v50, %v892_v48  ;;  %v894_v19 = vpop.f32.mrb[69].mxu0  ;;  %4761 = vxpose.xlu1.b32.cont [3/16] (narrow) %v4760_v52, 32  ;;  %v10485_v52 = vld [vmem:[#allocation50_spill] sm:$0xff]  ;;  %v6335_v12 = vsub.f32 %v1393_v30, %v10488_v46  ;;  %v10706_v16 = vld [vmem:[#allocation116_spill] sm:$0xff] }
 0x1a5   : > { %v6310_v29 = vsub.f32 %v10480_v50, %v894_v19  ;;  %v896_v53 = vpop.f32.mrb[70].mxu0  ;;  %v2701_v50 = vld [vmem:[%s9882_s1 + $0x118] sm:$0xff]  ;;  %v6326_v19 = vsub.f32 %v1393_v30, %v10485_v52  ;;  %v2671_v52 = vld [vmem:[%s9882_s1 + $0x28] sm:$0xff]  ;;  %v2718_v30 = vld [vmem:[%s9882_s1 + $0x1a0] sm:$0xff] }
 0x1a6   : > { %10481 = vst [vmem:[#allocation45_spill] sm:$0xff] %v6301_v32  ;;  %v1585_v48 = vmin.f32 %v6249_v42, %v6301_v32  ;;  %v6317_v47 = vsub.f32 %v10483_v40, %v896_v53  ;;  %v898_v45 = vpop.f32.mrb[71].mxu0  ;;  %v4762_v3 = vpack.i.bf16 %v2701_v50, %v2717_v11  ;;  %v1598_v53 = vmin.f32 %v1596_v9, %v6298_v41  ;;  %v1403_v11 = vpop.permute.xlu1 %1402  ;;  %v10497_v41 = vld [vmem:[#allocation56_spill] sm:$0xff]  ;;  %v10685_v10 = vld [vmem:[#allocation118_spill] sm:$0xff] }
 0x1a7   : > { %10482 = vst [vmem:[#allocation124_spill] sm:$0xff] %v6310_v29  ;;  %10486 = vst [vmem:[#allocation50_spill] sm:$0xff] %v6326_v19  ;;  %v1654_v24 = vmin.f32 %v6261_v27, %v6310_v29  ;;  %v6331_v42 = vsub.f32 %v10483_v40, %v898_v45  ;;  %4713 = vxpose.xlu0.b32.cont [5/16] (narrow) %v4712_v1, 32  ;;  %v2687_v45 = vld [vmem:[%s9882_s1 + $0xa8] sm:$0xff]  ;;  %v6346_v27 = vsub.f32 %v1398_v26, %v5950_v21 }
 0x1a8   : > { %10484 = vst [vmem:[#allocation44_spill] sm:$0xff] %v6317_v47  ;;  %10489 = vst [vmem:[#allocation48_spill] sm:$0xff] %v6335_v12  ;;  %v1586_v44 = vmin.f32 %v6272_v36, %v6317_v47  ;;  %4763 = vxpose.xlu1.b32.cont [4/16] (narrow) %v4762_v3, 32  ;;  %v4714_v46 = vpack.i.bf16 %v2671_v52, %v2687_v45  ;;  %v6351_v1 = vsub.f32 %v1398_v26, %v5945_v28  ;;  %v2702_v36 = vld [vmem:[%s9882_s1 + $0x120] sm:$0xff]  ;;  %v2672_v26 = vld [vmem:[%s9882_s1 + $0x30] sm:$0xff] }
 0x1a9   : > { %10487 = vst [vmem:[#allocation125_spill] sm:$0xff] %v6331_v42  ;;  %10490 = vst [vmem:[#allocation126_spill] sm:$0xff] %v6346_v27  ;;  %v1655_v40 = vmin.f32 %v6281_v22, %v6331_v42  ;;  %v1667_v9 = vmin.f32 %v1665_v14, %v6326_v19  ;;  %v4764_v50 = vpack.i.bf16 %v2702_v36, %v2718_v30  ;;  %v10492_v3 = vld [vmem:[#allocation53_spill] sm:$0xff]  ;;  %v2688_v45 = vld [vmem:[%s9882_s1 + $0xb0] sm:$0xff] }
 0x1aa   : > { %10491 = vst [vmem:[#allocation127_spill] sm:$0xff] %v6351_v1  ;;  %v1600_v22 = vmin.f32 %v1598_v53, %v6335_v12  ;;  %v10494_v19 = vld [vmem:[#allocation58_spill] sm:$0xff]  ;;  %v4716_v30 = vpack.i.bf16 %v2672_v26, %v2688_v45  ;;  %v6379_v25 = vsub.f32 %v1403_v11, %v10497_v41  ;;  %v2673_v45 = vld [vmem:[%s9882_s1 + $0x38] sm:$0xff] }
 0x1ab   : > { %v902_v21 = vpop.f32.mrb[72].mxu0  ;;  %4715 = vxpose.xlu0.b32.cont [6/16] (narrow) %v4714_v46, 32  ;;  %v1669_v14 = vmin.f32 %v1667_v9, %v6346_v27  ;;  %v6372_v46 = vsub.f32 %v1403_v11, %v10494_v19 }
 0x1ac   : > { %v6362_v52 = vsub.f32 %v10492_v3, %v902_v21  ;;  %v904_v28 = vpop.f32.mrb[73].mxu0  ;;  %4765 = vxpose.xlu1.b32.cont [5/16] (narrow) %v4764_v50, 32  ;;  %v1408_v21 = vpop.permute.xlu0 %1407  ;;  %v1602_v12 = vmin.f32 %v1600_v22, %v6351_v1  ;;  %10498 = vst [vmem:[#allocation56_spill] sm:$0xff] %v6379_v25  ;;  %v2719_v50 = vld [vmem:[%s9882_s1 + $0x1a8] sm:$0xff] }
 0x1ad   : > { %10495 = vst [vmem:[#allocation58_spill] sm:$0xff] %v6372_v46  ;;  %v6375_v36 = vsub.f32 %v10492_v3, %v904_v28  ;;  %v906_v53 = vpop.f32.mrb[74].mxu0  ;;  %v2703_v3 = vld [vmem:[%s9882_s1 + $0x128] sm:$0xff]  ;;  %v6394_v22 = vsub.f32 %v1408_v21, %v5978_v39  ;;  %v6403_v28 = vsub.f32 %v1408_v21, %v5973_v43  ;;  %v2689_v39 = vld [vmem:[%s9882_s1 + $0xb8] sm:$0xff]  ;;  %v1413_v43 = vpop.permute.xlu1 %1412  ;;  %v2720_v21 = vld [vmem:[%s9882_s1 + $0x1b0] sm:$0xff] }
 0x1ae   : > { %10493 = vst [vmem:[#allocation53_spill] sm:$0xff] %v6362_v52  ;;  %v6382_v18 = vmin.f32 %v1585_v48, %v6362_v52  ;;  %v6385_v9 = vsub.f32 %v10499_v58, %v906_v53  ;;  %v908_v19 = vpop.f32.mrb[75].mxu0  ;;  %v4766_v11 = vpack.i.bf16 %v2703_v3, %v2719_v50  ;;  %v4718_v53 = vpack.i.bf16 %v2673_v45, %v2689_v39  ;;  %v10504_v3 = vld [vmem:[#allocation66_spill] sm:$0xff] }
 0x1af   : > { %10496 = vst [vmem:[#allocation128_spill] sm:$0xff] %v6375_v36  ;;  %10501 = vst [vmem:[#allocation129_spill] sm:$0xff] %v6394_v22  ;;  %v6397_v41 = vmin.f32 %v1654_v24, %v6375_v36  ;;  %v6400_v48 = vsub.f32 %v10499_v58, %v908_v19  ;;  %4717 = vxpose.xlu0.b32.cont [7/16] (narrow) %v4716_v30, 32  ;;  %v1671_v24 = vmin.f32 %v1669_v14, %v6372_v46  ;;  %v10508_v46 = vld [vmem:[#allocation61_spill] sm:$0xff]  ;;  %v10713_v63 = vld [vmem:[#allocation48_spill] sm:$0xff] }
 0x1b0   : > { %10500 = vst [vmem:[#allocation52_spill] sm:$0xff] %v6385_v9  ;;  %10503 = vst [vmem:[#allocation131_spill] sm:$0xff] %v6403_v28  ;;  %v6406_v26 = vmin.f32 %v1586_v44, %v6385_v9  ;;  %4767 = vxpose.xlu1.b32.cont [6/16] (narrow) %v4766_v11, 32  ;;  %v1604_v30 = vmin.f32 %v1602_v12, %v6379_v25  ;;  %v2704_v44 = vld [vmem:[%s9882_s1 + $0x130] sm:$0xff]  ;;  %v6427_v14 = vsub.f32 %v1413_v43, %v10504_v3  ;;  %v1418_v11 = vpop.permute.xlu0 %1417  ;;  %v10506_v12 = vld [vmem:[#allocation64_spill] sm:$0xff] }
 0x1b1   : > { %10502 = vst [vmem:[#allocation130_spill] sm:$0xff] %v6400_v48  ;;  %v6416_v58 = vmin.f32 %v1655_v40, %v6400_v48  ;;  %v1673_v19 = vmin.f32 %v1671_v24, %v6394_v22  ;;  %v4768_v50 = vpack.i.bf16 %v2704_v44, %v2720_v21  ;;  %v6431_v39 = vsub.f32 %v1413_v43, %v10506_v12  ;;  %v2674_v24 = vld [vmem:[%s9882_s1 + $0x40] sm:$0xff]  ;;  %v2707_v1 = vld [vmem:[%s9882_s1 + $0x148] sm:$0xff] }
 0x1b2   : > { %10505 = vst [vmem:[#allocation66_spill] sm:$0xff] %v6427_v14  ;;  %v1606_v45 = vmin.f32 %v1604_v30, %v6403_v28  ;;  %v2690_v3 = vld [vmem:[%s9882_s1 + $0xc0] sm:$0xff]  ;;  %v6449_v21 = vsub.f32 %v1418_v11, %v6001_v54 }
 0x1b3   : > { %v912_v40 = vpop.f32.mrb[76].mxu0  ;;  %4719 = vxpose.xlu0.b32.cont [8/16] (narrow) %v4718_v53, 32  ;;  %10507 = vst [vmem:[#allocation64_spill] sm:$0xff] %v6431_v39  ;;  %v6443_v53 = vsub.f32 %v1418_v11, %v6006_v60  ;;  %v4720_v44 = vpack.i.bf16 %v2674_v24, %v2690_v3  ;;  %v10513_v12 = vld [vmem:[#allocation60_spill] sm:$0xff]  ;;  %v1423_v11 = vpop.permute.xlu1 %1422 }
 0x1b4   : > { %v6434_v27 = vsub.f32 %v10508_v46, %v912_v40  ;;  %v914_v25 = vpop.f32.mrb[77].mxu0  ;;  %4769 = vxpose.xlu1.b32.cont [7/16] (narrow) %v4768_v50, 32  ;;  %10512 = vst [vmem:[#allocation134_spill] sm:$0xff] %v6449_v21  ;;  %v2705_v60 = vld [vmem:[%s9882_s1 + $0x138] sm:$0xff]  ;;  %v1608_v24 = vmin.f32 %v1606_v45, %v6431_v39 }
 0x1b5   : > { %10510 = vst [vmem:[#allocation132_spill] sm:$0xff] %v6443_v53  ;;  %v6446_v30 = vsub.f32 %v10508_v46, %v914_v25  ;;  %v916_v43 = vpop.f32.mrb[78].mxu0  ;;  %v2721_v25 = vld [vmem:[%s9882_s1 + $0x1b8] sm:$0xff]  ;;  %v1675_v46 = vmin.f32 %v1673_v19, %v6427_v14  ;;  %v2691_v19 = vld [vmem:[%s9882_s1 + $0xc8] sm:$0xff] }
 0x1b6   : > { %10509 = vst [vmem:[#allocation61_spill] sm:$0xff] %v6434_v27  ;;  %v1589_v40 = vmin.f32 %v6382_v18, %v6434_v27  ;;  %v6454_v22 = vsub.f32 %v10513_v12, %v916_v43  ;;  %v918_v28 = vpop.f32.mrb[79].mxu0  ;;  %v4770_v18 = vpack.i.bf16 %v2705_v60, %v2721_v25  ;;  %v2675_v43 = vld [vmem:[%s9882_s1 + $0x48] sm:$0xff]  ;;  %v2706_v25 = vld [vmem:[%s9882_s1 + $0x140] sm:$0xff] }
 0x1b7   : > { %10511 = vst [vmem:[#allocation133_spill] sm:$0xff] %v6446_v30  ;;  %v1658_v54 = vmin.f32 %v6397_v41, %v6446_v30  ;;  %v6466_v50 = vsub.f32 %v10513_v12, %v918_v28  ;;  %4721 = vxpose.xlu0.b32.cont [9/16] (narrow) %v4720_v44, 32  ;;  %v1677_v41 = vmin.f32 %v1675_v46, %v6443_v53  ;;  %v10517_v12 = vld [vmem:[#allocation72_spill] sm:$0xff]  ;;  %v10519_v14 = vld [vmem:[#allocation69_spill] sm:$0xff] }
 0x1b8   : > { %10514 = vst [vmem:[#allocation60_spill] sm:$0xff] %v6454_v22  ;;  %v1590_v3 = vmin.f32 %v6406_v26, %v6454_v22  ;;  %v6479_v28 = vsub.f32 %v1423_v11, %v6017_v62  ;;  %4771 = vxpose.xlu1.b32.cont [8/16] (narrow) %v4770_v18, 32  ;;  %v4722_v45 = vpack.i.bf16 %v2675_v43, %v2691_v19  ;;  %v2722_v46 = vld [vmem:[%s9882_s1 + $0x1c0] sm:$0xff] }
 0x1b9   : > { %10515 = vst [vmem:[#allocation135_spill] sm:$0xff] %v6466_v50  ;;  %v1659_v44 = vmin.f32 %v6416_v58, %v6466_v50  ;;  %v1610_v26 = vmin.f32 %v1608_v24, %v6449_v21  ;;  %v6485_v60 = vsub.f32 %v1423_v11, %v10517_v12  ;;  %v4772_v53 = vpack.i.bf16 %v2706_v25, %v2722_v46  ;;  %v2676_v11 = vld [vmem:[%s9882_s1 + $0x50] sm:$0xff] }
 0x1ba   : > { %10516 = vst [vmem:[#allocation136_spill] sm:$0xff] %v6479_v28  ;;  %v2692_v24 = vld [vmem:[%s9882_s1 + $0xd0] sm:$0xff]  ;;  %v1679_v43 = vmin.f32 %v1677_v41, %v6479_v28 }
 0x1bb   : > { %10518 = vst [vmem:[#allocation72_spill] sm:$0xff] %v6485_v60  ;;  %v922_v62 = vpop.f32.mrb[80].mxu0  ;;  %4723 = vxpose.xlu0.b32.cont [10/16] (narrow) %v4722_v45, 32  ;;  %v4724_v45 = vpack.i.bf16 %v2676_v11, %v2692_v24  ;;  %v1612_v25 = vmin.f32 %v1610_v26, %v6485_v60  ;;  %v2677_v11 = vld [vmem:[%s9882_s1 + $0x58] sm:$0xff]  ;;  %v10541_v60 = vld [vmem:[#allocation54_spill] sm:$0xff] }
 0x1bc   : > { %v6494_v58 = vsub.f32 %v10519_v14, %v922_v62  ;;  %v924_v18 = vpop.f32.mrb[81].mxu0  ;;  %4773 = vxpose.xlu1.b32.cont [9/16] (narrow) %v4772_v53, 32  ;;  %v10522_v62 = vld [vmem:[#allocation68_spill] sm:$0xff]  ;;  %v1681_v41 = vmin.f32 %v1679_v43, %v1659_v44 }
 0x1bd   : > { %v6504_v19 = vsub.f32 %v10519_v14, %v924_v18  ;;  %v926_v12 = vpop.f32.mrb[82].mxu0  ;;  %v2723_v14 = vld [vmem:[%s9882_s1 + $0x1c8] sm:$0xff]  ;;  %v2693_v24 = vld [vmem:[%s9882_s1 + $0xd8] sm:$0xff] }
 0x1be   : > { %10520 = vst [vmem:[#allocation69_spill] sm:$0xff] %v6494_v58  ;;  %v1591_v46 = vmin.f32 %v1589_v40, %v6494_v58  ;;  %v6509_v21 = vsub.f32 %v10522_v62, %v926_v12  ;;  %v928_v39 = vpop.f32.mrb[83].mxu0  ;;  %v4774_v18 = vpack.i.bf16 %v2707_v1, %v2723_v14  ;;  %v4726_v44 = vpack.i.bf16 %v2677_v11, %v2693_v24  ;;  %v2708_v1 = vld [vmem:[%s9882_s1 + $0x150] sm:$0xff]  ;;  %v2695_v11 = vld [vmem:[%s9882_s1 + $0xe8] sm:$0xff] }
 0x1bf   : > { %10521 = vst [vmem:[#allocation137_spill] sm:$0xff] %v6504_v19  ;;  %v1660_v53 = vmin.f32 %v1658_v54, %v6504_v19  ;;  %4725 = vxpose.xlu0.b32.cont [11/16] (narrow) %v4724_v45, 32  ;;  %v6526_v28 = vsub.f32 %v10522_v62, %v928_v39  ;;  %v2678_v39 = vld [vmem:[%s9882_s1 + $0x60] sm:$0xff] }
 0x1c0   : > { %10523 = vst [vmem:[#allocation68_spill] sm:$0xff] %v6509_v21  ;;  %v1614_v26 = vmin.f32 %v1612_v25, %v1591_v46  ;;  %v1592_v40 = vmin.f32 %v1590_v3, %v6509_v21  ;;  %4775 = vxpose.xlu1.b32.cont [10/16] (narrow) %v4774_v18, 32  ;;  %v2724_v3 = vld [vmem:[%s9882_s1 + $0x1d0] sm:$0xff]  ;;  %v2694_v46 = vld [vmem:[%s9882_s1 + $0xe0] sm:$0xff] }
 0x1c1   : > { %v1683_v12 = vmin.f32 %v1681_v41, %v1660_v53  ;;  %10524 = vst [vmem:[#allocation138_spill] sm:$0xff] %v6526_v28  ;;  %v4776_v45 = vpack.i.bf16 %v2708_v1, %v2724_v3  ;;  %v4728_v62 = vpack.i.bf16 %v2678_v39, %v2694_v46  ;;  %v2709_v41 = vld [vmem:[%s9882_s1 + $0x158] sm:$0xff]  ;;  %v1691_v1 = vlaneseq  ;;  %v2680_v39 = vld [vmem:[%s9882_s1 + $0x70] sm:$0xff] }
 0x1c2   : > { %v1615_v54 = vmin.f32 %v1592_v40, %v1614_v26  ;;  %v2725_v53 = vld [vmem:[%s9882_s1 + $0x1d8] sm:$0xff]  ;;  %v2679_v40 = vld [vmem:[%s9882_s1 + $0x68] sm:$0xff]  ;;  %v2696_v46 = vld [vmem:[%s9882_s1 + $0xf0] sm:$0xff] }
 0x1c3   : > { %v1684_v43 = vmin.f32 %v6526_v28, %v1683_v12  ;;  %4727 = vxpose.xlu0.b32.cont [12/16] (narrow) %v4726_v44, 32  ;;  %v4778_v18 = vpack.i.bf16 %v2709_v41, %v2725_v53  ;;  %v4730_v24 = vpack.i.bf16 %v2679_v40, %v2695_v11  ;;  %v2710_v44 = vld [vmem:[%s9882_s1 + $0x160] sm:$0xff]  ;;  %v2711_v41 = vld [vmem:[%s9882_s1 + $0x168] sm:$0xff] }
 0x1c4   : > { %v1616_v25 = vrot.slane %v1615_v54, 4  ;;  %4777 = vxpose.xlu1.b32.cont [11/16] (narrow) %v4776_v45, 32  ;;  %v2727_v53 = vld [vmem:[%s9882_s1 + $0x1e8] sm:$0xff] }
 0x1c5   : > { %v1685_v3 = vrot.slane %v1684_v43, 4  ;;  %v4782_v40 = vpack.i.bf16 %v2711_v41, %v2727_v53  ;;  %v10525_v11 = vld [vmem:[#allocation13_spill] sm:$0xff]  ;;  %v10539_v53 = vld [vmem:[#allocation46_spill] sm:$0xff] }
 0x1c6   : > { %v1617_v14 = vmin.f32 %v1615_v54, %v1616_v25  ;;  %v2726_v54 = vld [vmem:[%s9882_s1 + $0x1e0] sm:$0xff] }
 0x1c7   : > { %4729 = vxpose.xlu0.b32.cont [13/16] (narrow) %v4728_v62, 32  ;;  %v4780_v45 = vpack.i.bf16 %v2710_v44, %v2726_v54  ;;  %v4732_v62 = vpack.i.bf16 %v2680_v39, %v2696_v46  ;;  %v10528_v44 = vld [vmem:[#allocation18_spill] sm:$0xff]  ;;  %v10529_v54 = vld [vmem:[#allocation21_spill] sm:$0xff]  ;;  %v10536_v46 = vld [vmem:[#allocation35_spill] sm:$0xff] }
 0x1c8   : > { %v1618_v26 = vrot.slane %v1617_v14, 2  ;;  %4779 = vxpose.xlu1.b32.cont [12/16] (narrow) %v4778_v18, 32  ;;  %v6573_v18 = vshrl.u32 %v1691_v1, 7  ;;  %v10531_v1 = vld [vmem:[#allocation25_spill] sm:$0xff] }
 0x1c9   : > { %v10535_v39 = vld [vmem:[#allocation33_spill] sm:$0xff] }
 0x1ca   : > { %v1619_v12 = vmin.f32 %v1617_v14, %v1618_v26  ;;  %v6575_v26 = vmin.f32 %v1684_v43, %v1685_v3  ;;  %v10530_v43 = vld [vmem:[#allocation23_spill] sm:$0xff]  ;;  %v10538_v41 = vld [vmem:[#allocation41_spill] sm:$0xff]  ;;  %v6677_v47 = vadd.s32 48, %v6573_v18  ;;  %v6683_v21 = vadd.s32 336, %v6573_v18 }
 0x1cb   : > { %4731 = vxpose.xlu0.b32.cont [14/16] (narrow) %v4730_v24, 32  ;;  %v10526_v24 = vld [vmem:[#allocation17_spill] sm:$0xff]  ;;  %v10532_v3 = vld [vmem:[#allocation27_spill] sm:$0xff]  ;;  %v6686_v32 = vadd.s32 64, %v6573_v18  ;;  %v6689_v4 = vadd.s32 344, %v6573_v18  ;;  %v6692_v35 = vadd.s32 72, %v6573_v18 }
 0x1cc   : > { %v1620_v25 = vrot.slane %v1619_v12, 1  ;;  %4781 = vxpose.xlu1.b32.cont [13/16] (narrow) %v4780_v45, 32  ;;  %v10533_v45 = vld [vmem:[#allocation29_spill] sm:$0xff]  ;;  %10550 = vst [vmem:[#allocation18_spill] sm:$0xff] %v6677_v47  ;;  %10552 = vst [vmem:[#allocation23_spill] sm:$0xff] %v6683_v21  ;;  %v6695_v51 = vadd.s32 352, %v6573_v18 }
 0x1cd   : > { %v10546_v28 = vld [vmem:[#allocation73_spill] sm:$0xff]  ;;  %10553 = vst [vmem:[#allocation25_spill] sm:$0xff] %v6686_v32  ;;  %10554 = vst [vmem:[#allocation27_spill] sm:$0xff] %v6689_v4  ;;  %v1687_v17 = vrot.slane %v6575_v26, 2  ;;  %v6699_v55 = vadd.s32 360, %v6573_v18  ;;  %v6702_v33 = vadd.s32 368, %v6573_v18 }
 0x1ce   : > { %v6565_v14 = vmin.f32 %v1619_v12, %v1620_v25  ;;  %v10527_v12 = vld [vmem:[#allocation14_spill] sm:$0xff]  ;;  %v10534_v25 = vld [vmem:[#allocation31_spill] sm:$0xff]  ;;  %10555 = vst [vmem:[#allocation29_spill] sm:$0xff] %v6692_v35  ;;  %v6705_v21 = vadd.s32 80, %v6573_v18  ;;  %v6708_v13 = vadd.s32 376, %v6573_v18  ;;  %v6711_v4 = vadd.s32 88, %v6573_v18 }
 0x1cf   : > { %4733 = vxpose.xlu0.b32.cont [15/16] (narrow) %v4732_v62, 32  ;;  %v10537_v62 = vld [vmem:[#allocation38_spill] sm:$0xff]  ;;  %10556 = vst [vmem:[#allocation31_spill] sm:$0xff] %v6695_v51  ;;  %10557 = vst [vmem:[#allocation33_spill] sm:$0xff] %v6699_v55  ;;  %v6714_v5 = vadd.s32 384, %v6573_v18  ;;  %v6717_v51 = vadd.s32 392, %v6573_v18  ;;  %v1688_v50 = vmin.f32 %v6575_v26, %v1687_v17 }
 0x1d0   : > { %vm1756_vm3 = vcmp.eq.f32.partialorder %v10525_v11, %v6565_v14  ;;  %vm1758_vm4 = vcmp.eq.f32.partialorder %v10526_v24, %v6565_v14  ;;  %vm1760_vm5 = vcmp.eq.f32.partialorder %v10527_v12, %v6565_v14  ;;  %vm1762_vm6 = vcmp.eq.f32.partialorder %v10528_v44, %v6565_v14  ;;  %4783 = vxpose.xlu1.b32.cont [14/16] (narrow) %v4782_v40, 32  ;;  %v10540_v40 = vld [vmem:[#allocation49_spill] sm:$0xff] }
 0x1d1   : > { %vm1764_vm7 = vcmp.eq.f32.partialorder %v10529_v54, %v6565_v14  ;;  %vm1766_vm8 = vcmp.eq.f32.partialorder %v10530_v43, %v6565_v14  ;;  %vm1768_vm9 = vcmp.eq.f32.partialorder %v10531_v1, %v6565_v14  ;;  %vm1770_vm10 = vcmp.eq.f32.partialorder %v10532_v3, %v6565_v14  ;;  %10558 = vst [vmem:[#allocation35_spill] sm:$0xff] %v6702_v33 }
 0x1d2   : > { %vm1772_vm11 = vcmp.eq.f32.partialorder %v10533_v45, %v6565_v14  ;;  %vm1822_vm15 = vcmp.eq.f32.partialorder %v6252_v49, %v6565_v14  ;;  %vm1828_vm2 = vcmp.eq.f32.partialorder %v6362_v52, %v6565_v14  ;;  %vm1830_vm12 = vcmp.eq.f32.partialorder %v6385_v9, %v6565_v14  ;;  %10559 = vst [vmem:[#allocation38_spill] sm:$0xff] %v6705_v21 }
 0x1d3   : > { %vm1832_vm13 = vcmp.eq.f32.partialorder %v6434_v27, %v6565_v14  ;;  %vm1834_vm14 = vcmp.eq.f32.partialorder %v6454_v22, %v6565_v14  ;;  %v6658_v49 = vadd.s32 8, %v6573_v18  ;;  %vm1836_vm0 = vcmp.eq.f32.partialorder %v6494_v58, %v6565_v14  ;;  %10560 = vst [vmem:[#allocation41_spill] sm:$0xff] %v6708_v13  ;;  %10561 = vst [vmem:[#allocation46_spill] sm:$0xff] %v6711_v4  ;;  %v10714_v57 = vld [vmem:[#allocation23_spill] sm:$0xff] }
 0x1d4   : > { %v6665_v52 = vadd.s32 16, %v6573_v18  ;;  %v6668_v9 = vadd.s32 24, %v6573_v18  ;;  %v6671_v27 = vadd.s32 32, %v6573_v18  ;;  %v6674_v22 = vadd.s32 40, %v6573_v18  ;;  %10562 = vst [vmem:[#allocation49_spill] sm:$0xff] %v6714_v5  ;;  %10563 = vst [vmem:[#allocation54_spill] sm:$0xff] %v6717_v51 }
 0x1d5   : > { %v6680_v58 = vadd.s32 56, %v6573_v18  ;;  %v6720_v55 = vadd.s32 400, %v6573_v18  ;;  %v6723_v33 = vadd.s32 96, %v6573_v18  ;;  %v6726_v20 = vadd.s32 408, %v6573_v18 }
 0x1d6   : > { %10547 = vst [vmem:[#allocation13_spill] sm:$0xff] %v6665_v52  ;;  %10548 = vst [vmem:[#allocation17_spill] sm:$0xff] %v6671_v27  ;;  %v6729_v13 = vadd.s32 104, %v6573_v18  ;;  %v6732_v19 = vadd.s32 416, %v6573_v18  ;;  %v6735_v5 = vadd.s32 424, %v6573_v18  ;;  %v6738_v51 = vadd.s32 432, %v6573_v18 }
 0x1d7   : > { %10549 = vst [vmem:[#allocation14_spill] sm:$0xff] %v6674_v22  ;;  %10551 = vst [vmem:[#allocation21_spill] sm:$0xff] %v6680_v58  ;;  %v6745_v30 = vadd.s32 440, %v6573_v18  ;;  %v6751_v48 = vadd.s32 448, %v6573_v18  ;;  %v6763_v17 = vadd.s32 136, %v6573_v18  ;;  %v6766_v26 = vadd.s32 472, %v6573_v18 }
 0x1d8   : > { %10564 = vst [vmem:[#allocation57_spill] sm:$0xff] %v6720_v55  ;;  %10565 = vst [vmem:[#allocation62_spill] sm:$0xff] %v6723_v33  ;;  %v6741_v55 = vadd.s32 112, %v6573_v18  ;;  %v6778_v36 = vadd.s32 488, %v6573_v18  ;;  %v6784_v42 = vadd.s32 496, %v6573_v18  ;;  %v1689_v29 = vrot.slane %v1688_v50, 1 }
 0x1d9   : > { %10566 = vst [vmem:[#allocation65_spill] sm:$0xff] %v6726_v20  ;;  %10567 = vst [vmem:[#allocation70_spill] sm:$0xff] %v6729_v13  ;;  %v6748_v20 = vadd.s32 120, %v6573_v18  ;;  %v6790_v37 = vadd.s32 504, %v6573_v18  ;;  %v6796_v23 = vadd.s32 184, %v6573_v18  ;;  %v6802_v34 = vadd.s32 200, %v6573_v18 }
 0x1da   : > { %10568 = vst [vmem:[#allocation73_spill] sm:$0xff] %v6732_v19  ;;  %10569 = vst [vmem:[#allocation139_spill] sm:$0xff] %v6735_v5  ;;  %v6754_v19 = vadd.s32 456, %v6573_v18  ;;  %v6757_v5 = vadd.s32 128, %v6573_v18  ;;  %v6808_v6 = vadd.s32 216, %v6573_v18  ;;  %v6814_v0 = vadd.s32 232, %v6573_v18 }
 0x1db   : > { %10570 = vst [vmem:[#allocation140_spill] sm:$0xff] %v6738_v51  ;;  %10571 = vst [vmem:[#allocation141_spill] sm:$0xff] %v6741_v55  ;;  %v6760_v51 = vadd.s32 464, %v6573_v18  ;;  %v6817_v15 = vadd.s32 240, %v6573_v18  ;;  %v6834_v31 = vmin.f32 %v1688_v50, %v1689_v29  ;;  %v1890_v29 = vsel %vm1762_vm6, %v6668_v9, 512 }
 0x1dc   : > { %10572 = vst [vmem:[#allocation142_spill] sm:$0xff] %v6745_v30  ;;  %10573 = vst [vmem:[#allocation143_spill] sm:$0xff] %v6748_v20  ;;  %v6769_v30 = vadd.s32 144, %v6573_v18  ;;  %v1892_v50 = vsel %vm1764_vm7, %v6671_v27, 512  ;;  %v1894_v11 = vsel %vm1766_vm8, %v6674_v22, 512  ;;  %v1896_v24 = vsel %vm1768_vm9, %v6677_v47, 512 }
 0x1dd   : > { %10574 = vst [vmem:[#allocation144_spill] sm:$0xff] %v6751_v48  ;;  %10575 = vst [vmem:[#allocation145_spill] sm:$0xff] %v6754_v19  ;;  %v6772_v48 = vadd.s32 480, %v6573_v18  ;;  %v6775_v19 = vadd.s32 152, %v6573_v18  ;;  %v1898_v12 = vsel %vm1770_vm10, %v6680_v58, 512  ;;  %v1900_v44 = vsel %vm1772_vm11, %v6686_v32, 512 }
 0x1de   : > { %10576 = vst [vmem:[#allocation146_spill] sm:$0xff] %v6757_v5  ;;  %10577 = vst [vmem:[#allocation147_spill] sm:$0xff] %v6760_v51  ;;  %v6781_v51 = vadd.s32 160, %v6573_v18  ;;  %vm10605_vm6 = vcmp.eq.f32.partialorder %v10537_v62, %v6565_v14  ;;  %vm10606_vm7 = vcmp.eq.f32.partialorder %v10538_v41, %v6565_v14  ;;  %vm10607_vm8 = vcmp.eq.f32.partialorder %v10539_v53, %v6565_v14 }
 0x1df   : > { %10578 = vst [vmem:[#allocation148_spill] sm:$0xff] %v6763_v17  ;;  %10579 = vst [vmem:[#allocation149_spill] sm:$0xff] %v6766_v26  ;;  %v6787_v26 = vadd.s32 168, %v6573_v18  ;;  %v1908_v3 = vsel %vm10605_vm6, %v6723_v33, 512  ;;  %v1910_v45 = vsel %vm10606_vm7, %v6729_v13, 512  ;;  %vm10608_vm9 = vcmp.eq.f32.partialorder %v10540_v40, %v6565_v14 }
 0x1e0   : > { %10580 = vst [vmem:[#allocation150_spill] sm:$0xff] %v6769_v30  ;;  %10581 = vst [vmem:[#allocation151_spill] sm:$0xff] %v6772_v48  ;;  %v6793_v48 = vadd.s32 176, %v6573_v18  ;;  %vm10609_vm10 = vcmp.eq.f32.partialorder %v10541_v60, %v6565_v14  ;;  %vm10610_vm11 = vcmp.eq.f32.partialorder %v10542_v7, %v6565_v14  ;;  %vm10614_vm6 = vcmp.eq.f32.partialorder %v10546_v28, %v6565_v14  ;;  %v10618_v28 = vld [vmem:[#allocation19_spill] sm:$0xff] }
 0x1e1   : > { %10582 = vst [vmem:[#allocation152_spill] sm:$0xff] %v6775_v19  ;;  %10583 = vst [vmem:[#allocation153_spill] sm:$0xff] %v6778_v36  ;;  %v6799_v36 = vadd.s32 192, %v6573_v18  ;;  %v6914_v62 = vsel %vm10610_vm11, %v6763_v17, 512  ;;  %v6938_v7 = vsel %vm10614_vm6, %v6787_v26, 512  ;;  %vm10615_vm7 = vcmp.eq.f32.partialorder %v6032_v56, %v6565_v14  ;;  %v10619_v56 = vld [vmem:[#allocation16_spill] sm:$0xff] }
 0x1e2   : > { %10584 = vst [vmem:[#allocation154_spill] sm:$0xff] %v6781_v51  ;;  %10585 = vst [vmem:[#allocation155_spill] sm:$0xff] %v6784_v42  ;;  %v6805_v42 = vadd.s32 208, %v6573_v18 }
 0x1e3   : > { %10586 = vst [vmem:[#allocation156_spill] sm:$0xff] %v6787_v26  ;;  %10587 = vst [vmem:[#allocation157_spill] sm:$0xff] %v6790_v37  ;;  %v6811_v37 = vadd.s32 224, %v6573_v18 }
 0x1e4   : > { %10588 = vst [vmem:[#allocation158_spill] sm:$0xff] %v6793_v48  ;;  %10589 = vst [vmem:[#allocation159_spill] sm:$0xff] %v6796_v23 }
 0x1e5   : > { %10590 = vst [vmem:[#allocation160_spill] sm:$0xff] %v6799_v36  ;;  %10591 = vst [vmem:[#allocation161_spill] sm:$0xff] %v6802_v34  ;;  %v6820_v36 = vadd.s32 248, %v6573_v18  ;;  %v6823_v34 = vadd.s32 256, %v6573_v18 }
 0x1e6   : > { %10592 = vst [vmem:[#allocation162_spill] sm:$0xff] %v6805_v42  ;;  %10593 = vst [vmem:[#allocation163_spill] sm:$0xff] %v6808_v6  ;;  %v6826_v42 = vadd.s32 264, %v6573_v18  ;;  %v6829_v6 = vadd.s32 272, %v6573_v18 }
 0x1e7   : > { %10594 = vst [vmem:[#allocation164_spill] sm:$0xff] %v6811_v37  ;;  %10595 = vst [vmem:[#allocation165_spill] sm:$0xff] %v6814_v0  ;;  %v6832_v37 = vadd.s32 280, %v6573_v18 }
 0x1e8   : > { %10596 = vst [vmem:[#allocation166_spill] sm:$0xff] %v6817_v15  ;;  %10597 = vst [vmem:[#allocation167_spill] sm:$0xff] %v6820_v36  ;;  %v1884_v15 = vsel %vm1756_vm3, %v6573_v18, 512  ;;  %vm10602_vm3 = vcmp.eq.f32.partialorder %v10534_v25, %v6565_v14  ;;  %v6896_v25 = vsel %vm10607_vm8, %v6741_v55, 512  ;;  %vm10616_vm8 = vcmp.eq.f32.partialorder %v6045_v61, %v6565_v14  ;;  %v10621_v61 = vld [vmem:[#allocation22_spill] sm:$0xff]  ;;  %v10631_v55 = vld [vmem:[#allocation47_spill] sm:$0xff] }
 0x1e9   : > { %10598 = vst [vmem:[#allocation168_spill] sm:$0xff] %v6823_v34  ;;  %10599 = vst [vmem:[#allocation169_spill] sm:$0xff] %v6826_v42  ;;  %v1886_v34 = vsel %vm1758_vm4, %v6658_v49, 512  ;;  %v1902_v54 = vsel %vm10602_vm3, %v6692_v35, 512  ;;  %vm10603_vm4 = vcmp.eq.f32.partialorder %v10535_v39, %v6565_v14  ;;  %v6902_v39 = vsel %vm10608_vm9, %v6748_v20, 512 }
 0x1ea   : > { %10600 = vst [vmem:[#allocation170_spill] sm:$0xff] %v6829_v6  ;;  %10601 = vst [vmem:[#allocation171_spill] sm:$0xff] %v6832_v37  ;;  %v1888_v6 = vsel %vm1760_vm5, %v6665_v52, 512  ;;  %v1904_v43 = vsel %vm10603_vm4, %v6705_v21, 512  ;;  %vm10604_vm5 = vcmp.eq.f32.partialorder %v10536_v46, %v6565_v14  ;;  %v6908_v46 = vsel %vm10609_vm10, %v6757_v5, 512  ;;  %v10627_v5 = vld [vmem:[#allocation34_spill] sm:$0xff] }
 0x1eb   : > { %v1906_v1 = vsel %vm10604_vm5, %v6711_v4, 512  ;;  %vm10611_vm3 = vcmp.eq.f32.partialorder %v10543_v8, %v6565_v14  ;;  %vm10612_vm4 = vcmp.eq.f32.partialorder %v10544_v59, %v6565_v14  ;;  %vm10613_vm5 = vcmp.eq.f32.partialorder %v10545_v2, %v6565_v14  ;;  %v10617_v2 = vld [vmem:[#allocation15_spill] sm:$0xff] }
 0x1ec   : > { %v6920_v41 = vsel %vm10611_vm3, %v6769_v30, 512  ;;  %v6926_v53 = vsel %vm10612_vm4, %v6775_v19, 512  ;;  %v6932_v60 = vsel %vm10613_vm5, %v6781_v51, 512  ;;  %v6944_v8 = vsel %vm10615_vm7, %v6793_v48, 512  ;;  %v10620_v48 = vld [vmem:[#allocation20_spill] sm:$0xff]  ;;  %v10623_v30 = vld [vmem:[#allocation26_spill] sm:$0xff] }
 0x1ed   : > { %v6950_v59 = vsel %vm10616_vm8, %v6796_v23, 512  ;;  %vm2012_vm9 = vcmp.lt.s32.totalorder %v1884_v15, %v1888_v6  ;;  %vm2014_vm10 = vcmp.lt.s32.totalorder %v1886_v34, %v1890_v29  ;;  %v10622_v23 = vld [vmem:[#allocation24_spill] sm:$0xff] }
 0x1ee   : > { %v2013_v40 = vsel %vm2012_vm9, %v1884_v15, %v1888_v6  ;;  %v2015_v26 = vsel %vm2014_vm10, %v1886_v34, %v1890_v29  ;;  %v10624_v15 = vld [vmem:[#allocation28_spill] sm:$0xff]  ;;  %v10625_v6 = vld [vmem:[#allocation30_spill] sm:$0xff]  ;;  %vm10686_vm10 = vcmp.eq.f32.partialorder %v10685_v10, %v6565_v14 }
 0x1ef   : > { %vm2016_vm6 = vcmp.lt.s32.totalorder %v2013_v40, %v1892_v50  ;;  %vm2018_vm7 = vcmp.lt.s32.totalorder %v2015_v26, %v1894_v11  ;;  %v10626_v34 = vld [vmem:[#allocation32_spill] sm:$0xff] }
 0x1f0   : > { %v2017_v51 = vsel %vm2016_vm6, %v2013_v40, %v1892_v50  ;;  %v2019_v19 = vsel %vm2018_vm7, %v2015_v26, %v1894_v11  ;;  %v10628_v26 = vld [vmem:[#allocation36_spill] sm:$0xff]  ;;  %v10629_v50 = vld [vmem:[#allocation39_spill] sm:$0xff] }
 0x1f1   : > { %vm2020_vm4 = vcmp.lt.s32.totalorder %v2017_v51, %v1896_v24  ;;  %vm2022_vm3 = vcmp.lt.s32.totalorder %v2019_v19, %v1898_v12  ;;  %v10635_v11 = vld [vmem:[#allocation63_spill] sm:$0xff] }
 0x1f2   : > { %v2021_v29 = vsel %vm2020_vm4, %v2017_v51, %v1896_v24  ;;  %v2023_v17 = vsel %vm2022_vm3, %v2019_v19, %v1898_v12  ;;  %v10632_v51 = vld [vmem:[#allocation51_spill] sm:$0xff] }
 0x1f3   : > { %vm2024_vm9 = vcmp.lt.s32.totalorder %v2021_v29, %v1900_v44  ;;  %vm2026_vm1 = vcmp.lt.s32.totalorder %v2023_v17, %v1902_v54  ;;  %v10634_v24 = vld [vmem:[#allocation59_spill] sm:$0xff] }
 0x1f4   : > { %v2025_v40 = vsel %vm2024_vm9, %v2021_v29, %v1900_v44  ;;  %v2027_v20 = vsel %vm2026_vm1, %v2023_v17, %v1902_v54  ;;  %v10636_v17 = vld [vmem:[#allocation67_spill] sm:$0xff] }
 0x1f5   : > { %vm2028_vm6 = vcmp.lt.s32.totalorder %v2025_v40, %v1904_v43  ;;  %vm2030_vm11 = vcmp.lt.s32.totalorder %v2027_v20, %v1906_v1  ;;  %v10637_v44 = vld [vmem:[#allocation71_spill] sm:$0xff] }
 0x1f6   : > { %v2029_v12 = vsel %vm2028_vm6, %v2025_v40, %v1904_v43  ;;  %v2031_v13 = vsel %vm2030_vm11, %v2027_v20, %v1906_v1  ;;  %v10670_v1 = vld [vmem:[#allocation164_spill] sm:$0xff] }
 0x1f7   : > { %vm2032_vm4 = vcmp.lt.s32.totalorder %v2029_v12, %v1908_v3  ;;  %vm2034_vm8 = vcmp.lt.s32.totalorder %v2031_v13, %v1910_v45  ;;  %v10671_v43 = vld [vmem:[#allocation100_spill] sm:$0xff] }
 0x1f8   : > { %v2033_v29 = vsel %vm2032_vm4, %v2029_v12, %v1908_v3  ;;  %v2035_v19 = vsel %vm2034_vm8, %v2031_v13, %v1910_v45  ;;  %v7065_v12 = vadd.s32 288, %v6573_v18  ;;  %v7082_v3 = vadd.s32 312, %v6573_v18 }
 0x1f9   : > { %vm2036_vm9 = vcmp.lt.s32.totalorder %v2033_v29, %v6896_v25  ;;  %vm2038_vm1 = vcmp.lt.s32.totalorder %v2035_v19, %v6902_v39 }
 0x1fa   : > { %v2037_v20 = vsel %vm2036_vm9, %v2033_v29, %v6896_v25  ;;  %v2039_v13 = vsel %vm2038_vm1, %v2035_v19, %v6902_v39  ;;  %v10654_v19 = vld [vmem:[#allocation160_spill] sm:$0xff]  ;;  %10660 = vst [vmem:[#allocation15_spill] sm:$0xff] %v7065_v12  ;;  %v10665_v39 = vld [vmem:[#allocation163_spill] sm:$0xff]  ;;  %10669 = vst [vmem:[#allocation20_spill] sm:$0xff] %v7082_v3 }
 0x1fb   : > { %vm2040_vm11 = vcmp.lt.s32.totalorder %v2037_v20, %v6908_v46  ;;  %vm2042_vm6 = vcmp.lt.s32.totalorder %v2039_v13, %v6914_v62 }
 0x1fc   : > { %v2041_v45 = vsel %vm2040_vm11, %v2037_v20, %v6908_v46  ;;  %v2043_v25 = vsel %vm2042_vm6, %v2039_v13, %v6914_v62  ;;  %v7068_v20 = vadd.s32 296, %v6573_v18  ;;  %v10662_v13 = vld [vmem:[#allocation162_spill] sm:$0xff] }
 0x1fd   : > { %vm2044_vm4 = vcmp.lt.s32.totalorder %v2041_v45, %v6920_v41  ;;  %vm2046_vm8 = vcmp.lt.s32.totalorder %v2043_v25, %v6926_v53 }
 0x1fe   : > { %v2045_v46 = vsel %vm2044_vm4, %v2041_v45, %v6920_v41  ;;  %v2047_v62 = vsel %vm2046_vm8, %v2043_v25, %v6926_v53  ;;  %10661 = vst [vmem:[#allocation19_spill] sm:$0xff] %v7068_v20  ;;  %vm10672_vm4 = vcmp.eq.f32.partialorder %v10671_v43, %v6565_v14 }
 0x1ff   : > { %vm2048_vm1 = vcmp.lt.s32.totalorder %v2045_v46, %v6932_v60  ;;  %vm2050_vm9 = vcmp.lt.s32.totalorder %v2047_v62, %v6938_v7 }
 0x200   : > { %v2049_v41 = vsel %vm2048_vm1, %v2045_v46, %v6932_v60  ;;  %v2051_v53 = vsel %vm2050_vm9, %v2047_v62, %v6938_v7  ;;  %v10655_v60 = vld [vmem:[#allocation84_spill] sm:$0xff]  ;;  %v10657_v46 = vld [vmem:[#allocation161_spill] sm:$0xff]  ;;  %v10658_v62 = vld [vmem:[#allocation87_spill] sm:$0xff] }
 0x201   : > { %vm2052_vm11 = vcmp.lt.s32.totalorder %v2049_v41, %v6944_v8  ;;  %vm2054_vm6 = vcmp.lt.s32.totalorder %v2051_v53, %v6950_v59  ;;  %vm10656_vm9 = vcmp.eq.f32.partialorder %v10655_v60, %v6565_v14  ;;  %vm10659_vm1 = vcmp.eq.f32.partialorder %v10658_v62, %v6565_v14  ;;  %v10663_v60 = vld [vmem:[#allocation92_spill] sm:$0xff]  ;;  %v10666_v62 = vld [vmem:[#allocation95_spill] sm:$0xff] }
 0x202   : > { %v1932_v7 = vsel %vm10656_vm9, %v10654_v19, 512  ;;  %v1934_v25 = vsel %vm10659_vm1, %v10657_v46, 512  ;;  %v2053_v45 = vsel %vm2052_vm11, %v2049_v41, %v6944_v8  ;;  %v2055_v29 = vsel %vm2054_vm6, %v2051_v53, %v6950_v59  ;;  %v10691_v46 = vld [vmem:[#allocation45_spill] sm:$0xff]  ;;  %v10707_v19 = vld [vmem:[#allocation120_spill] sm:$0xff] }
 0x203   : > { %vm2056_vm3 = vcmp.lt.s32.totalorder %v2053_v45, %v1932_v7  ;;  %vm2058_vm5 = vcmp.lt.s32.totalorder %v2055_v29, %v1934_v25  ;;  %vm10664_vm9 = vcmp.eq.f32.partialorder %v10663_v60, %v6565_v14  ;;  %vm10667_vm1 = vcmp.eq.f32.partialorder %v10666_v62, %v6565_v14 }
 0x204   : > { %v1936_v40 = vsel %vm10664_vm9, %v10662_v13, 512  ;;  %v1938_v8 = vsel %vm10667_vm1, %v10665_v39, 512  ;;  %v2057_v41 = vsel %vm2056_vm3, %v2053_v45, %v1932_v7  ;;  %v2059_v59 = vsel %vm2058_vm5, %v2055_v29, %v1934_v25  ;;  %v10677_v39 = vld [vmem:[#allocation166_spill] sm:$0xff]  ;;  %v10678_v13 = vld [vmem:[#allocation108_spill] sm:$0xff] }
 0x205   : > { %v7079_v53 = vadd.s32 304, %v6573_v18  ;;  %vm2060_vm6 = vcmp.lt.s32.totalorder %v2057_v41, %v1936_v40  ;;  %vm2062_vm11 = vcmp.lt.s32.totalorder %v2059_v59, %v1938_v8  ;;  %v1940_v60 = vsel %vm10672_vm4, %v10670_v1, 512  ;;  %v10680_v1 = vld [vmem:[#allocation112_spill] sm:$0xff] }
 0x206   : > { %vm10674_vm9 = vcmp.eq.f32.partialorder %v10673_v38, %v6565_v14  ;;  %v2061_v45 = vsel %vm2060_vm6, %v2057_v41, %v1936_v40  ;;  %v2063_v29 = vsel %vm2062_vm11, %v2059_v59, %v1938_v8  ;;  %v7093_v25 = vadd.s32 320, %v6573_v18  ;;  %v10682_v41 = vld [vmem:[#allocation77_spill] sm:$0xff]  ;;  %v10683_v59 = vld [vmem:[#allocation78_spill] sm:$0xff] }
 0x207   : > { %10668 = vst [vmem:[#allocation16_spill] sm:$0xff] %v7079_v53  ;;  %v1942_v62 = vsel %vm10674_vm9, %v6814_v0, 512  ;;  %v7096_v7 = vadd.s32 328, %v6573_v18  ;;  %vm2064_vm5 = vcmp.lt.s32.totalorder %v2061_v45, %v1940_v60  ;;  %vm10679_vm1 = vcmp.eq.f32.partialorder %v10678_v13, %v6565_v14  ;;  %v10684_v0 = vld [vmem:[#allocation168_spill] sm:$0xff] }
 0x208   : > { %10675 = vst [vmem:[#allocation22_spill] sm:$0xff] %v7093_v25  ;;  %vm2066_vm3 = vcmp.lt.s32.totalorder %v2063_v29, %v1942_v62  ;;  %v1944_v43 = vsel %vm10679_vm1, %v10677_v39, 512  ;;  %vm10681_vm4 = vcmp.eq.f32.partialorder %v10680_v1, %v6565_v14  ;;  %v2065_v40 = vsel %vm2064_vm5, %v2061_v45, %v1940_v60  ;;  %v10688_v45 = vld [vmem:[#allocation82_spill] sm:$0xff] }
 0x209   : > { %10676 = vst [vmem:[#allocation24_spill] sm:$0xff] %v7096_v7  ;;  %v1946_v38 = vsel %vm10681_vm4, %v6820_v36, 512  ;;  %v2067_v8 = vsel %vm2066_vm3, %v2063_v29, %v1942_v62  ;;  %vm1840_vm6 = vcmp.eq.f32.partialorder %v10682_v41, %v6565_v14  ;;  %vm1842_vm11 = vcmp.eq.f32.partialorder %v10683_v59, %v6565_v14  ;;  %v10689_v29 = vld [vmem:[#allocation85_spill] sm:$0xff]  ;;  %v10690_v36 = vld [vmem:[#allocation170_spill] sm:$0xff] }
 0x20a   : > { %vm2068_vm9 = vcmp.lt.s32.totalorder %v2065_v40, %v1944_v43  ;;  %vm2070_vm8 = vcmp.lt.s32.totalorder %v2067_v8, %v1946_v38  ;;  %v1948_v13 = vsel %vm10686_vm10, %v10684_v0, 512  ;;  %v1950_v1 = vsel %vm1822_vm15, %v6826_v42, 512  ;;  %v10693_v0 = vld [vmem:[#allocation44_spill] sm:$0xff]  ;;  %v10702_v42 = vld [vmem:[#allocation110_spill] sm:$0xff] }
 0x20b   : > { %v2069_v60 = vsel %vm2068_vm9, %v2065_v40, %v1944_v43  ;;  %v2071_v62 = vsel %vm2070_vm8, %v2067_v8, %v1946_v38  ;;  %vm1844_vm5 = vcmp.eq.f32.partialorder %v10688_v45, %v6565_v14  ;;  %vm10692_vm7 = vcmp.eq.f32.partialorder %v10691_v46, %v6565_v14  ;;  %v10695_v40 = vld [vmem:[#allocation90_spill] sm:$0xff]  ;;  %v10696_v8 = vld [vmem:[#allocation93_spill] sm:$0xff] }
 0x20c   : > { %vm2072_vm1 = vcmp.lt.s32.totalorder %v2069_v60, %v1948_v13  ;;  %vm2074_vm4 = vcmp.lt.s32.totalorder %v2071_v62, %v1950_v1  ;;  %v1952_v10 = vsel %vm10692_vm7, %v10690_v36, 512  ;;  %vm10694_vm10 = vcmp.eq.f32.partialorder %v10693_v0, %v6565_v14 }
 0x20d   : > { %v1954_v39 = vsel %vm10694_vm10, %v6832_v37, 512  ;;  %v2073_v43 = vsel %vm2072_vm1, %v2069_v60, %v1948_v13  ;;  %v2075_v38 = vsel %vm2074_vm4, %v2071_v62, %v1950_v1  ;;  %vm1848_vm15 = vcmp.eq.f32.partialorder %v10695_v40, %v6565_v14  ;;  %v10699_v60 = vld [vmem:[#allocation98_spill] sm:$0xff]  ;;  %v10700_v62 = vld [vmem:[#allocation101_spill] sm:$0xff] }
 0x20e   : > { %vm2076_vm9 = vcmp.lt.s32.totalorder %v2073_v43, %v1952_v10  ;;  %vm2078_vm3 = vcmp.lt.s32.totalorder %v2075_v38, %v1954_v39  ;;  %v1956_v46 = vsel %vm1828_vm2, %v7065_v12, 512  ;;  %v1958_v0 = vsel %vm1830_vm12, %v7068_v20, 512  ;;  %v10701_v37 = vld [vmem:[#allocation106_spill] sm:$0xff]  ;;  %v10708_v12 = vld [vmem:[#allocation40_spill] sm:$0xff] }
 0x20f   : > { %v2077_v13 = vsel %vm2076_vm9, %v2073_v43, %v1952_v10  ;;  %v2079_v1 = vsel %vm2078_vm3, %v2075_v38, %v1954_v39  ;;  %vm1852_vm7 = vcmp.eq.f32.partialorder %v10699_v60, %v6565_v14  ;;  %vm1854_vm1 = vcmp.eq.f32.partialorder %v10700_v62, %v6565_v14  ;;  %v10705_v20 = vld [vmem:[#allocation114_spill] sm:$0xff]  ;;  %v10734_v60 = vld [vmem:[#allocation73_spill] sm:$0xff] }
 0x210   : > { %vm2080_vm4 = vcmp.lt.s32.totalorder %v2077_v13, %v1956_v46  ;;  %vm2082_vm10 = vcmp.lt.s32.totalorder %v2079_v1, %v1958_v0  ;;  %v1960_v36 = vsel %vm1832_vm13, %v7079_v53, 512  ;;  %v1962_v39 = vsel %vm1834_vm14, %v7082_v3, 512  ;;  %v10712_v3 = vld [vmem:[#allocation123_spill] sm:$0xff] }
 0x211   : > { %v2081_v43 = vsel %vm2080_vm4, %v2077_v13, %v1956_v46  ;;  %v2083_v38 = vsel %vm2082_vm10, %v2079_v1, %v1958_v0  ;;  %vm1860_vm12 = vcmp.eq.f32.partialorder %v10705_v20, %v6565_v14  ;;  %vm1862_vm3 = vcmp.eq.f32.partialorder %v10706_v16, %v6565_v14  ;;  %v10710_v0 = vld [vmem:[#allocation68_spill] sm:$0xff] }
 0x212   : > { %vm2084_vm9 = vcmp.lt.s32.totalorder %v2081_v43, %v1960_v36  ;;  %vm2086_vm2 = vcmp.lt.s32.totalorder %v2083_v38, %v1962_v39  ;;  %v1964_v46 = vsel %vm1836_vm0, %v7093_v25, 512  ;;  %vm10711_vm14 = vcmp.eq.f32.partialorder %v10710_v0, %v6565_v14  ;;  %v10715_v25 = vld [vmem:[#allocation27_spill] sm:$0xff]  ;;  %v10740_v20 = vld [vmem:[#allocation144_spill] sm:$0xff] }
 0x213   : > { %v1966_v13 = vsel %vm10711_vm14, %v7096_v7, 512  ;;  %v2085_v1 = vsel %vm2084_vm9, %v2081_v43, %v1960_v36  ;;  %v2087_v10 = vsel %vm2086_vm2, %v2083_v38, %v1962_v39  ;;  %vm1868_vm4 = vcmp.eq.f32.partialorder %v10712_v3, %v6565_v14  ;;  %v10716_v43 = vld [vmem:[#allocation127_spill] sm:$0xff]  ;;  %v10717_v38 = vld [vmem:[#allocation56_spill] sm:$0xff] }
 0x214   : > { %vm1870_vm10 = vcmp.eq.f32.partialorder %v10713_v63, %v6565_v14  ;;  %vm2088_vm8 = vcmp.lt.s32.totalorder %v2085_v1, %v1964_v46  ;;  %vm2090_vm13 = vcmp.lt.s32.totalorder %v2087_v10, %v1966_v13  ;;  %v1968_v53 = vsel %vm1840_vm6, %v10714_v57, 512  ;;  %v10718_v7 = vld [vmem:[#allocation31_spill] sm:$0xff]  ;;  %v10719_v57 = vld [vmem:[#allocation33_spill] sm:$0xff] }
 0x215   : > { %v1970_v0 = vsel %vm1842_vm11, %v10715_v25, 512  ;;  %v2089_v36 = vsel %vm2088_vm8, %v2085_v1, %v1964_v46  ;;  %v2091_v39 = vsel %vm2090_vm13, %v2087_v10, %v1966_v13  ;;  %vm1872_vm0 = vcmp.eq.f32.partialorder %v10716_v43, %v6565_v14  ;;  %v10721_v1 = vld [vmem:[#allocation131_spill] sm:$0xff]  ;;  %v10722_v10 = vld [vmem:[#allocation64_spill] sm:$0xff] }
 0x216   : > { %vm2092_vm9 = vcmp.lt.s32.totalorder %v2089_v36, %v1968_v53  ;;  %vm2094_vm14 = vcmp.lt.s32.totalorder %v2091_v39, %v1970_v0  ;;  %v1972_v41 = vsel %vm1844_vm5, %v10718_v7, 512  ;;  %vm10720_vm6 = vcmp.eq.f32.partialorder %v10689_v29, %v6565_v14  ;;  %v10723_v25 = vld [vmem:[#allocation35_spill] sm:$0xff]  ;;  %v10724_v7 = vld [vmem:[#allocation41_spill] sm:$0xff] }
 0x217   : > { %v1974_v59 = vsel %vm10720_vm6, %v10719_v57, 512  ;;  %v2093_v46 = vsel %vm2092_vm9, %v2089_v36, %v1968_v53  ;;  %v2095_v13 = vsel %vm2094_vm14, %v2091_v39, %v1970_v0  ;;  %vm1876_vm11 = vcmp.eq.f32.partialorder %v10721_v1, %v6565_v14  ;;  %v10726_v36 = vld [vmem:[#allocation134_spill] sm:$0xff]  ;;  %v10727_v39 = vld [vmem:[#allocation72_spill] sm:$0xff]  ;;  %v10728_v57 = vld [vmem:[#allocation49_spill] sm:$0xff] }
 0x218   : > { %vm2096_vm13 = vcmp.lt.s32.totalorder %v2093_v46, %v1972_v41  ;;  %vm2098_vm2 = vcmp.lt.s32.totalorder %v2095_v13, %v1974_v59  ;;  %v1976_v45 = vsel %vm1848_vm15, %v10723_v25, 512  ;;  %vm10725_vm5 = vcmp.eq.f32.partialorder %v10696_v8, %v6565_v14  ;;  %v10729_v25 = vld [vmem:[#allocation54_spill] sm:$0xff]  ;;  %v10745_v3 = vld [vmem:[#allocation151_spill] sm:$0xff] }
 0x219   : > { %v1978_v29 = vsel %vm10725_vm5, %v10724_v7, 512  ;;  %v2097_v53 = vsel %vm2096_vm13, %v2093_v46, %v1972_v41  ;;  %v2099_v0 = vsel %vm2098_vm2, %v2095_v13, %v1974_v59  ;;  %vm1880_vm9 = vcmp.eq.f32.partialorder %v10726_v36, %v6565_v14  ;;  %v10730_v46 = vld [vmem:[#allocation57_spill] sm:$0xff] }
 0x21a   : > { %vm1882_vm14 = vcmp.eq.f32.partialorder %v10727_v39, %v6565_v14  ;;  %vm2100_vm6 = vcmp.lt.s32.totalorder %v2097_v53, %v1976_v45  ;;  %vm2102_vm8 = vcmp.lt.s32.totalorder %v2099_v0, %v1978_v29  ;;  %v1980_v40 = vsel %vm1852_vm7, %v10728_v57, 512  ;;  %v10732_v7 = vld [vmem:[#allocation65_spill] sm:$0xff] }
 0x21b   : > { %v1982_v8 = vsel %vm1854_vm1, %v10729_v25, 512  ;;  %v2101_v41 = vsel %vm2100_vm6, %v2097_v53, %v1976_v45  ;;  %v2103_v59 = vsel %vm2102_vm8, %v2099_v0, %v1978_v29  ;;  %vm10731_vm15 = vcmp.eq.f32.partialorder %v10701_v37, %v6565_v14  ;;  %v10735_v25 = vld [vmem:[#allocation139_spill] sm:$0xff]  ;;  %v10736_v53 = vld [vmem:[#allocation140_spill] sm:$0xff]  ;;  %v10738_v0 = vld [vmem:[#allocation142_spill] sm:$0xff] }
 0x21c   : > { %v1984_v13 = vsel %vm10731_vm15, %v10730_v46, 512  ;;  %vm10733_vm2 = vcmp.eq.f32.partialorder %v10702_v42, %v6565_v14  ;;  %vm2104_vm13 = vcmp.lt.s32.totalorder %v2101_v41, %v1980_v40  ;;  %vm2106_vm5 = vcmp.lt.s32.totalorder %v2103_v59, %v1982_v8 }
 0x21d   : > { %v1986_v54 = vsel %vm10733_vm2, %v10732_v7, 512  ;;  %v1988_v62 = vsel %vm1860_vm12, %v10734_v60, 512  ;;  %v1990_v45 = vsel %vm1862_vm3, %v10735_v25, 512  ;;  %v2105_v29 = vsel %vm2104_vm13, %v2101_v41, %v1980_v40  ;;  %v10741_v25 = vld [vmem:[#allocation145_spill] sm:$0xff]  ;;  %v10742_v41 = vld [vmem:[#allocation147_spill] sm:$0xff] }
 0x21e   : > { %v2107_v37 = vsel %vm2106_vm5, %v2103_v59, %v1982_v8  ;;  %vm10737_vm7 = vcmp.eq.f32.partialorder %v10707_v19, %v6565_v14  ;;  %vm10739_vm1 = vcmp.eq.f32.partialorder %v10708_v12, %v6565_v14  ;;  %vm2108_vm8 = vcmp.lt.s32.totalorder %v2105_v29, %v1984_v13  ;;  %v10743_v59 = vld [vmem:[#allocation149_spill] sm:$0xff] }
 0x21f   : > { %v1992_v42 = vsel %vm10737_vm7, %v10736_v53, 512  ;;  %v1994_v7 = vsel %vm10739_vm1, %v10738_v0, 512  ;;  %vm2110_vm6 = vcmp.lt.s32.totalorder %v2107_v37, %v1986_v54  ;;  %v1996_v16 = vsel %vm1868_vm4, %v10740_v20, 512 }
 0x220   : > { %v1998_v40 = vsel %vm1870_vm10, %v10741_v25, 512  ;;  %v2109_v8 = vsel %vm2108_vm8, %v2105_v29, %v1984_v13  ;;  %v2111_v19 = vsel %vm2110_vm6, %v2107_v37, %v1986_v54  ;;  %v2000_v12 = vsel %vm1872_vm0, %v10742_v41, 512  ;;  %v10746_v25 = vld [vmem:[#allocation153_spill] sm:$0xff]  ;;  %v10748_v29 = vld [vmem:[#allocation155_spill] sm:$0xff] }
 0x221   : > { %vm10744_vm12 = vcmp.eq.f32.partialorder %v10717_v38, %v6565_v14  ;;  %vm2112_vm3 = vcmp.lt.s32.totalorder %v2109_v8, %v1988_v62  ;;  %vm2114_vm15 = vcmp.lt.s32.totalorder %v2111_v19, %v1990_v45  ;;  %v2004_v63 = vsel %vm1876_vm11, %v10745_v3, 512  ;;  %v10749_v37 = vld [vmem:[#allocation157_spill] sm:$0xff] }
 0x222   : > { %v2002_v0 = vsel %vm10744_vm12, %v10743_v59, 512  ;;  %vm10747_vm4 = vcmp.eq.f32.partialorder %v10722_v10, %v6565_v14  ;;  %v2113_v13 = vsel %vm2112_vm3, %v2109_v8, %v1988_v62  ;;  %v2115_v43 = vsel %vm2114_vm15, %v2111_v19, %v1990_v45  ;;  %v10766_v8 = vld [vmem:[#allocation141_spill] sm:$0xff]  ;;  %v10768_v19 = vld [vmem:[#allocation143_spill] sm:$0xff] }
 0x223   : > { %v2006_v54 = vsel %vm10747_vm4, %v10746_v25, 512  ;;  %v2008_v38 = vsel %vm1880_vm9, %v10748_v29, 512  ;;  %v2010_v59 = vsel %vm1882_vm14, %v10749_v37, 512  ;;  %vm2116_vm10 = vcmp.lt.s32.totalorder %v2113_v13, %v1992_v42 }
 0x224   : > { %vm2118_vm0 = vcmp.lt.s32.totalorder %v2115_v43, %v1994_v7  ;;  %v2117_v1 = vsel %vm2116_vm10, %v2113_v13, %v1992_v42  ;;  %vm10750_vm11 = vcmp.eq.f32.partialorder %v10617_v2, %v6834_v31  ;;  %vm10751_vm2 = vcmp.eq.f32.partialorder %v10618_v28, %v6834_v31 }
 0x225   : > { %v2119_v3 = vsel %vm2118_vm0, %v2115_v43, %v1994_v7  ;;  %v1885_v10 = vsel %vm10750_vm11, %v6573_v18, 512  ;;  %v1887_v36 = vsel %vm10751_vm2, %v6658_v49, 512  ;;  %vm2120_vm9 = vcmp.lt.s32.totalorder %v2117_v1, %v1996_v16  ;;  %v10773_v43 = vld [vmem:[#allocation148_spill] sm:$0xff] }
 0x226   : > { %vm2122_vm13 = vcmp.lt.s32.totalorder %v2119_v3, %v1998_v40  ;;  %vm10752_vm14 = vcmp.eq.f32.partialorder %v10619_v56, %v6834_v31  ;;  %vm10753_vm5 = vcmp.eq.f32.partialorder %v10620_v48, %v6834_v31  ;;  %v2121_v39 = vsel %vm2120_vm9, %v2117_v1, %v1996_v16  ;;  %v10763_v16 = vld [vmem:[#allocation70_spill] sm:$0xff] }
 0x227   : > { %v1889_v14 = vsel %vm10752_vm14, %v6665_v52, 512  ;;  %v1891_v7 = vsel %vm10753_vm5, %v6668_v9, 512  ;;  %v2123_v2 = vsel %vm2122_vm13, %v2119_v3, %v1998_v40  ;;  %vm10754_vm7 = vcmp.eq.f32.partialorder %v10621_v61, %v6834_v31  ;;  %v10764_v40 = vld [vmem:[#allocation43_spill] sm:$0xff]  ;;  %v10864_v52 = vld [vmem:[#allocation58_spill] sm:$0xff] }
 0x228   : > { %v1893_v28 = vsel %vm10754_vm7, %v6671_v27, 512  ;;  %vm10755_vm1 = vcmp.eq.f32.partialorder %v10622_v23, %v6834_v31  ;;  %vm2124_vm8 = vcmp.lt.s32.totalorder %v2121_v39, %v2000_v12  ;;  %vm2126_vm6 = vcmp.lt.s32.totalorder %v2123_v2, %v2002_v0  ;;  %v10875_v27 = vld [vmem:[#allocation136_spill] sm:$0xff] }
 0x229   : > { %v1895_v62 = vsel %vm10755_vm1, %v6674_v22, 512  ;;  %vm10756_vm12 = vcmp.eq.f32.partialorder %v10623_v30, %v6834_v31  ;;  %vm10757_vm3 = vcmp.eq.f32.partialorder %v10624_v15, %v6834_v31  ;;  %v2125_v45 = vsel %vm2124_vm8, %v2121_v39, %v2000_v12  ;;  %v10777_v39 = vld [vmem:[#allocation152_spill] sm:$0xff] }
 0x22a   : > { %v1897_v48 = vsel %vm10756_vm12, %v6677_v47, 512  ;;  %v1899_v56 = vsel %vm10757_vm3, %v6680_v58, 512  ;;  %v2127_v61 = vsel %vm2126_vm6, %v2123_v2, %v2002_v0  ;;  %vm10758_vm15 = vcmp.eq.f32.partialorder %v10625_v6, %v6834_v31  ;;  %v10779_v2 = vld [vmem:[#allocation154_spill] sm:$0xff] }
 0x22b   : > { %v7314_v23 = vsel %vm10758_vm15, %v6686_v32, 512  ;;  %vm10759_vm4 = vcmp.eq.f32.partialorder %v10626_v34, %v6834_v31  ;;  %vm2128_vm10 = vcmp.lt.s32.totalorder %v2125_v45, %v2004_v63  ;;  %vm2130_vm0 = vcmp.lt.s32.totalorder %v2127_v61, %v2006_v54  ;;  %v10829_v32 = vld [vmem:[#allocation115_spill] sm:$0xff]  ;;  %v10834_v47 = vld [vmem:[#allocation170_spill] sm:$0xff] }
 0x22c   : > { %v7320_v42 = vsel %vm10759_vm4, %v6692_v35, 512  ;;  %vm10760_vm11 = vcmp.eq.f32.partialorder %v10627_v5, %v6834_v31  ;;  %vm10761_vm2 = vcmp.eq.f32.partialorder %v10628_v26, %v6834_v31  ;;  %v2129_v6 = vsel %vm2128_vm10, %v2125_v45, %v2004_v63  ;;  %v10770_v63 = vld [vmem:[#allocation146_spill] sm:$0xff]  ;;  %v10830_v35 = vld [vmem:[#allocation169_spill] sm:$0xff] }
 0x22d   : > { %v7326_v30 = vsel %vm10760_vm11, %v6705_v21, 512  ;;  %v7332_v15 = vsel %vm10761_vm2, %v6711_v4, 512  ;;  %v2131_v0 = vsel %vm2130_vm0, %v2127_v61, %v2006_v54  ;;  %vm10762_vm9 = vcmp.eq.f32.partialorder %v10629_v50, %v6834_v31  ;;  %v10771_v54 = vld [vmem:[#allocation55_spill] sm:$0xff] }
 0x22e   : > { %v7338_v34 = vsel %vm10762_vm9, %v6723_v33, 512  ;;  %vm10765_vm13 = vcmp.eq.f32.partialorder %v10764_v40, %v6834_v31  ;;  %vm2132_vm14 = vcmp.lt.s32.totalorder %v2129_v6, %v2008_v38  ;;  %vm2134_vm5 = vcmp.lt.s32.totalorder %v2131_v0, %v2010_v59  ;;  %v2712_v61 = vld [vmem:[%s9882_s1 + $0x170] sm:$0xff] }
 0x22f   : > { %v7344_v5 = vsel %vm10765_vm13, %v10763_v16, 512  ;;  %vm10767_vm7 = vcmp.eq.f32.partialorder %v10631_v55, %v6834_v31  ;;  %vm10769_vm1 = vcmp.eq.f32.partialorder %v10632_v51, %v6834_v31  ;;  %v2133_v12 = vsel %vm2132_vm14, %v2129_v6, %v2008_v38  ;;  %v2681_v51 = vld [vmem:[%s9882_s1 + $0x78] sm:$0xff]  ;;  %v10775_v38 = vld [vmem:[#allocation150_spill] sm:$0xff] }
 0x230   : > { %v7350_v26 = vsel %vm10767_vm7, %v10766_v8, 512  ;;  %v7356_v50 = vsel %vm10769_vm1, %v10768_v19, 512  ;;  %v2135_v3 = vsel %vm2134_vm5, %v2131_v0, %v2010_v59  ;;  %vm10772_vm8 = vcmp.eq.f32.partialorder %v10771_v54, %v6834_v31  ;;  %v2697_v59 = vld [vmem:[%s9882_s1 + $0xf8] sm:$0xff]  ;;  %v10782_v40 = vld [vmem:[#allocation74_spill] sm:$0xff]  ;;  %v10814_v19 = vld [vmem:[#allocation97_spill] sm:$0xff] }
 0x231   : > { %v7362_v13 = vsel %vm10772_vm8, %v10770_v63, 512  ;;  %vm10774_vm6 = vcmp.eq.f32.partialorder %v10634_v24, %v6834_v31  ;;  %vm2136_vm12 = vcmp.lt.s32.totalorder %v2133_v12, %v2135_v3  ;;  %vm10776_vm3 = vcmp.eq.f32.partialorder %v10635_v11, %v6834_v31  ;;  %v2728_v11 = vld [vmem:[%s9882_s1 + $0x1f0] sm:$0xff]  ;;  %v10781_v0 = vld [vmem:[#allocation156_spill] sm:$0xff] }
 0x232   : > { %v7368_v55 = vsel %vm10774_vm6, %v10773_v43, 512  ;;  %v7380_v1 = vsel %vm10776_vm3, %v10775_v38, 512  ;;  %vm10778_vm15 = vcmp.eq.f32.partialorder %v10636_v17, %v6834_v31  ;;  %vm10780_vm4 = vcmp.eq.f32.partialorder %v10637_v44, %v6834_v31  ;;  %v10785_v63 = vld [vmem:[#allocation79_spill] sm:$0xff]  ;;  %v10791_v43 = vld [vmem:[#allocation160_spill] sm:$0xff] }
 0x233   : > { %v7386_v24 = vsel %vm10778_vm15, %v10777_v39, 512  ;;  %v7392_v45 = vsel %vm10780_vm4, %v10779_v2, 512  ;;  %v2137_v6 = vsel %vm2136_vm12, %v2133_v12, %v2135_v3  ;;  %vm10783_vm10 = vcmp.eq.f32.partialorder %v10782_v40, %v6834_v31  ;;  %v2713_v39 = vld [vmem:[%s9882_s1 + $0x178] sm:$0xff]  ;;  %v10784_v3 = vld [vmem:[#allocation158_spill] sm:$0xff] }
 0x234   : > { %v7404_v17 = vsel %vm10783_vm10, %v10781_v0, 512  ;;  %vm2147_vm0 = vcmp.lt.s32.totalorder %v1885_v10, %v1889_v14  ;;  %vm2149_vm11 = vcmp.lt.s32.totalorder %v1887_v36, %v1891_v7  ;;  %v2138_v44 = vrot.slane %v2137_v6, 4  ;;  %v2729_v12 = vld [vmem:[%s9882_s1 + $0x1f8] sm:$0xff] }
 0x235   : > { %v2148_v54 = vsel %vm2147_vm0, %v1885_v10, %v1889_v14  ;;  %v2150_v2 = vsel %vm2149_vm11, %v1887_v36, %v1891_v7  ;;  %v4734_v38 = vpack.i.bf16 %v2681_v51, %v2697_v59  ;;  %vm10786_vm2 = vcmp.eq.f32.partialorder %v10785_v63, %v6834_v31  ;;  %v10787_v10 = vld [vmem:[#allocation159_spill] sm:$0xff]  ;;  %v10788_v36 = vld [vmem:[#allocation80_spill] sm:$0xff]  ;;  %v10792_v63 = vld [vmem:[#allocation86_spill] sm:$0xff] }
 0x236   : > { %v7416_v40 = vsel %vm10786_vm2, %v10784_v3, 512  ;;  %vm2151_vm9 = vcmp.lt.s32.totalorder %v2148_v54, %v1893_v28  ;;  %vm2153_vm13 = vcmp.lt.s32.totalorder %v2150_v2, %v1895_v62  ;;  %v4784_v0 = vpack.i.bf16 %v2712_v61, %v2728_v11  ;;  %v10790_v59 = vld [vmem:[#allocation75_spill] sm:$0xff] }
 0x237   : > { %vm2139_vm14 = vcmp.lt.s32.totalorder %v2137_v6, %v2138_v44  ;;  %vm10789_vm5 = vcmp.eq.f32.partialorder %v10788_v36, %v6834_v31  ;;  %v2152_v7 = vsel %vm2151_vm9, %v2148_v54, %v1893_v28  ;;  %v2154_v51 = vsel %vm2153_vm13, %v2150_v2, %v1895_v62  ;;  %4735 = vxpose.xlu0.b32.end [16/16] (narrow) %v4734_v38, 32  ;;  %v10794_v36 = vld [vmem:[#allocation76_spill] sm:$0xff]  ;;  %v10795_v28 = vld [vmem:[#allocation81_spill] sm:$0xff]  ;;  %v10815_v33 = vld [vmem:[#allocation99_spill] sm:$0xff] }
 0x238   : > { %v7422_v14 = vsel %vm10789_vm5, %v10787_v10, 512  ;;  %vm1841_vm7 = vcmp.eq.f32.partialorder %v10790_v59, %v6834_v31  ;;  %vm10793_vm1 = vcmp.eq.f32.partialorder %v10792_v63, %v6834_v31  ;;  %vm2155_vm8 = vcmp.lt.s32.totalorder %v2152_v7, %v1897_v48  ;;  %4785 = vxpose.xlu1.b32.cont [15/16] (narrow) %v4784_v0, 32  ;;  %v10796_v62 = vld [vmem:[#allocation161_spill] sm:$0xff]  ;;  %v10797_v38 = vld [vmem:[#allocation88_spill] sm:$0xff]  ;;  %v10802_v0 = vld [vmem:[#allocation94_spill] sm:$0xff] }
 0x239   : > { %v7430_v3 = vsel %vm10793_vm1, %v10791_v43, 512  ;;  %vm2157_vm6 = vcmp.lt.s32.totalorder %v2154_v51, %v1899_v56  ;;  %v4786_v61 = vpack.i.bf16 %v2713_v39, %v2729_v12  ;;  %v2140_v11 = vsel %vm2139_vm14, %v2137_v6, %v2138_v44  ;;  %v10799_v43 = vld [vmem:[#allocation83_spill] sm:$0xff]  ;;  %v10800_v39 = vld [vmem:[#allocation89_spill] sm:$0xff]  ;;  %v10801_v6 = vld [vmem:[#allocation162_spill] sm:$0xff] }
 0x23a   : > { %vm1843_vm12 = vcmp.eq.f32.partialorder %v10794_v36, %v6834_v31  ;;  %vm1845_vm3 = vcmp.eq.f32.partialorder %v10795_v28, %v6834_v31  ;;  %vm10798_vm15 = vcmp.eq.f32.partialorder %v10797_v38, %v6834_v31  ;;  %v2156_v54 = vsel %vm2155_vm8, %v2152_v7, %v1897_v48  ;;  %v10804_v12 = vld [vmem:[#allocation163_spill] sm:$0xff]  ;;  %v10805_v10 = vld [vmem:[#allocation96_spill] sm:$0xff]  ;;  %v10809_v7 = vld [vmem:[#allocation102_spill] sm:$0xff] }
 0x23b   : > { %v7440_v2 = vsel %vm10798_vm15, %v10796_v62, 512  ;;  %v2158_v63 = vsel %vm2157_vm6, %v2154_v51, %v1899_v56  ;;  %vm1847_vm4 = vcmp.eq.f32.partialorder %v10799_v43, %v6834_v31  ;;  %vm1849_vm10 = vcmp.eq.f32.partialorder %v10800_v39, %v6834_v31  ;;  %v10807_v48 = vld [vmem:[#allocation91_spill] sm:$0xff]  ;;  %v10808_v56 = vld [vmem:[#allocation164_spill] sm:$0xff] }
 0x23c   : > { %vm10803_vm0 = vcmp.eq.f32.partialorder %v10802_v0, %v6834_v31  ;;  %vm10806_vm11 = vcmp.eq.f32.partialorder %v10805_v10, %v6834_v31  ;;  %vm2159_vm2 = vcmp.lt.s32.totalorder %v2156_v54, %v7314_v23  ;;  %vm2161_vm9 = vcmp.lt.s32.totalorder %v2158_v63, %v7320_v42  ;;  %v10811_v0 = vld [vmem:[#allocation165_spill] sm:$0xff]  ;;  %4787 = vxpose.xlu1.b32.end [16/16] (narrow) %v4786_v61, 32  ;;  %v10828_v4 = vld [vmem:[#allocation111_spill] sm:$0xff] }
 0x23d   : > { %v7450_v44 = vsel %vm10803_vm0, %v10801_v6, 512  ;;  %v7456_v38 = vsel %vm10806_vm11, %v10804_v12, 512  ;;  %vm1851_vm13 = vcmp.eq.f32.partialorder %v10807_v48, %v6834_v31  ;;  %vm10810_vm14 = vcmp.eq.f32.partialorder %v10809_v7, %v6834_v31  ;;  %v10812_v6 = vld [vmem:[#allocation104_spill] sm:$0xff]  ;;  %v10816_v7 = vld [vmem:[#allocation166_spill] sm:$0xff] }
 0x23e   : > { %v7466_v51 = vsel %vm10810_vm14, %v10808_v56, 512  ;;  %vm10813_vm5 = vcmp.eq.f32.partialorder %v10812_v6, %v6834_v31  ;;  %v2160_v12 = vsel %vm2159_vm2, %v2156_v54, %v7314_v23  ;;  %v2162_v62 = vsel %vm2161_vm9, %v2158_v63, %v7320_v42  ;;  %v10817_v56 = vld [vmem:[#allocation109_spill] sm:$0xff]  ;;  %v10820_v42 = vld [vmem:[#allocation107_spill] sm:$0xff] }
 0x23f   : > { %v7472_v10 = vsel %vm10813_vm5, %v10811_v0, 512  ;;  %v2141_v8 = vrot.slane %v2140_v11, 2  ;;  %vm1853_vm1 = vcmp.eq.f32.partialorder %v10814_v19, %v6834_v31  ;;  %vm1855_vm8 = vcmp.eq.f32.partialorder %v10815_v33, %v6834_v31  ;;  %v10819_v23 = vld [vmem:[#allocation105_spill] sm:$0xff]  ;;  %v10821_v54 = vld [vmem:[#allocation167_spill] sm:$0xff] }
 0x240   : > { %vm10818_vm6 = vcmp.eq.f32.partialorder %v10817_v56, %v6834_v31  ;;  %vm2163_vm15 = vcmp.lt.s32.totalorder %v2160_v12, %v7326_v30  ;;  %vm2165_vm0 = vcmp.lt.s32.totalorder %v2162_v62, %v7332_v15  ;;  %v10822_v63 = vld [vmem:[#allocation113_spill] sm:$0xff]  ;;  %v10824_v56 = vld [vmem:[#allocation168_spill] sm:$0xff]  ;;  %v7648_v43 = vsel %vm1853_vm1, %v10728_v57, 512 }
 0x241   : > { %v7484_v16 = vsel %vm10818_vm6, %v10816_v7, 512  ;;  %vm10823_vm9 = vcmp.eq.f32.partialorder %v10822_v63, %v6834_v31  ;;  %v10825_v7 = vld [vmem:[#allocation119_spill] sm:$0xff]  ;;  %v2164_v61 = vsel %vm2163_vm15, %v2160_v12, %v7326_v30  ;;  %v2166_v21 = vsel %vm2165_vm0, %v2162_v62, %v7332_v15  ;;  %v10831_v63 = vld [vmem:[#allocation121_spill] sm:$0xff] }
 0x242   : > { %v7496_v6 = vsel %vm10823_vm9, %v10821_v54, 512  ;;  %vm10826_vm14 = vcmp.eq.f32.partialorder %v10825_v7, %v6834_v31  ;;  %vm10832_vm9 = vcmp.eq.f32.partialorder %v10831_v63, %v6834_v31  ;;  %v10835_v7 = vld [vmem:[#allocation124_spill] sm:$0xff]  ;;  %vm2167_vm15 = vcmp.lt.s32.totalorder %v2164_v61, %v7338_v34  ;;  %v10838_v30 = vld [vmem:[#allocation117_spill] sm:$0xff]  ;;  %v10839_v15 = vld [vmem:[#allocation171_spill] sm:$0xff] }
 0x243   : > { %v7502_v0 = vsel %vm10826_vm14, %v10824_v56, 512  ;;  %v7514_v54 = vsel %vm10832_vm9, %v10830_v35, 512  ;;  %vm10836_vm14 = vcmp.eq.f32.partialorder %v10835_v7, %v6834_v31  ;;  %vm2169_vm0 = vcmp.lt.s32.totalorder %v2166_v21, %v7344_v5  ;;  %v10840_v62 = vld [vmem:[#allocation125_spill] sm:$0xff]  ;;  %v10843_v63 = vld [vmem:[#allocation15_spill] sm:$0xff]  ;;  %v10844_v35 = vld [vmem:[#allocation128_spill] sm:$0xff] }
 0x244   : > { %10827 = vst [vmem:[#allocation26_spill] sm:$0xff] %v7502_v0  ;;  %10833 = vst [vmem:[#allocation28_spill] sm:$0xff] %v7514_v54  ;;  %v7520_v56 = vsel %vm10836_vm14, %v10834_v47, 512  ;;  %vm10841_vm6 = vcmp.eq.f32.partialorder %v10840_v62, %v6834_v31  ;;  %vm10845_vm9 = vcmp.eq.f32.partialorder %v10844_v35, %v6834_v31  ;;  %v2168_v47 = vsel %vm2167_vm15, %v2164_v61, %v7338_v34  ;;  %v10850_v62 = vld [vmem:[#allocation122_spill] sm:$0xff]  ;;  %v10858_v61 = vld [vmem:[#allocation133_spill] sm:$0xff] }
 0x245   : > { %10837 = vst [vmem:[#allocation30_spill] sm:$0xff] %v7520_v56  ;;  %v7530_v12 = vsel %vm10841_vm6, %v10839_v15, 512  ;;  %v7536_v7 = vsel %vm10845_vm9, %v10843_v63, 512  ;;  %v2170_v58 = vsel %vm2169_vm0, %v2166_v21, %v7344_v5  ;;  %vm7540_vm14 = vcmp.lt.s32.totalorder %v2140_v11, %v2141_v8  ;;  %v10849_v56 = vld [vmem:[#allocation42_spill] sm:$0xff]  ;;  %v10851_v15 = vld [vmem:[#allocation19_spill] sm:$0xff]  ;;  %v10857_v5 = vld [vmem:[#allocation16_spill] sm:$0xff] }
 0x246   : > { %10842 = vst [vmem:[#allocation32_spill] sm:$0xff] %v7530_v12  ;;  %10846 = vst [vmem:[#allocation34_spill] sm:$0xff] %v7536_v7  ;;  %vm1867_vm5 = vcmp.eq.f32.partialorder %v10849_v56, %v6834_v31  ;;  %v10852_v12 = vld [vmem:[#allocation130_spill] sm:$0xff]  ;;  %vm2171_vm15 = vcmp.lt.s32.totalorder %v2168_v47, %v7350_v26  ;;  %vm2173_vm0 = vcmp.lt.s32.totalorder %v2170_v58, %v7356_v50  ;;  %v10861_v7 = vld [vmem:[#allocation20_spill] sm:$0xff] }
 0x247   : > { %vm10853_vm2 = vcmp.eq.f32.partialorder %v10852_v12, %v6834_v31  ;;  %v10855_v21 = vld [vmem:[#allocation50_spill] sm:$0xff]  ;;  %vm10859_vm6 = vcmp.eq.f32.partialorder %v10858_v61, %v6834_v31  ;;  %v10862_v12 = vld [vmem:[#allocation135_spill] sm:$0xff]  ;;  %v2174_v22 = vsel %vm2173_vm0, %v2170_v58, %v7356_v50  ;;  %vm1875_vm9 = vcmp.eq.f32.partialorder %v10864_v52, %v6834_v31  ;;  %v10866_v0 = vld [vmem:[#allocation137_spill] sm:$0xff] }
 0x248   : > { %v7552_v35 = vsel %vm10853_vm2, %v10851_v15, 512  ;;  %v10856_v34 = vld [vmem:[#allocation126_spill] sm:$0xff]  ;;  %v7564_v63 = vsel %vm10859_vm6, %v10857_v5, 512  ;;  %vm10863_vm2 = vcmp.eq.f32.partialorder %v10862_v12, %v6834_v31  ;;  %vm10867_vm11 = vcmp.eq.f32.partialorder %v10866_v0, %v6834_v31  ;;  %v10868_v5 = vld [vmem:[#allocation24_spill] sm:$0xff]  ;;  %v10871_v58 = vld [vmem:[#allocation129_spill] sm:$0xff] }
 0x249   : > { %10854 = vst [vmem:[#allocation36_spill] sm:$0xff] %v7552_v35  ;;  %10860 = vst [vmem:[#allocation39_spill] sm:$0xff] %v7564_v63  ;;  %v7570_v15 = vsel %vm10863_vm2, %v10861_v7, 512  ;;  %v2172_v35 = vsel %vm2171_vm15, %v2168_v47, %v7350_v26  ;;  %v10865_v54 = vld [vmem:[#allocation22_spill] sm:$0xff]  ;;  %vm2177_vm15 = vcmp.lt.s32.totalorder %v2174_v22, %v7368_v55  ;;  %v2143_v47 = vsel %vm7540_vm14, %v2140_v11, %v2141_v8  ;;  %v10873_v50 = vld [vmem:[#allocation23_spill] sm:$0xff] }
 0x24a   : > { %v7580_v61 = vsel %vm10867_vm11, %v10865_v54, 512  ;;  %v10869_v63 = vld [vmem:[#allocation138_spill] sm:$0xff]  ;;  %vm2175_vm2 = vcmp.lt.s32.totalorder %v2172_v35, %v7362_v13  ;;  %vm1877_vm0 = vcmp.eq.f32.partialorder %v10871_v58, %v6834_v31  ;;  %v7600_v0 = vsel %vm1841_vm7, %v10873_v50, 512  ;;  %v10874_v54 = vld [vmem:[#allocation132_spill] sm:$0xff]  ;;  %v10876_v8 = vld [vmem:[#allocation27_spill] sm:$0xff] }
 0x24b   : > { %vm10870_vm6 = vcmp.eq.f32.partialorder %v10869_v63, %v6834_v31  ;;  %v10872_v26 = vld [vmem:[#allocation66_spill] sm:$0xff]  ;;  %v2176_v63 = vsel %vm2175_vm2, %v2172_v35, %v7362_v13  ;;  %vm1883_vm14 = vcmp.eq.f32.partialorder %v10875_v27, %v6834_v31  ;;  %v7612_v11 = vsel %vm1843_vm12, %v10876_v8, 512  ;;  %v10877_v7 = vld [vmem:[#allocation31_spill] sm:$0xff]  ;;  %v10880_v50 = vld [vmem:[#allocation41_spill] sm:$0xff] }
 0x24c   : > { %v7586_v12 = vsel %vm10870_vm6, %v10868_v5, 512  ;;  %vm1879_vm11 = vcmp.eq.f32.partialorder %v10872_v26, %v6834_v31  ;;  %v2178_v5 = vsel %vm2177_vm15, %v2174_v22, %v7368_v55  ;;  %vm1881_vm6 = vcmp.eq.f32.partialorder %v10874_v54, %v6834_v31  ;;  %v10878_v22 = vld [vmem:[#allocation33_spill] sm:$0xff]  ;;  %v10879_v55 = vld [vmem:[#allocation35_spill] sm:$0xff] }
 0x24d   : > { %v7618_v59 = vsel %vm1845_vm3, %v10877_v7, 512  ;;  %vm2179_vm7 = vcmp.lt.s32.totalorder %v2176_v63, %v7380_v1  ;;  %vm2181_vm2 = vcmp.lt.s32.totalorder %v2178_v5, %v7386_v24  ;;  %v7626_v13 = vsel %vm1847_vm4, %v10878_v22, 512 }
 0x24e   : > { %v7632_v36 = vsel %vm1849_vm10, %v10879_v55, 512  ;;  %v2180_v28 = vsel %vm2179_vm7, %v2176_v63, %v7380_v1  ;;  %v2182_v35 = vsel %vm2181_vm2, %v2178_v5, %v7386_v24  ;;  %v2144_v7 = vrot.slane %v2143_v47, 1  ;;  %v10881_v1 = vld [vmem:[#allocation54_spill] sm:$0xff]  ;;  %v10883_v63 = vld [vmem:[#allocation65_spill] sm:$0xff] }
 0x24f   : > { %v7640_v8 = vsel %vm1851_vm13, %v10880_v50, 512  ;;  %vm2183_vm12 = vcmp.lt.s32.totalorder %v2180_v28, %v7392_v45  ;;  %vm2185_vm3 = vcmp.lt.s32.totalorder %v2182_v35, %v7404_v17  ;;  %v7654_v24 = vsel %vm1855_vm8, %v10881_v1, 512 }
 0x250   : > { %v2184_v39 = vsel %vm2183_vm12, %v2180_v28, %v7392_v45  ;;  %v2186_v48 = vsel %vm2185_vm3, %v2182_v35, %v7404_v17  ;;  %vm10882_vm4 = vcmp.eq.f32.partialorder %v10819_v23, %v6834_v31  ;;  %vm10884_vm10 = vcmp.eq.f32.partialorder %v10820_v42, %v6834_v31  ;;  %v10886_v45 = vld [vmem:[#allocation139_spill] sm:$0xff]  ;;  %v10891_v35 = vld [vmem:[#allocation145_spill] sm:$0xff] }
 0x251   : > { %v7662_v5 = vsel %vm10882_vm4, %v10730_v46, 512  ;;  %v7668_v19 = vsel %vm10884_vm10, %v10883_v63, 512  ;;  %vm2187_vm13 = vcmp.lt.s32.totalorder %v2184_v39, %v7416_v40  ;;  %vm2189_vm1 = vcmp.lt.s32.totalorder %v2186_v48, %v7422_v14 }
 0x252   : > { %vm10885_vm8 = vcmp.eq.f32.partialorder %v10828_v4, %v6834_v31  ;;  %vm10887_vm15 = vcmp.eq.f32.partialorder %v10829_v32, %v6834_v31  ;;  %v2188_v23 = vsel %vm2187_vm13, %v2184_v39, %v7416_v40  ;;  %v2190_v42 = vsel %vm2189_vm1, %v2186_v48, %v7422_v14  ;;  %v10889_v4 = vld [vmem:[#allocation142_spill] sm:$0xff] }
 0x253   : > { %v7676_v33 = vsel %vm10885_vm8, %v10734_v60, 512  ;;  %v7682_v17 = vsel %vm10887_vm15, %v10886_v45, 512  ;;  %vm2145_vm7 = vcmp.lt.s32.totalorder %v2143_v47, %v2144_v7  ;;  %vm10888_vm2 = vcmp.eq.f32.partialorder %v10838_v30, %v6834_v31 }
 0x254   : > { %v7690_v28 = vsel %vm10888_vm2, %v10736_v53, 512  ;;  %vm2191_vm12 = vcmp.lt.s32.totalorder %v2188_v23, %v7430_v3  ;;  %vm2193_vm3 = vcmp.lt.s32.totalorder %v2190_v42, %v7440_v2  ;;  %v7698_v32 = vsel %vm1867_vm5, %v10889_v4, 512  ;;  %v10915_v4 = vld [vmem:[#allocation143_spill] sm:$0xff] }
 0x255   : > { %vm10890_vm4 = vcmp.eq.f32.partialorder %v10850_v62, %v6834_v31  ;;  %v2192_v14 = vsel %vm2191_vm12, %v2188_v23, %v7430_v3  ;;  %v2194_v30 = vsel %vm2193_vm3, %v2190_v42, %v7440_v2  ;;  %vm10892_vm10 = vcmp.eq.f32.partialorder %v10855_v21, %v6834_v31  ;;  %v10894_v3 = vld [vmem:[#allocation149_spill] sm:$0xff]  ;;  %v10895_v23 = vld [vmem:[#allocation151_spill] sm:$0xff]  ;;  %v10899_v42 = vld [vmem:[#allocation14_spill] sm:$0xff] }
 0x256   : > { %v7704_v40 = vsel %vm10890_vm4, %v10740_v20, 512  ;;  %v7712_v39 = vsel %vm10892_vm10, %v10891_v35, 512  ;;  %vm10893_vm5 = vcmp.eq.f32.partialorder %v10856_v34, %v6834_v31  ;;  %vm2195_vm13 = vcmp.lt.s32.totalorder %v2192_v14, %v7450_v44  ;;  %v10896_v31 = vld [vmem:[#allocation26_spill] sm:$0xff] }
 0x257   : > { %v7718_v56 = vsel %vm10893_vm5, %v10742_v41, 512  ;;  %vm2197_vm1 = vcmp.lt.s32.totalorder %v2194_v30, %v7456_v38  ;;  %v7722_v62 = vsel %vm2145_vm7, %v2143_v47, %v2144_v7  ;;  %v7728_v2 = vsel %vm1875_vm9, %v10894_v3, 512  ;;  %v10910_v3 = vld [vmem:[#allocation46_spill] sm:$0xff] }
 0x258   : > { %v2196_v21 = vsel %vm2195_vm13, %v2192_v14, %v7450_v44  ;;  %v2198_v48 = vsel %vm2197_vm1, %v2194_v30, %v7456_v38  ;;  %v7736_v34 = vsel %vm1877_vm0, %v10895_v23, 512  ;;  %v7742_v7 = vsel %vm1879_vm11, %v10746_v25, 512  ;;  %v10900_v14 = vld [vmem:[#allocation30_spill] sm:$0xff]  ;;  %v10901_v30 = vld [vmem:[#allocation32_spill] sm:$0xff]  ;;  %v10908_v25 = vld [vmem:[#allocation39_spill] sm:$0xff] }
 0x259   : > { %vm2199_vm8 = vcmp.lt.s32.totalorder %v2196_v21, %v7466_v51  ;;  %vm2201_vm9 = vcmp.lt.s32.totalorder %v2198_v48, %v7472_v10  ;;  %v7750_v52 = vsel %vm1881_vm6, %v10748_v29, 512  ;;  %v7756_v44 = vsel %vm1883_vm14, %v10749_v37, 512  ;;  %v10906_v37 = vld [vmem:[#allocation18_spill] sm:$0xff]  ;;  %v10907_v29 = vld [vmem:[#allocation29_spill] sm:$0xff] }
 0x25a   : > { %v2200_v38 = vsel %vm2199_vm8, %v2196_v21, %v7466_v51  ;;  %v2202_v47 = vsel %vm2201_vm9, %v2198_v48, %v7472_v10  ;;  %vm2284_vm15 = vcmp.eq.s32.totalorder %v6658_v49, %v7722_v62  ;;  %vm2282_vm6 = vcmp.eq.s32.totalorder %v6573_v18, %v7722_v62  ;;  %v10897_v51 = vld [vmem:[#allocation28_spill] sm:$0xff]  ;;  %v10898_v10 = vld [vmem:[#allocation13_spill] sm:$0xff]  ;;  %v10911_v35 = vld [vmem:[#allocation38_spill] sm:$0xff] }
 0x25b   : > { %vm2203_vm0 = vcmp.lt.s32.totalorder %v2200_v38, %v7484_v16  ;;  %vm2205_vm11 = vcmp.lt.s32.totalorder %v2202_v47, %v7496_v6  ;;  %vm2288_vm14 = vcmp.eq.s32.totalorder %v6668_v9, %v7722_v62  ;;  %vm2286_vm12 = vcmp.eq.s32.totalorder %v10898_v10, %v7722_v62  ;;  %v10914_v20 = vld [vmem:[#allocation62_spill] sm:$0xff] }
 0x25c   : > { %v2204_v54 = vsel %vm2203_vm0, %v2200_v38, %v7484_v16  ;;  %v2206_v58 = vsel %vm2205_vm11, %v2202_v47, %v7496_v6  ;;  %v10253_v16 = vmov 0.0   ;;  %vm2292_vm3 = vcmp.eq.s32.totalorder %v10899_v42, %v7722_v62 }
 0x25d   : > { %vm2207_vm7 = vcmp.lt.s32.totalorder %v2204_v54, %v10896_v31  ;;  %vm2209_vm2 = vcmp.lt.s32.totalorder %v2206_v58, %v10897_v51  ;;  %v7780_v6 = vsel %vm2284_vm15, 1.0, %v10253_v16  ;;  %v7790_v21 = vsel %vm2282_vm6, 1.0, %v10253_v16 }
 0x25e   : > { %v2208_v26 = vsel %vm2207_vm7, %v2204_v54, %v10896_v31  ;;  %v2210_v27 = vsel %vm2209_vm2, %v2206_v58, %v10897_v51  ;;  %v7796_v48 = vsel %vm2288_vm14, 1.0, %v10253_v16  ;;  %v7804_v54 = vsel %vm2286_vm12, 1.0, %v10253_v16  ;;  %v10902_v58 = vld [vmem:[#allocation17_spill] sm:$0xff]  ;;  %v10903_v31 = vld [vmem:[#allocation34_spill] sm:$0xff]  ;;  %v10904_v51 = vld [vmem:[#allocation36_spill] sm:$0xff] }
 0x25f   : > { %vm2211_vm4 = vcmp.lt.s32.totalorder %v2208_v26, %v10900_v14  ;;  %vm2213_vm10 = vcmp.lt.s32.totalorder %v2210_v27, %v10901_v30  ;;  %vm2290_vm5 = vcmp.eq.s32.totalorder %v10902_v58, %v7722_v62  ;;  %vm10256_vm9 = vcmp.eq.s32.totalorder %v10906_v37, %v7722_v62 }
 0x260   : > { %v2212_v38 = vsel %vm2211_vm4, %v2208_v26, %v10900_v14  ;;  %v2214_v47 = vsel %vm2213_vm10, %v2210_v27, %v10901_v30  ;;  %v7814_v26 = vsel %vm2292_vm3, 1.0, %v10253_v16  ;;  %v10905_v27 = vld [vmem:[#allocation21_spill] sm:$0xff]  ;;  %vm10230_vm0 = vcmp.eq.s32.totalorder %v10907_v29, %v7722_v62 }
 0x261   : > { %vm2215_vm13 = vcmp.lt.s32.totalorder %v2212_v38, %v10903_v31  ;;  %vm2217_vm1 = vcmp.lt.s32.totalorder %v2214_v47, %v10904_v51  ;;  %vm10232_vm8 = vcmp.eq.s32.totalorder %v10905_v27, %v7722_v62  ;;  %v7830_v23 = vsel %vm2290_vm5, 1.0, %v10253_v16 }
 0x262   : > { %v2216_v14 = vsel %vm2215_vm13, %v2212_v38, %v10903_v31  ;;  %v2218_v30 = vsel %vm2217_vm1, %v2214_v47, %v10904_v51  ;;  %v10909_v38 = vld [vmem:[#allocation25_spill] sm:$0xff]  ;;  %v7840_v51 = vsel %vm10232_vm8, 1.0, %v10253_v16  ;;  %vm10234_vm4 = vcmp.eq.s32.totalorder %v10910_v3, %v7722_v62 }
 0x263   : > { %vm2219_vm11 = vcmp.lt.s32.totalorder %v2216_v14, %v10908_v25  ;;  %vm2221_vm7 = vcmp.lt.s32.totalorder %v2218_v30, %v7570_v15  ;;  %vm10231_vm2 = vcmp.eq.s32.totalorder %v10909_v38, %v7722_v62  ;;  %vm10235_vm1 = vcmp.eq.s32.totalorder %v10911_v35, %v7722_v62 }
 0x264   : > { %v2220_v47 = vsel %vm2219_vm11, %v2216_v14, %v10908_v25  ;;  %v2222_v31 = vsel %vm2221_vm7, %v2218_v30, %v7570_v15  ;;  %v7850_v25 = vsel %vm10256_vm9, 1.0, %v10253_v16  ;;  %v7856_v15 = vsel %vm10230_vm0, 1.0, %v10253_v16 }
 0x265   : > { %vm2223_vm10 = vcmp.lt.s32.totalorder %v2220_v47, %v7580_v61  ;;  %vm2225_vm13 = vcmp.lt.s32.totalorder %v2222_v31, %v7586_v12  ;;  %v7864_v41 = vsel %vm10231_vm2, 1.0, %v10253_v16  ;;  %vm10237_vm0 = vcmp.eq.s32.totalorder %v10915_v4, %v7722_v62 }
 0x266   : > { %v2224_v14 = vsel %vm2223_vm10, %v2220_v47, %v7580_v61  ;;  %v2226_v30 = vsel %vm2225_vm13, %v2222_v31, %v7586_v12  ;;  %v7874_v61 = vsel %vm10234_vm4, 1.0, %v10253_v16  ;;  %v10913_v12 = vld [vmem:[#allocation70_spill] sm:$0xff]  ;;  %vm10239_vm13 = vcmp.eq.s32.totalorder %v10914_v20, %v7722_v62 }
 0x267   : > { %vm2227_vm11 = vcmp.lt.s32.totalorder %v2224_v14, %v7600_v0  ;;  %vm2229_vm7 = vcmp.lt.s32.totalorder %v2226_v30, %v7612_v11  ;;  %10912 = vst [vmem:[#allocation47_spill] sm:$0xff] %v7874_v61  ;;  %vm10236_vm10 = vcmp.eq.s32.totalorder %v10913_v12, %v7722_v62  ;;  %v7890_v53 = vsel %vm10235_vm1, 1.0, %v10253_v16  ;;  %v10919_v61 = vld [vmem:[#allocation148_spill] sm:$0xff] }
 0x268   : > { %v2228_v47 = vsel %vm2227_vm11, %v2224_v14, %v7600_v0  ;;  %v2230_v31 = vsel %vm2229_vm7, %v2226_v30, %v7612_v11  ;;  %10916 = vst [vmem:[#allocation51_spill] sm:$0xff] %v7890_v53  ;;  %v10917_v0 = vld [vmem:[#allocation141_spill] sm:$0xff]  ;;  %v7900_v30 = vsel %vm10236_vm10, 1.0, %v10253_v16  ;;  %vm10241_vm7 = vcmp.eq.s32.totalorder %v10919_v61, %v7722_v62  ;;  %v10922_v53 = vld [vmem:[#allocation146_spill] sm:$0xff]  ;;  %v10930_v61 = vld [vmem:[#allocation159_spill] sm:$0xff] }
 0x269   : > { %vm2231_vm2 = vcmp.lt.s32.totalorder %v2228_v47, %v7618_v59  ;;  %vm2233_vm8 = vcmp.lt.s32.totalorder %v2230_v31, %v7626_v13  ;;  %vm10238_vm11 = vcmp.eq.s32.totalorder %v10917_v0, %v7722_v62  ;;  %10918 = vst [vmem:[#allocation59_spill] sm:$0xff] %v7900_v30 }
 0x26a   : > { %v2232_v11 = vsel %vm2231_vm2, %v2228_v47, %v7618_v59  ;;  %v2234_v14 = vsel %vm2233_vm8, %v2230_v31, %v7626_v13  ;;  %v7910_v59 = vsel %vm10239_vm13, 1.0, %v10253_v16  ;;  %v7916_v13 = vsel %vm10237_vm0, 1.0, %v10253_v16 }
 0x26b   : > { %vm2235_vm4 = vcmp.lt.s32.totalorder %v2232_v11, %v7632_v36  ;;  %vm2237_vm1 = vcmp.lt.s32.totalorder %v2234_v14, %v7640_v8  ;;  %10920 = vst [vmem:[#allocation63_spill] sm:$0xff] %v7916_v13  ;;  %v7924_v30 = vsel %vm10238_vm11, 1.0, %v10253_v16  ;;  %vm10242_vm8 = vcmp.eq.s32.totalorder %v10922_v53, %v7722_v62  ;;  %v10926_v13 = vld [vmem:[#allocation156_spill] sm:$0xff] }
 0x26c   : > { %v2236_v47 = vsel %vm2235_vm4, %v2232_v11, %v7632_v36  ;;  %v2238_v31 = vsel %vm2237_vm1, %v2234_v14, %v7640_v8  ;;  %10921 = vst [vmem:[#allocation67_spill] sm:$0xff] %v7924_v30  ;;  %v7934_v36 = vsel %vm10241_vm7, 1.0, %v10253_v16  ;;  %v10924_v8 = vld [vmem:[#allocation152_spill] sm:$0xff]  ;;  %v10925_v30 = vld [vmem:[#allocation150_spill] sm:$0xff]  ;;  %vm10244_vm0 = vcmp.eq.s32.totalorder %v10926_v13, %v7722_v62 }
 0x26d   : > { %vm2239_vm2 = vcmp.lt.s32.totalorder %v2236_v47, %v7648_v43  ;;  %vm2241_vm10 = vcmp.lt.s32.totalorder %v2238_v31, %v7654_v24  ;;  %10923 = vst [vmem:[#allocation71_spill] sm:$0xff] %v7934_v36  ;;  %vm10243_vm4 = vcmp.eq.s32.totalorder %v10924_v8, %v7722_v62  ;;  %vm10246_vm1 = vcmp.eq.s32.totalorder %v10925_v30, %v7722_v62 }
 0x26e   : > { %v2240_v11 = vsel %vm2239_vm2, %v2236_v47, %v7648_v43  ;;  %v2242_v14 = vsel %vm2241_vm10, %v2238_v31, %v7654_v24  ;;  %v7950_v36 = vsel %vm10242_vm8, 1.0, %v10253_v16  ;;  %v10928_v43 = vld [vmem:[#allocation154_spill] sm:$0xff]  ;;  %v7960_v31 = vsel %vm10243_vm4, 1.0, %v10253_v16 }
 0x26f   : > { %vm2243_vm11 = vcmp.lt.s32.totalorder %v2240_v11, %v7662_v5  ;;  %vm2245_vm13 = vcmp.lt.s32.totalorder %v2242_v14, %v7668_v19  ;;  %10927 = vst [vmem:[#allocation84_spill] sm:$0xff] %v7950_v36  ;;  %vm10245_vm2 = vcmp.eq.s32.totalorder %v10928_v43, %v7722_v62  ;;  %10929 = vst [vmem:[#allocation87_spill] sm:$0xff] %v7960_v31  ;;  %v10934_v36 = vld [vmem:[#allocation158_spill] sm:$0xff] }
 0x270   : > { %v2244_v24 = vsel %vm2243_vm11, %v2240_v11, %v7662_v5  ;;  %v2246_v47 = vsel %vm2245_vm13, %v2242_v14, %v7668_v19  ;;  %vm10247_vm10 = vcmp.eq.s32.totalorder %v10930_v61, %v7722_v62  ;;  %v7970_v5 = vsel %vm10246_vm1, 1.0, %v10253_v16 }
 0x271   : > { %vm2247_vm7 = vcmp.lt.s32.totalorder %v2244_v24, %v7676_v33  ;;  %vm2249_vm8 = vcmp.lt.s32.totalorder %v2246_v47, %v7682_v17  ;;  %10931 = vst [vmem:[#allocation92_spill] sm:$0xff] %v7970_v5  ;;  %v7976_v19 = vsel %vm10244_vm0, 1.0, %v10253_v16  ;;  %v7984_v31 = vsel %vm10245_vm2, 1.0, %v10253_v16  ;;  %v10942_v5 = vld [vmem:[#allocation165_spill] sm:$0xff] }
 0x272   : > { %10932 = vst [vmem:[#allocation95_spill] sm:$0xff] %v7976_v19  ;;  %v2248_v11 = vsel %vm2247_vm7, %v2244_v24, %v7676_v33  ;;  %v2250_v14 = vsel %vm2249_vm8, %v2246_v47, %v7682_v17  ;;  %10933 = vst [vmem:[#allocation100_spill] sm:$0xff] %v7984_v31  ;;  %vm10248_vm13 = vcmp.eq.s32.totalorder %v10934_v36, %v7722_v62  ;;  %v7994_v33 = vsel %vm10247_vm10, 1.0, %v10253_v16  ;;  %v10936_v17 = vld [vmem:[#allocation161_spill] sm:$0xff]  ;;  %v10937_v31 = vld [vmem:[#allocation160_spill] sm:$0xff] }
 0x273   : > { %vm2251_vm11 = vcmp.lt.s32.totalorder %v2248_v11, %v7690_v28  ;;  %vm2253_vm4 = vcmp.lt.s32.totalorder %v2250_v14, %v7698_v32  ;;  %10935 = vst [vmem:[#allocation103_spill] sm:$0xff] %v7994_v33  ;;  %vm10249_vm7 = vcmp.eq.s32.totalorder %v10936_v17, %v7722_v62  ;;  %vm10252_vm8 = vcmp.eq.s32.totalorder %v10937_v31, %v7722_v62  ;;  %v10938_v19 = vld [vmem:[#allocation163_spill] sm:$0xff] }
 0x274   : > { %v2252_v24 = vsel %vm2251_vm11, %v2248_v11, %v7690_v28  ;;  %v2254_v47 = vsel %vm2253_vm4, %v2250_v14, %v7698_v32  ;;  %vm10250_vm0 = vcmp.eq.s32.totalorder %v10938_v19, %v7722_v62  ;;  %v8010_v33 = vsel %vm10248_vm13, 1.0, %v10253_v16  ;;  %v10940_v28 = vld [vmem:[#allocation162_spill] sm:$0xff] }
 0x275   : > { %vm2255_vm2 = vcmp.lt.s32.totalorder %v2252_v24, %v7704_v40  ;;  %vm2257_vm1 = vcmp.lt.s32.totalorder %v2254_v47, %v7712_v39  ;;  %10939 = vst [vmem:[#allocation108_spill] sm:$0xff] %v8010_v33  ;;  %vm10251_vm11 = vcmp.eq.s32.totalorder %v10940_v28, %v7722_v62  ;;  %v8020_v14 = vsel %vm10249_vm7, 1.0, %v10253_v16  ;;  %v10945_v33 = vld [vmem:[#allocation164_spill] sm:$0xff] }
 0x276   : > { %v2256_v32 = vsel %vm2255_vm2, %v2252_v24, %v7704_v40  ;;  %v2258_v11 = vsel %vm2257_vm1, %v2254_v47, %v7712_v39  ;;  %10941 = vst [vmem:[#allocation112_spill] sm:$0xff] %v8020_v14  ;;  %vm10255_vm4 = vcmp.eq.s32.totalorder %v10942_v5, %v7722_v62  ;;  %v8030_v40 = vsel %vm10252_vm8, 1.0, %v10253_v16 }
 0x277   : > { %vm2259_vm10 = vcmp.lt.s32.totalorder %v2256_v32, %v7718_v56  ;;  %vm2261_vm13 = vcmp.lt.s32.totalorder %v2258_v11, %v7728_v2  ;;  %v8036_v39 = vsel %vm10250_vm0, 1.0, %v10253_v16  ;;  %v8044_v14 = vsel %vm10251_vm11, 1.0, %v10253_v16 }
 0x278   : > { %10943 = vst [vmem:[#allocation77_spill] sm:$0xff] %v8036_v39  ;;  %v2260_v24 = vsel %vm2259_vm10, %v2256_v32, %v7718_v56  ;;  %v2262_v47 = vsel %vm2261_vm13, %v2258_v11, %v7728_v2  ;;  %10944 = vst [vmem:[#allocation78_spill] sm:$0xff] %v8044_v14  ;;  %vm10269_vm1 = vcmp.eq.s32.totalorder %v10945_v33, %v7722_v62  ;;  %v8054_v56 = vsel %vm10255_vm4, 1.0, %v10253_v16  ;;  %v10947_v2 = vld [vmem:[#allocation167_spill] sm:$0xff]  ;;  %v10948_v14 = vld [vmem:[#allocation166_spill] sm:$0xff] }
 0x279   : > { %vm2263_vm2 = vcmp.lt.s32.totalorder %v2260_v24, %v7736_v34  ;;  %vm2265_vm7 = vcmp.lt.s32.totalorder %v2262_v47, %v7742_v7  ;;  %10946 = vst [vmem:[#allocation118_spill] sm:$0xff] %v8054_v56  ;;  %vm10264_vm10 = vcmp.eq.s32.totalorder %v10947_v2, %v7722_v62  ;;  %vm10265_vm13 = vcmp.eq.s32.totalorder %v10948_v14, %v7722_v62  ;;  %v10949_v39 = vld [vmem:[#allocation169_spill] sm:$0xff]  ;;  %v10950_v16 = vld [vmem:[#allocation168_spill] sm:$0xff]  ;;  %v10951_v56 = vld [vmem:[#allocation171_spill] sm:$0xff] }
 0x27a   : > { %v2264_v32 = vsel %vm2263_vm2, %v2260_v24, %v7736_v34  ;;  %v2266_v11 = vsel %vm2265_vm7, %v2262_v47, %v7742_v7  ;;  %vm10259_vm0 = vcmp.eq.s32.totalorder %v10949_v39, %v7722_v62  ;;  %vm10262_vm4 = vcmp.eq.s32.totalorder %v10950_v16, %v7722_v62  ;;  %v10960_v39 = vld [vmem:[#allocation19_spill] sm:$0xff] }
 0x27b   : > { %vm2267_vm11 = vcmp.lt.s32.totalorder %v2264_v32, %v7750_v52  ;;  %vm2269_vm8 = vcmp.lt.s32.totalorder %v2266_v11, %v7756_v44  ;;  %vm10260_vm9 = vcmp.eq.s32.totalorder %v10951_v56, %v7722_v62  ;;  %v10952_v24 = vmov 0.0   ;;  %v10966_v56 = vld [vmem:[#allocation24_spill] sm:$0xff]  ;;  %v10967_v16 = vld [vmem:[#allocation27_spill] sm:$0xff] }
 0x27c   : > { %v2268_v34 = vsel %vm2267_vm11, %v2264_v32, %v7750_v52  ;;  %v2270_v7 = vsel %vm2269_vm8, %v2266_v11, %v7756_v44  ;;  %v8076_v47 = vsel %vm10269_vm1, 1.0, %v10952_v24  ;;  %v8082_v5 = vsel %vm10264_vm10, 1.0, %v10952_v24  ;;  %v10957_v32 = vld [vmem:[#allocation170_spill] sm:$0xff] }
 0x27d   : > { %10953 = vst [vmem:[#allocation37_spill] sm:$0xff] %v8076_v47  ;;  %10954 = vst [vmem:[#allocation82_spill] sm:$0xff] %v8082_v5  ;;  %vm2271_vm7 = vcmp.lt.s32.totalorder %v2268_v34, %v2270_v7  ;;  %v8088_v52 = vsel %vm10265_vm13, 1.0, %v10952_v24  ;;  %v8094_v44 = vsel %vm10259_vm0, 1.0, %v10952_v24  ;;  %vm10268_vm8 = vcmp.eq.s32.totalorder %v10957_v32, %v7722_v62  ;;  %v10961_v47 = vld [vmem:[#allocation15_spill] sm:$0xff] }
 0x27e   : > { %10955 = vst [vmem:[#allocation85_spill] sm:$0xff] %v8088_v52  ;;  %10956 = vst [vmem:[#allocation45_spill] sm:$0xff] %v8094_v44  ;;  %v2272_v11 = vsel %vm2271_vm7, %v2268_v34, %v2270_v7  ;;  %v8102_v5 = vsel %vm10262_vm4, 1.0, %v10952_v24  ;;  %v8108_v52 = vsel %vm10260_vm9, 1.0, %v10952_v24  ;;  %vm10280_vm11 = vcmp.eq.s32.totalorder %v10960_v39, %v7722_v62  ;;  %v10962_v34 = vld [vmem:[#allocation16_spill] sm:$0xff]  ;;  %v10969_v32 = vld [vmem:[#allocation23_spill] sm:$0xff] }
 0x27f   : > { %10958 = vst [vmem:[#allocation44_spill] sm:$0xff] %v8102_v5  ;;  %10959 = vst [vmem:[#allocation90_spill] sm:$0xff] %v8108_v52  ;;  %v2273_v44 = vrot.slane %v2272_v11, 4  ;;  %vm10281_vm2 = vcmp.eq.s32.totalorder %v10961_v47, %v7722_v62  ;;  %vm10279_vm7 = vcmp.eq.s32.totalorder %v10962_v34, %v7722_v62  ;;  %v10963_v7 = vld [vmem:[#allocation20_spill] sm:$0xff]  ;;  %v8122_v5 = vsel %vm10268_vm8, 1.0, %v10952_v24  ;;  %v10965_v52 = vld [vmem:[#allocation22_spill] sm:$0xff] }
 0x280   : > { %vm10277_vm0 = vcmp.eq.s32.totalorder %v10963_v7, %v7722_v62  ;;  %10964 = vst [vmem:[#allocation93_spill] sm:$0xff] %v8122_v5  ;;  %vm10275_vm9 = vcmp.eq.s32.totalorder %v10965_v52, %v7722_v62  ;;  %vm10273_vm4 = vcmp.eq.s32.totalorder %v10966_v56, %v7722_v62  ;;  %vm10274_vm10 = vcmp.eq.s32.totalorder %v10967_v16, %v7722_v62 }
 0x281   : > { %vm2274_vm13 = vcmp.lt.s32.totalorder %v2272_v11, %v2273_v44  ;;  %v8134_v2 = vsel %vm10280_vm11, 1.0, %v10952_v24  ;;  %vm10276_vm8 = vcmp.eq.s32.totalorder %v10969_v32, %v7722_v62  ;;  %vm10278_vm1 = vcmp.eq.s32.totalorder %v10878_v22, %v7722_v62 }
 0x282   : > { %10968 = vst [vmem:[#allocation53_spill] sm:$0xff] %v8134_v2  ;;  %v2275_v5 = vsel %vm2274_vm13, %v2272_v11, %v2273_v44  ;;  %v8144_v14 = vsel %vm10281_vm2, 1.0, %v10952_v24  ;;  %v8150_v39 = vsel %vm10277_vm0, 1.0, %v10952_v24  ;;  %v8156_v2 = vsel %vm10279_vm7, 1.0, %v10952_v24 }
 0x283   : > { %10970 = vst [vmem:[#allocation52_spill] sm:$0xff] %v8150_v39  ;;  %10971 = vst [vmem:[#allocation98_spill] sm:$0xff] %v8156_v2  ;;  %v2276_v33 = vrot.slane %v2275_v5, 2  ;;  %v8162_v44 = vsel %vm10273_vm4, 1.0, %v10952_v24  ;;  %v8168_v11 = vsel %vm10275_vm9, 1.0, %v10952_v24  ;;  %v8174_v39 = vsel %vm10274_vm10, 1.0, %v10952_v24 }
 0x284   : > { %10972 = vst [vmem:[#allocation101_spill] sm:$0xff] %v8162_v44  ;;  %10973 = vst [vmem:[#allocation106_spill] sm:$0xff] %v8168_v11  ;;  %v8180_v2 = vsel %vm10276_vm8, 1.0, %v10952_v24  ;;  %v10976_v44 = vld [vmem:[#allocation31_spill] sm:$0xff]  ;;  %v8188_v11 = vsel %vm10278_vm1, 1.0, %v10952_v24  ;;  %vm10294_vm4 = vcmp.eq.s32.totalorder %v10879_v55, %v7722_v62  ;;  %vm10293_vm9 = vcmp.eq.s32.totalorder %v10880_v50, %v7722_v62 }
 0x285   : > { %10974 = vst [vmem:[#allocation110_spill] sm:$0xff] %v8174_v39  ;;  %10975 = vst [vmem:[#allocation61_spill] sm:$0xff] %v8180_v2  ;;  %vm10295_vm13 = vcmp.eq.s32.totalorder %v10976_v44, %v7722_v62  ;;  %vm2277_vm10 = vcmp.lt.s32.totalorder %v2275_v5, %v2276_v33  ;;  %vm10290_vm8 = vcmp.eq.s32.totalorder %v10728_v57, %v7722_v62  ;;  %v8198_v39 = vpop.trf.xlu0  ;;  %v8225_v16 = vsel %vm10294_vm4, 1.0, %v10952_v24 }
 0x286   : > { %10977 = vst [vmem:[#allocation60_spill] sm:$0xff] %v8188_v11  ;;  %vm10287_vm0 = vcmp.eq.s32.totalorder %v10881_v1, %v7722_v62  ;;  %v2278_v2 = vsel %vm2277_vm10, %v2275_v5, %v2276_v33  ;;  %10978 = vst [vmem:[#allocation114_spill] sm:$0xff] %v8198_v39  ;;  %vm10285_vm1 = vcmp.eq.s32.totalorder %v10730_v46, %v7722_v62  ;;  %v4737_v22 = vunpack.i.l.bf16 %v8198_v39 }
 0x287   : > { %vm10286_vm7 = vcmp.eq.s32.totalorder %v10883_v63, %v7722_v62  ;;  %vm10289_vm11 = vcmp.eq.s32.totalorder %v10734_v60, %v7722_v62  ;;  %v2279_v11 = vrot.slane %v2278_v2, 1  ;;  %vm10288_vm2 = vcmp.eq.s32.totalorder %v10886_v45, %v7722_v62  ;;  %10981 = vst [vmem:[#allocation40_spill] sm:$0xff] %v8225_v16 }
 0x288   : > { %v8213_v5 = vsel %vm10295_vm13, 1.0, %v10952_v24  ;;  %v8219_v33 = vsel %vm10293_vm9, 1.0, %v10952_v24  ;;  %v8231_v39 = vsel %vm10287_vm0, 1.0, %v10952_v24  ;;  %2922 = vmatprep.mubr.f32.mxu1 %v4737_v22 }
 0x289   : > { %10979 = vst [vmem:[#allocation116_spill] sm:$0xff] %v8213_v5  ;;  %10980 = vst [vmem:[#allocation120_spill] sm:$0xff] %v8219_v33  ;;  %vm2280_vm10 = vcmp.lt.s32.totalorder %v2278_v2, %v2279_v11  ;;  %v8237_v5 = vsel %vm10290_vm8, 1.0, %v10952_v24  ;;  %v8243_v33 = vsel %vm10285_vm1, 1.0, %v10952_v24 }
 0x28a   : > { %10982 = vst [vmem:[#allocation69_spill] sm:$0xff] %v8231_v39  ;;  %10983 = vst [vmem:[#allocation68_spill] sm:$0xff] %v8237_v5  ;;  %v8245_v16 = vsel %vm2280_vm10, %v2278_v2, %v2279_v11  ;;  %v8251_v39 = vsel %vm10286_vm7, 1.0, %v10952_v24  ;;  %v8257_v5 = vsel %vm10288_vm2, 1.0, %v10952_v24 }
 0x28b   : > { %10984 = vst [vmem:[#allocation123_spill] sm:$0xff] %v8243_v33  ;;  %10985 = vst [vmem:[#allocation48_spill] sm:$0xff] %v8257_v5  ;;  %v8263_v33 = vsel %vm10289_vm11, 1.0, %v10952_v24  ;;  %vm2283_vm10 = vcmp.eq.s32.totalorder %v6573_v18, %v8245_v16  ;;  %vm2285_vm1 = vcmp.eq.s32.totalorder %v6658_v49, %v8245_v16  ;;  %vm2287_vm7 = vcmp.eq.s32.totalorder %v10898_v10, %v8245_v16 }
 0x28c   : > { %10986 = vst [vmem:[#allocation127_spill] sm:$0xff] %v8263_v33  ;;  %vm2289_vm0 = vcmp.eq.s32.totalorder %v6668_v9, %v8245_v16  ;;  %vm4483_vm2 = vmpackc.low %vm2285_vm1, %vm2283_vm10  ;;  %v4217_v22 = vsel %vm2285_vm1, 1.0, %v10952_v24  ;;  %v4215_v2 = vsel %vm2283_vm10, 1.0, %v10952_v24  ;;  %vm2291_vm11 = vcmp.eq.s32.totalorder %v10902_v58, %v8245_v16 }
 0x28d   : > { %v4221_v11 = vsel %vm2289_vm0, 1.0, %v10952_v24  ;;  %v10307_v33 = vmov 1.0|1.0   ;;  %vm4485_vm8 = vmpackc.low %vm2284_vm15, %vm2282_vm6  ;;  %v3152_v5 = vadd.f32 %v4217_v22, %v7780_v6  ;;  %v3149_v45 = vadd.f32 %v4215_v2, %v7790_v21 }
 0x28e   : > { %4484 = vmatprep.subr.msk.bf16.mxu1 %vm4483_vm2, %v10307_v33  ;;  %v3158_v60 = vadd.f32 %v4221_v11, %v7796_v48  ;;  %vm2293_vm1 = vcmp.eq.s32.totalorder %v10899_v42, %v8245_v16  ;;  %vm4487_vm2 = vmpackc.low %vm2289_vm0, %vm2287_vm7  ;;  %v4219_v49 = vsel %vm2287_vm7, 1.0, %v10952_v24  ;;  %vm2295_vm15 = vcmp.eq.s32.totalorder %v10906_v37, %v8245_v16  ;;  %v10989_v42 = vld [vmem:[#allocation59_spill] sm:$0xff] }
 0x28f   : > { %4486 = vmatpush1.bf16.msk.msra.mxu1 %vm4485_vm8, %v10307_v33  ;;  %v4225_v18 = vsel %vm2293_vm1, 1.0, %v10952_v24  ;;  %vm2297_vm6 = vcmp.eq.s32.totalorder %v10905_v27, %v8245_v16  ;;  %3153 = vadd.xlane.f32.xlu0 %v3152_v5  ;;  %v3155_v6 = vadd.f32 %v4219_v49, %v7804_v54  ;;  %v4223_v48 = vsel %vm2291_vm11, 1.0, %v10952_v24  ;;  %vm4489_vm7 = vmpackc.low %vm2288_vm14, %vm2286_vm12 }
 0x290   : > { %4488 = vmatprep.subr.msk.bf16.mxu1 %vm4487_vm2, %v10307_v33  ;;  %v3164_v21 = vadd.f32 %v4225_v18, %v7814_v26  ;;  %v4229_v22 = vsel %vm2297_vm6, 1.0, %v10952_v24  ;;  %3150 = vadd.xlane.f32.xlu1 %v3149_v45  ;;  %v3161_v2 = vadd.f32 %v4223_v48, %v7830_v23  ;;  %vm2299_vm0 = vcmp.eq.s32.totalorder %v10909_v38, %v8245_v16  ;;  %vm4491_vm14 = vmpackc.low %vm2293_vm1, %vm2291_vm11 }
 0x291   : > { %v3170_v5 = vadd.f32 %v4229_v22, %v7840_v51  ;;  %vm2301_vm8 = vcmp.eq.s32.totalorder %v10907_v29, %v8245_v16  ;;  %v4227_v45 = vsel %vm2295_vm15, 1.0, %v10952_v24  ;;  %vm2303_vm10 = vcmp.eq.s32.totalorder %v10911_v35, %v8245_v16  ;;  %v10990_v22 = vld [vmem:[#allocation63_spill] sm:$0xff] }
 0x292   : > { %v4233_v23 = vsel %vm2301_vm8, 1.0, %v10952_v24  ;;  %vm2305_vm2 = vcmp.eq.s32.totalorder %v10910_v3, %v8245_v16  ;;  %v3167_v9 = vadd.f32 %v4227_v45, %v7850_v25  ;;  %v4231_v54 = vsel %vm2299_vm0, 1.0, %v10952_v24  ;;  %v10987_v25 = vld [vmem:[#allocation47_spill] sm:$0xff] }
 0x293   : > { %4490 = vmatpush1.bf16.msk.msra.mxu1 %vm4489_vm7, %v10307_v33  ;;  %v8350_v10 = vadd.f32 %v4233_v23, %v7856_v15  ;;  %v4237_v26 = vsel %vm2305_vm2, 1.0, %v10952_v24  ;;  %3159 = vadd.xlane.f32.xlu0 %v3158_v60  ;;  %v8362_v51 = vadd.f32 %v4231_v54, %v7864_v41  ;;  %vm2307_vm12 = vcmp.eq.s32.totalorder %v10914_v20, %v8245_v16  ;;  %v10988_v60 = vld [vmem:[#allocation51_spill] sm:$0xff]  ;;  %v10991_v23 = vld [vmem:[#allocation148_spill] sm:$0xff] }
 0x294   : > { %4492 = vmatprep.subr.msk.bf16.mxu1 %vm4491_vm14, %v10307_v33  ;;  %v8365_v11 = vadd.f32 %v4237_v26, %v10987_v25  ;;  %v4235_v15 = vsel %vm2303_vm10, 1.0, %v10952_v24  ;;  %3156 = vadd.xlane.f32.xlu1 %v3155_v6  ;;  %vm2309_vm11 = vcmp.eq.s32.totalorder %v10913_v12, %v8245_v16  ;;  %vm2311_vm1 = vcmp.eq.s32.totalorder %v10917_v0, %v8245_v16  ;;  %vm4493_vm14 = vmpackc.low %vm2292_vm3, %vm2290_vm5  ;;  %v10993_v25 = vld [vmem:[#allocation71_spill] sm:$0xff] }
 0x295   : > { %v8376_v49 = vadd.f32 %v4235_v15, %v10988_v60  ;;  %vm2313_vm7 = vcmp.eq.s32.totalorder %v10915_v4, %v8245_v16  ;;  %v4241_v41 = vsel %vm2309_vm11, 1.0, %v10952_v24  ;;  %v4239_v18 = vsel %vm2307_vm12, 1.0, %v10952_v24  ;;  %vm4495_vm3 = vmpackc.low %vm2297_vm6, %vm2295_vm15 }
 0x296   : > { %v4245_v6 = vsel %vm2313_vm7, 1.0, %v10952_v24  ;;  %vm2315_vm9 = vcmp.eq.s32.totalorder %v10922_v53, %v8245_v16  ;;  %v8410_v58 = vadd.f32 %v4241_v41, %v10989_v42  ;;  %v8413_v48 = vadd.f32 %v4239_v18, %v7910_v59 }
 0x297   : > { %4494 = vmatpush1.bf16.msk.msra.mxu1 %vm4493_vm14, %v10307_v33  ;;  %v8416_v45 = vadd.f32 %v4245_v6, %v10990_v22  ;;  %vm10296_vm5 = vcmp.eq.s32.totalorder %v10991_v23, %v8245_v16  ;;  %3165 = vadd.xlane.f32.xlu0 %v3164_v21  ;;  %v4243_v54 = vsel %vm2311_vm1, 1.0, %v10952_v24  ;;  %vm2319_vm15 = vcmp.eq.s32.totalorder %v10925_v30, %v8245_v16  ;;  %v10992_v21 = vld [vmem:[#allocation67_spill] sm:$0xff]  ;;  %v10998_v22 = vld [vmem:[#allocation92_spill] sm:$0xff] }
 0x298   : > { %4496 = vmatprep.subr.msk.bf16.mxu1 %vm4495_vm3, %v10307_v33  ;;  %v4249_v59 = vsel %vm10296_vm5, 1.0, %v10952_v24  ;;  %vm10300_vm6 = vcmp.eq.s32.totalorder %v10924_v8, %v8245_v16  ;;  %3162 = vadd.xlane.f32.xlu1 %v3161_v2  ;;  %v8434_v26 = vadd.f32 %v4243_v54, %v10992_v21  ;;  %v4247_v60 = vsel %vm2315_vm9, 1.0, %v10952_v24  ;;  %v10996_v2 = vld [vmem:[#allocation84_spill] sm:$0xff]  ;;  %v10997_v6 = vld [vmem:[#allocation87_spill] sm:$0xff] }
 0x299   : > { %v8437_v15 = vadd.f32 %v4249_v59, %v10993_v25  ;;  %v4253_v41 = vsel %vm10300_vm6, 1.0, %v10952_v24  ;;  %vm10994_vm14 = vcmp.eq.s32.totalorder %v10906_v37, %v7722_v62  ;;  %vm10995_vm3 = vcmp.eq.s32.totalorder %v10905_v27, %v7722_v62  ;;  %v10999_v59 = vld [vmem:[#allocation95_spill] sm:$0xff] }
 0x29a   : > { %vm4497_vm4 = vmpackc.low %vm10995_vm3, %vm10994_vm14  ;;  %v8454_v18 = vadd.f32 %v4247_v60, %v10996_v2  ;;  %v8457_v42 = vadd.f32 %v4253_v41, %v10997_v6  ;;  %vm10299_vm13 = vcmp.eq.s32.totalorder %v10928_v43, %v8245_v16  ;;  %vm10297_vm5 = vcmp.eq.s32.totalorder %v10926_v13, %v8245_v16  ;;  %v11001_v2 = vld [vmem:[#allocation103_spill] sm:$0xff] }
 0x29b   : > { %4498 = vmatpush1.bf16.msk.msra.mxu1 %vm4497_vm4, %v10307_v33  ;;  %vm4499_vm14 = vmpackc.low %vm2301_vm8, %vm2299_vm0  ;;  %v4251_v37 = vsel %vm2319_vm15, 1.0, %v10952_v24  ;;  %v4257_v27 = vsel %vm10297_vm5, 1.0, %v10952_v24  ;;  %vm2327_vm4 = vcmp.eq.s32.totalorder %v10934_v36, %v8245_v16  ;;  %vm10298_vm3 = vcmp.eq.s32.totalorder %v10930_v61, %v8245_v16  ;;  %3171 = vadd.xlane.f32.xlu0 %v3170_v5  ;;  %v11000_v5 = vld [vmem:[#allocation100_spill] sm:$0xff] }
 0x29c   : > { %4500 = vmatprep.subr.msk.bf16.mxu1 %vm4499_vm14, %v10307_v33  ;;  %v8484_v54 = vadd.f32 %v4251_v37, %v10998_v22  ;;  %v8487_v21 = vadd.f32 %v4257_v27, %v10999_v59  ;;  %v4255_v25 = vsel %vm10299_vm13, 1.0, %v10952_v24  ;;  %v4261_v60 = vsel %vm10298_vm3, 1.0, %v10952_v24  ;;  %3168 = vadd.xlane.f32.xlu1 %v3167_v9  ;;  %v11005_v27 = vld [vmem:[#allocation112_spill] sm:$0xff] }
 0x29d   : > { %v8498_v41 = vadd.f32 %v4255_v25, %v11000_v5  ;;  %v8501_v6 = vadd.f32 %v4261_v60, %v11001_v2  ;;  %vm2331_vm0 = vcmp.eq.s32.totalorder %v10937_v31, %v8245_v16  ;;  %vm10303_vm8 = vcmp.eq.s32.totalorder %v10936_v17, %v8245_v16  ;;  %v11006_v5 = vld [vmem:[#allocation77_spill] sm:$0xff] }
 0x29e   : > { %vm11002_vm14 = vcmp.eq.s32.totalorder %v10909_v38, %v7722_v62  ;;  %vm11003_vm5 = vcmp.eq.s32.totalorder %v10907_v29, %v7722_v62  ;;  %v4259_v9 = vsel %vm2327_vm4, 1.0, %v10952_v24  ;;  %v4265_v37 = vsel %vm10303_vm8, 1.0, %v10952_v24  ;;  %v11004_v29 = vld [vmem:[#allocation108_spill] sm:$0xff] }
 0x29f   : > { %vm4501_vm3 = vmpackc.low %vm11003_vm5, %vm11002_vm14  ;;  %vm10302_vm13 = vcmp.eq.s32.totalorder %v10940_v28, %v8245_v16  ;;  %vm10301_vm6 = vcmp.eq.s32.totalorder %v10938_v19, %v8245_v16  ;;  %v8533_v38 = vadd.f32 %v4259_v9, %v11004_v29  ;;  %v8536_v22 = vadd.f32 %v4265_v37, %v11005_v27  ;;  %3177 = vadd.xlane.f32.xlu0 %v8350_v10  ;;  %v11008_v9 = vld [vmem:[#allocation164_spill] sm:$0xff]  ;;  %v11009_v10 = vld [vmem:[#allocation165_spill] sm:$0xff] }
 0x2a0   : > { %4502 = vmatpush1.bf16.msk.msra.mxu1 %vm4501_vm3, %v10307_v33  ;;  %vm4503_vm5 = vmpackc.low %vm2305_vm2, %vm2303_vm10  ;;  %v4263_v59 = vsel %vm2331_vm0, 1.0, %v10952_v24  ;;  %v4269_v25 = vsel %vm10301_vm6, 1.0, %v10952_v24  ;;  %vm10328_vm10 = vcmp.eq.s32.totalorder %v11008_v9, %v8245_v16  ;;  %v4267_v37 = vsel %vm10302_vm13, 1.0, %v10952_v24  ;;  %3174 = vadd.xlane.f32.xlu1 %v8362_v51  ;;  %v11010_v29 = vld [vmem:[#allocation78_spill] sm:$0xff] }
 0x2a1   : > { %4504 = vmatprep.subr.msk.bf16.mxu1 %vm4503_vm5, %v10307_v33  ;;  %v8549_v60 = vadd.f32 %v4263_v59, %v8030_v40  ;;  %v8552_v2 = vadd.f32 %v4269_v25, %v11006_v5  ;;  %vm10327_vm2 = vcmp.eq.s32.totalorder %v11009_v10, %v8245_v16  ;;  %v8564_v27 = vadd.f32 %v4267_v37, %v11010_v29  ;;  %v11012_v40 = vld [vmem:[#allocation166_spill] sm:$0xff]  ;;  %v11013_v59 = vld [vmem:[#allocation167_spill] sm:$0xff]  ;;  %v11018_v29 = vld [vmem:[#allocation37_spill] sm:$0xff] }
 0x2a2   : > { %vm10326_vm3 = vcmp.eq.s32.totalorder %v11012_v40, %v8245_v16  ;;  %vm10311_vm14 = vcmp.eq.s32.totalorder %v11013_v59, %v8245_v16  ;;  %vm11014_vm5 = vcmp.eq.s32.totalorder %v10911_v35, %v7722_v62  ;;  %vm11015_vm6 = vcmp.eq.s32.totalorder %v10910_v3, %v7722_v62  ;;  %v11016_v35 = vld [vmem:[#allocation168_spill] sm:$0xff]  ;;  %v11017_v3 = vld [vmem:[#allocation118_spill] sm:$0xff]  ;;  %v11021_v10 = vld [vmem:[#allocation169_spill] sm:$0xff] }
 0x2a3   : > { %11007 = vst [vmem:[#allocation56_spill] sm:$0xff] %v8552_v2  ;;  %11011 = vst [vmem:[#allocation131_spill] sm:$0xff] %v8564_v27  ;;  %v4273_v51 = vsel %vm10327_vm2, 1.0, %v10952_v24  ;;  %v4271_v25 = vsel %vm10328_vm10, 1.0, %v10952_v24  ;;  %v4277_v5 = vsel %vm10311_vm14, 1.0, %v10952_v24  ;;  %vm10310_vm8 = vcmp.eq.s32.totalorder %v11016_v35, %v8245_v16  ;;  %v11019_v59 = vld [vmem:[#allocation82_spill] sm:$0xff]  ;;  %3183 = vadd.xlane.f32.xlu0 %v8365_v11 }
 0x2a4   : > { %vm4505_vm13 = vmpackc.low %vm11015_vm6, %vm11014_vm5  ;;  %v8598_v37 = vadd.f32 %v4273_v51, %v11017_v3  ;;  %v8601_v27 = vadd.f32 %v4271_v25, %v11018_v29  ;;  %v8604_v2 = vadd.f32 %v4277_v5, %v11019_v59  ;;  %vm10309_vm5 = vcmp.eq.s32.totalorder %v11021_v10, %v8245_v16  ;;  %v11022_v59 = vld [vmem:[#allocation170_spill] sm:$0xff]  ;;  %v11023_v25 = vld [vmem:[#allocation171_spill] sm:$0xff]  ;;  %3180 = vadd.xlane.f32.xlu1 %v8376_v49 }
 0x2a5   : > { %4506 = vmatpush1.bf16.msk.msra.mxu1 %vm4505_vm13, %v10307_v33  ;;  %vm4507_vm6 = vmpackc.low %vm2309_vm11, %vm2307_vm12  ;;  %v4275_v9 = vsel %vm10326_vm3, 1.0, %v10952_v24  ;;  %v4281_v51 = vsel %vm10309_vm5, 1.0, %v10952_v24  ;;  %vm10325_vm13 = vcmp.eq.s32.totalorder %v11022_v59, %v8245_v16  ;;  %vm10317_vm12 = vcmp.eq.s32.totalorder %v11023_v25, %v8245_v16  ;;  %v11024_v11 = vld [vmem:[#allocation85_spill] sm:$0xff]  ;;  %v11029_v49 = vld [vmem:[#allocation44_spill] sm:$0xff] }
 0x2a6   : > { %11020 = vst [vmem:[#allocation64_spill] sm:$0xff] %v8604_v2  ;;  %4508 = vmatprep.subr.msk.bf16.mxu1 %vm4507_vm6, %v10307_v33  ;;  %v8624_v5 = vadd.f32 %v4275_v9, %v11024_v11  ;;  %v11025_v3 = vld [vmem:[#allocation45_spill] sm:$0xff]  ;;  %v4279_v33 = vsel %vm10310_vm8, 1.0, %v10952_v24  ;;  %v4285_v2 = vsel %vm10317_vm12, 1.0, %v10952_v24  ;;  %vm11027_vm11 = vcmp.eq.s32.totalorder %v10914_v20, %v7722_v62 }
 0x2a7   : > { %v8627_v29 = vadd.f32 %v4281_v51, %v11025_v3  ;;  %vm11028_vm6 = vcmp.eq.s32.totalorder %v10913_v12, %v7722_v62  ;;  %v8644_v9 = vadd.f32 %v4279_v33, %v11029_v49  ;;  %v11030_v51 = vld [vmem:[#allocation90_spill] sm:$0xff]  ;;  %vm10316_vm8 = vcmp.eq.s32.totalorder %v10961_v47, %v8245_v16  ;;  %v11032_v3 = vld [vmem:[#allocation19_spill] sm:$0xff]  ;;  %v8672_v33 = vpop.trf.xlu1  ;;  %3189 = vadd.xlane.f32.xlu0 %v8410_v58 }
 0x2a8   : > { %vm4509_vm5 = vmpackc.low %vm11028_vm6, %vm11027_vm11  ;;  %v8647_v11 = vadd.f32 %v4285_v2, %v11030_v51  ;;  %vm10315_vm14 = vcmp.eq.s32.totalorder %v11032_v3, %v8245_v16  ;;  %v4283_v20 = vsel %vm10325_vm13, 1.0, %v10952_v24  ;;  %vm10314_vm6 = vcmp.eq.s32.totalorder %v10963_v7, %v8245_v16  ;;  %11034 = vst [vmem:[#allocation49_spill] sm:$0xff] %v8672_v33  ;;  %v11035_v2 = vld [vmem:[#allocation93_spill] sm:$0xff]  ;;  %3186 = vadd.xlane.f32.xlu1 %v8413_v48 }
 0x2a9   : > { %11026 = vst [vmem:[#allocation134_spill] sm:$0xff] %v8627_v29  ;;  %v11033_v29 = vmov 1.0|1.0   ;;  %vm4511_vm11 = vmpackc.low %vm2313_vm7, %vm2311_vm1  ;;  %v4289_v12 = vsel %vm10315_vm14, 1.0, %v10952_v24  ;;  %v8677_v49 = vadd.f32 %v4283_v20, %v11035_v2  ;;  %v11036_v51 = vld [vmem:[#allocation53_spill] sm:$0xff]  ;;  %v4287_v3 = vsel %vm10316_vm8, 1.0, %v10952_v24 }
 0x2aa   : > { %11031 = vst [vmem:[#allocation72_spill] sm:$0xff] %v8647_v11  ;;  %4510 = vmatpush1.bf16.msk.msra.mxu1 %vm4509_vm5, %v11033_v29  ;;  %vm10324_vm5 = vcmp.eq.s32.totalorder %v10962_v34, %v8245_v16  ;;  %v8680_v11 = vadd.f32 %v4289_v12, %v11036_v51  ;;  %v4293_v33 = vsel %vm10314_vm6, 1.0, %v10952_v24  ;;  %v8692_v58 = vadd.f32 %v4287_v3, %v8144_v14  ;;  %v11038_v20 = vld [vmem:[#allocation52_spill] sm:$0xff]  ;;  %v8701_v12 = vpop.trf.xlu0  ;;  %v11042_v3 = vld [vmem:[#allocation27_spill] sm:$0xff] }
 0x2ab   : > { %4512 = vmatprep.subr.msk.bf16.mxu1 %vm4511_vm11, %v11033_v29  ;;  %v8695_v2 = vadd.f32 %v4293_v33, %v11038_v20  ;;  %vm10322_vm1 = vcmp.eq.s32.totalorder %v10965_v52, %v8245_v16  ;;  %vm10321_vm7 = vcmp.eq.s32.totalorder %v10966_v56, %v8245_v16  ;;  %vm11040_vm11 = vcmp.eq.s32.totalorder %v10917_v0, %v7722_v62  ;;  %v11045_v33 = vld [vmem:[#allocation101_spill] sm:$0xff]  ;;  %v11047_v56 = vld [vmem:[#allocation140_spill] sm:$0xff] }
 0x2ac   : > { %11037 = vst [vmem:[#allocation43_spill] sm:$0xff] %v8692_v58  ;;  %vm11041_vm6 = vcmp.eq.s32.totalorder %v10915_v4, %v7722_v62  ;;  %v4291_v14 = vsel %vm10324_vm5, 1.0, %v10952_v24  ;;  %v4297_v48 = vsel %vm10321_vm7, 1.0, %v10952_v24  ;;  %vm10323_vm8 = vcmp.eq.s32.totalorder %v10969_v32, %v8245_v16  ;;  %v11044_v4 = vld [vmem:[#allocation98_spill] sm:$0xff]  ;;  %3195 = vadd.xlane.f32.xlu0 %v8416_v45  ;;  %v11053_v45 = vld [vmem:[#allocation145_spill] sm:$0xff]  ;;  %3192 = vadd.xlane.f32.xlu1 %v8434_v26 }
 0x2ad   : > { %11039 = vst [vmem:[#allocation55_spill] sm:$0xff] %v8695_v2  ;;  %vm4513_vm14 = vmpackc.low %vm11041_vm6, %vm11040_vm11  ;;  %vm10320_vm12 = vcmp.eq.s32.totalorder %v11042_v3, %v8245_v16  ;;  %vm11043_vm6 = vcmp.eq.s32.totalorder %v10991_v23, %v8245_v16  ;;  %v8729_v0 = vadd.f32 %v4291_v14, %v11044_v4  ;;  %v8732_v51 = vadd.f32 %v4297_v48, %v11045_v33  ;;  %v11048_v58 = vld [vmem:[#allocation142_spill] sm:$0xff]  ;;  %v11052_v3 = vld [vmem:[#allocation144_spill] sm:$0xff] }
 0x2ae   : > { %4514 = vmatpush1.bf16.msk.msra.mxu1 %vm4513_vm14, %v11033_v29  ;;  %vm4515_vm11 = vmpackc.low %vm11043_vm6, %vm2315_vm9  ;;  %v4295_v20 = vsel %vm10322_vm1, 1.0, %v10952_v24  ;;  %v4301_v2 = vsel %vm10320_vm12, 1.0, %v10952_v24  ;;  %vm2390_vm14 = vcmp.eq.s32.totalorder %v11047_v56, %v7722_v62  ;;  %vm10354_vm9 = vcmp.eq.s32.totalorder %v11048_v58, %v7722_v62  ;;  %v11049_v14 = vld [vmem:[#allocation106_spill] sm:$0xff] }
 0x2af   : > { %11046 = vst [vmem:[#allocation74_spill] sm:$0xff] %v8732_v51  ;;  %4516 = vmatprep.subr.msk.bf16.mxu1 %vm4515_vm11, %v11033_v29  ;;  %v8749_v48 = vadd.f32 %v4295_v20, %v11049_v14  ;;  %v11050_v4 = vld [vmem:[#allocation110_spill] sm:$0xff]  ;;  %vm2371_vm6 = vcmp.eq.s32.totalorder %v10976_v44, %v8245_v16  ;;  %v4299_v51 = vsel %vm10323_vm8, 1.0, %v10952_v24  ;;  %vm10353_vm12 = vcmp.eq.s32.totalorder %v11052_v3, %v7722_v62  ;;  %v11054_v20 = vld [vmem:[#allocation147_spill] sm:$0xff]  ;;  %v11056_v14 = vld [vmem:[#allocation61_spill] sm:$0xff]  ;;  %v8816_v44 = vpop.trf.xlu0 }
 0x2b0   : > { %v8752_v33 = vadd.f32 %v4301_v2, %v11050_v4  ;;  %vm10352_vm11 = vcmp.eq.s32.totalorder %v11053_v45, %v7722_v62  ;;  %vm10351_vm7 = vcmp.eq.s32.totalorder %v11054_v20, %v7722_v62  ;;  %v11055_v2 = vld [vmem:[#allocation33_spill] sm:$0xff]  ;;  %v8770_v4 = vadd.f32 %v4299_v51, %v11056_v14  ;;  %3201 = vadd.xlane.f32.xlu0 %v8437_v15  ;;  %v11066_v15 = vld [vmem:[#allocation40_spill] sm:$0xff] }
 0x2b1   : > { %vm10338_vm1 = vcmp.eq.s32.totalorder %v11055_v2, %v8245_v16  ;;  %vm10336_vm8 = vcmp.eq.s32.totalorder %v10879_v55, %v8245_v16  ;;  %vm10332_vm5 = vcmp.eq.s32.totalorder %v10880_v50, %v8245_v16  ;;  %vm11059_vm13 = vcmp.eq.s32.totalorder %v10922_v53, %v7722_v62  ;;  %v11062_v53 = vld [vmem:[#allocation60_spill] sm:$0xff]  ;;  %3198 = vadd.xlane.f32.xlu1 %v8454_v18 }
 0x2b2   : > { %11051 = vst [vmem:[#allocation79_spill] sm:$0xff] %v8752_v33  ;;  %11057 = vst [vmem:[#allocation80_spill] sm:$0xff] %v8770_v4  ;;  %v8776_v33 = vpop.trf.xlu1  ;;  %vm11060_vm3 = vcmp.eq.s32.totalorder %v10991_v23, %v7722_v62  ;;  %v4305_v26 = vsel %vm10338_vm1, 1.0, %v10952_v24  ;;  %v4303_v51 = vsel %vm2371_vm6, 1.0, %v10952_v24  ;;  %v4309_v14 = vsel %vm10332_vm5, 1.0, %v10952_v24  ;;  %v11064_v50 = vld [vmem:[#allocation120_spill] sm:$0xff] }
 0x2b3   : > { %11058 = vst [vmem:[#allocation75_spill] sm:$0xff] %v8776_v33  ;;  %vm4517_vm2 = vmpackc.low %vm11060_vm3, %vm11059_vm13  ;;  %vm10335_vm10 = vcmp.eq.s32.totalorder %v10728_v57, %v8245_v16  ;;  %vm11061_vm3 = vcmp.eq.s32.totalorder %v10924_v8, %v8245_v16  ;;  %v8806_v23 = vadd.f32 %v4305_v26, %v11062_v53  ;;  %v11063_v33 = vld [vmem:[#allocation116_spill] sm:$0xff]  ;;  %v8812_v2 = vadd.f32 %v4309_v14, %v11064_v50 }
 0x2b4   : > { %4518 = vmatpush1.bf16.msk.msra.mxu1 %vm4517_vm2, %v11033_v29  ;;  %vm4519_vm13 = vmpackc.low %vm11061_vm3, %vm2319_vm15  ;;  %v8809_v4 = vadd.f32 %v4303_v51, %v11063_v33  ;;  %vm10334_vm5 = vcmp.eq.s32.totalorder %v10881_v1, %v8245_v16  ;;  %v4307_v26 = vsel %vm10336_vm8, 1.0, %v10952_v24  ;;  %vm10345_vm15 = vcmp.eq.s32.totalorder %v10730_v46, %v8245_v16  ;;  %v11067_v51 = vld [vmem:[#allocation69_spill] sm:$0xff]  ;;  %v11071_v18 = vld [vmem:[#allocation68_spill] sm:$0xff]  ;;  %3207 = vadd.xlane.f32.xlu0 %v8457_v42  ;;  %v8902_v46 = vpop.trf.xlu0 }
 0x2b5   : > { %11065 = vst [vmem:[#allocation86_spill] sm:$0xff] %v8812_v2  ;;  %4520 = vmatprep.subr.msk.bf16.mxu1 %vm4519_vm13, %v11033_v29  ;;  %v4313_v50 = vsel %vm10334_vm5, 1.0, %v10952_v24  ;;  %vm10337_vm2 = vcmp.eq.s32.totalorder %v10883_v63, %v8245_v16  ;;  %v8834_v33 = vadd.f32 %v4307_v26, %v11066_v15  ;;  %v4311_v53 = vsel %vm10335_vm10, 1.0, %v10952_v24  ;;  %v11074_v15 = vld [vmem:[#allocation73_spill] sm:$0xff]  ;;  %3204 = vadd.xlane.f32.xlu1 %v8484_v54 }
 0x2b6   : > { %v8837_v14 = vadd.f32 %v4313_v50, %v11067_v51  ;;  %v4317_v2 = vsel %vm10337_vm2, 1.0, %v10952_v24  ;;  %vm11069_vm3 = vcmp.eq.s32.totalorder %v10925_v30, %v7722_v62  ;;  %vm11070_vm13 = vcmp.eq.s32.totalorder %v10924_v8, %v7722_v62  ;;  %v11075_v51 = vld [vmem:[#allocation139_spill] sm:$0xff]  ;;  %v11084_v63 = vld [vmem:[#allocation153_spill] sm:$0xff] }
 0x2b7   : > { %vm4521_vm5 = vmpackc.low %vm11070_vm13, %vm11069_vm3  ;;  %v8854_v26 = vadd.f32 %v4311_v53, %v11071_v18  ;;  %v8857_v50 = vadd.f32 %v4317_v2, %v8251_v39  ;;  %vm10344_vm10 = vcmp.eq.s32.totalorder %v11074_v15, %v8245_v16  ;;  %vm10343_vm8 = vcmp.eq.s32.totalorder %v11075_v51, %v8245_v16  ;;  %v11078_v39 = vld [vmem:[#allocation149_spill] sm:$0xff]  ;;  %v11079_v2 = vld [vmem:[#allocation151_spill] sm:$0xff]  ;;  %v8882_v53 = vpop.trf.xlu1 }
 0x2b8   : > { %11068 = vst [vmem:[#allocation76_spill] sm:$0xff] %v8837_v14  ;;  %4522 = vmatpush1.bf16.msk.msra.mxu1 %vm4521_vm5, %v11033_v29  ;;  %vm11076_vm2 = vcmp.eq.s32.totalorder %v10928_v43, %v8245_v16  ;;  %vm11077_vm3 = vcmp.eq.s32.totalorder %v10926_v13, %v8245_v16  ;;  %v4315_v30 = vsel %vm10345_vm15, 1.0, %v10952_v24  ;;  %v4321_v8 = vsel %vm10343_vm8, 1.0, %v10952_v24  ;;  %11080 = vst [vmem:[#allocation83_spill] sm:$0xff] %v8882_v53  ;;  %v11081_v18 = vld [vmem:[#allocation123_spill] sm:$0xff] }
 0x2b9   : > { %11072 = vst [vmem:[#allocation81_spill] sm:$0xff] %v8854_v26  ;;  %11073 = vst [vmem:[#allocation88_spill] sm:$0xff] %v8857_v50  ;;  %vm10350_vm5 = vcmp.eq.s32.totalorder %v11078_v39, %v7722_v62  ;;  %vm10347_vm1 = vcmp.eq.s32.totalorder %v11079_v2, %v7722_v62  ;;  %v8887_v50 = vadd.f32 %v4315_v30, %v11081_v18  ;;  %v11082_v26 = vld [vmem:[#allocation48_spill] sm:$0xff]  ;;  %v4319_v51 = vsel %vm10344_vm10, 1.0, %v10952_v24  ;;  %v11085_v53 = vld [vmem:[#allocation127_spill] sm:$0xff] }
 0x2ba   : > { %vm4523_vm13 = vmpackc.low %vm11077_vm3, %vm11076_vm2  ;;  %v8890_v14 = vadd.f32 %v4321_v8, %v11082_v26  ;;  %vm10346_vm2 = vcmp.eq.s32.totalorder %v11084_v63, %v7722_v62  ;;  %v8900_v42 = vadd.f32 %v4319_v51, %v11085_v53  ;;  %v11087_v30 = vld [vmem:[#allocation155_spill] sm:$0xff]  ;;  %vm11089_vm8 = vcmp.eq.s32.totalorder %v10926_v13, %v7722_v62  ;;  %v11090_v26 = vld [vmem:[#allocation157_spill] sm:$0xff]  ;;  %3213 = vadd.xlane.f32.xlu0 %v8487_v21 }
 0x2bb   : > { %4524 = vmatprep.subr.msk.bf16.mxu1 %vm4523_vm13, %v11033_v29  ;;  %vm10349_vm3 = vcmp.eq.s32.totalorder %v11087_v30, %v7722_v62  ;;  %vm11088_vm13 = vcmp.eq.s32.totalorder %v10928_v43, %v7722_v62  ;;  %vm10348_vm15 = vcmp.eq.s32.totalorder %v11090_v26, %v7722_v62  ;;  %v4324_v54 = vsel %vm10354_vm9, 1.0, %v10952_v24  ;;  %3210 = vadd.xlane.f32.xlu1 %v8498_v41 }
 0x2bc   : > { %11083 = vst [vmem:[#allocation89_spill] sm:$0xff] %v8890_v14  ;;  %11086 = vst [vmem:[#allocation94_spill] sm:$0xff] %v8900_v42  ;;  %v4322_v51 = vsel %vm2390_vm14, 1.0, %v10952_v24  ;;  %v4326_v13 = vsel %vm10353_vm12, 1.0, %v10952_v24  ;;  %v4328_v43 = vsel %vm10352_vm11, 1.0, %v10952_v24  ;;  %v4330_v8 = vsel %vm10351_vm7, 1.0, %v10952_v24  ;;  %v8954_v42 = vpop.trf.xlu1 }
 0x2bd   : > { %vm4525_vm10 = vmpackc.low %vm11089_vm8, %vm11088_vm13  ;;  %vm11091_vm8 = vcmp.eq.s32.totalorder %v10930_v61, %v8245_v16  ;;  %v4332_v53 = vsel %vm10350_vm5, 1.0, %v10952_v24  ;;  %v4334_v18 = vsel %vm10347_vm1, 1.0, %v10952_v24  ;;  %11092 = vst [vmem:[#allocation96_spill] sm:$0xff] %v8954_v42  ;;  %v4336_v21 = vsel %vm10346_vm2, 1.0, %v10952_v24 }
 0x2be   : > { %4526 = vmatpush1.bf16.msk.msra.mxu1 %vm4525_vm10, %v11033_v29  ;;  %vm4527_vm13 = vmpackc.low %vm11091_vm8, %vm2327_vm4  ;;  %vm2391_vm4 = vcmp.eq.s32.totalorder %v11047_v56, %v8245_v16  ;;  %v4338_v14 = vsel %vm10349_vm3, 1.0, %v10952_v24  ;;  %v4340_v41 = vsel %vm10348_vm15, 1.0, %v10952_v24  ;;  %vm11093_vm10 = vcmp.eq.s32.totalorder %v10934_v36, %v7722_v62  ;;  %3219 = vadd.xlane.f32.xlu0 %v8501_v6 }
 0x2bf   : > { %4528 = vmatprep.subr.msk.bf16.mxu1 %vm4527_vm13, %v11033_v29  ;;  %vm11094_vm8 = vcmp.eq.s32.totalorder %v10930_v61, %v7722_v62  ;;  %vm2393_vm2 = vcmp.eq.s32.totalorder %v11048_v58, %v8245_v16  ;;  %vm2395_vm1 = vcmp.eq.s32.totalorder %v11052_v3, %v8245_v16  ;;  %vm11095_vm15 = vcmp.eq.s32.totalorder %v10936_v17, %v8245_v16 }
 0x2c0   : > { %vm4529_vm13 = vmpackc.low %vm11094_vm8, %vm11093_vm10  ;;  %vm2397_vm5 = vcmp.eq.s32.totalorder %v11053_v45, %v8245_v16  ;;  %vm2399_vm10 = vcmp.eq.s32.totalorder %v11054_v20, %v8245_v16  ;;  %vm2401_vm8 = vcmp.eq.s32.totalorder %v11078_v39, %v8245_v16  ;;  %3216 = vadd.xlane.f32.xlu1 %v8533_v38  ;;  %vm11097_vm7 = vcmp.eq.s32.totalorder %v10936_v17, %v7722_v62 }
 0x2c1   : > { %vm4531_vm3 = vmpackc.low %vm11095_vm15, %vm2331_vm0  ;;  %vm10359_vm0 = vcmp.eq.s32.totalorder %v11084_v63, %v8245_v16  ;;  %vm10358_vm15 = vcmp.eq.s32.totalorder %v11087_v30, %v8245_v16  ;;  %vm10357_vm12 = vcmp.eq.s32.totalorder %v11090_v26, %v8245_v16  ;;  %v4325_v61 = vsel %vm2393_vm2, 1.0, %v10952_v24 }
 0x2c2   : > { %4530 = vmatpush1.bf16.msk.msra.mxu1 %vm4529_vm13, %v11033_v29  ;;  %vm2403_vm13 = vcmp.eq.s32.totalorder %v11079_v2, %v8245_v16  ;;  %v4323_v36 = vsel %vm2391_vm4, 1.0, %v10952_v24  ;;  %v9027_v17 = vadd.f32 %v4325_v61, %v4324_v54  ;;  %v4329_v42 = vsel %vm2397_vm5, 1.0, %v10952_v24  ;;  %3225 = vadd.xlane.f32.xlu0 %v8536_v22 }
 0x2c3   : > { %4532 = vmatprep.subr.msk.bf16.mxu1 %vm4531_vm3, %v11033_v29  ;;  %vm11096_vm3 = vcmp.eq.s32.totalorder %v10937_v31, %v7722_v62  ;;  %v4327_v31 = vsel %vm2395_vm1, 1.0, %v10952_v24  ;;  %v9029_v6 = vadd.f32 %v4323_v36, %v4322_v51  ;;  %v9039_v3 = vadd.f32 %v4329_v42, %v4328_v43 }
 0x2c4   : > { %vm4533_vm11 = vmpackc.low %vm11097_vm7, %vm11096_vm3  ;;  %vm11098_vm7 = vcmp.eq.s32.totalorder %v10940_v28, %v8245_v16  ;;  %vm11099_vm3 = vcmp.eq.s32.totalorder %v10938_v19, %v8245_v16  ;;  %v9031_v38 = vadd.f32 %v4327_v31, %v4326_v13  ;;  %v4331_v54 = vsel %vm2399_vm10, 1.0, %v10952_v24  ;;  %3222 = vadd.xlane.f32.xlu1 %v8549_v60  ;;  %v11107_v31 = vld [vmem:[#allocation131_spill] sm:$0xff] }
 0x2c5   : > { %vm4535_vm9 = vmpackc.low %vm11099_vm3, %vm11098_vm7  ;;  %v4333_v51 = vsel %vm2401_vm8, 1.0, %v10952_v24  ;;  %v4335_v13 = vsel %vm2403_vm13, 1.0, %v10952_v24  ;;  %v9054_v22 = vadd.f32 %v4331_v54, %v4330_v8  ;;  %v4337_v61 = vsel %vm10359_vm0, 1.0, %v10952_v24  ;;  %v11123_v54 = vld [vmem:[#allocation134_spill] sm:$0xff] }
 0x2c6   : > { %4534 = vmatpush1.bf16.msk.msra.mxu1 %vm4533_vm11, %v11033_v29  ;;  %v9056_v42 = vadd.f32 %v4333_v51, %v4332_v53  ;;  %v9058_v43 = vadd.f32 %v4335_v13, %v4334_v18  ;;  %vm11101_vm11 = vcmp.eq.s32.totalorder %v10938_v19, %v7722_v62  ;;  %v9070_v36 = vadd.f32 %v4337_v61, %v4336_v21  ;;  %v11102_v53 = vld [vmem:[#allocation164_spill] sm:$0xff]  ;;  %v11181_v13 = vld [vmem:[#allocation89_spill] sm:$0xff] }
 0x2c7   : > { %4536 = vmatprep.subr.msk.bf16.mxu1 %vm4535_vm9, %v11033_v29  ;;  %vm11100_vm9 = vcmp.eq.s32.totalorder %v10940_v28, %v7722_v62  ;;  %v4339_v60 = vsel %vm10358_vm15, 1.0, %v10952_v24  ;;  %v4341_v8 = vsel %vm10357_vm12, 1.0, %v10952_v24  ;;  %vm11103_vm3 = vcmp.eq.s32.totalorder %v11102_v53, %v8245_v16  ;;  %v11104_v28 = vld [vmem:[#allocation165_spill] sm:$0xff]  ;;  %v11106_v21 = vld [vmem:[#allocation56_spill] sm:$0xff]  ;;  %v11111_v24 = vld [vmem:[#allocation167_spill] sm:$0xff] }
 0x2c8   : > { %vm4537_vm7 = vmpackc.low %vm11101_vm11, %vm11100_vm9  ;;  %vm11105_vm9 = vcmp.eq.s32.totalorder %v11104_v28, %v8245_v16  ;;  %v9087_v19 = vadd.f32 %v4339_v60, %v4338_v14  ;;  %v9089_v18 = vadd.f32 %v4341_v8, %v4340_v41  ;;  %3231 = vadd.xlane.f32.xlu0 %v11106_v21  ;;  %3228 = vadd.xlane.f32.xlu1 %v11107_v31  ;;  %v11113_v14 = vld [vmem:[#allocation114_spill] sm:$0xff]  ;;  %v11171_v51 = vld [vmem:[#allocation76_spill] sm:$0xff] }
 0x2c9   : > { %vm4539_vm11 = vmpackc.low %vm11105_vm9, %vm11103_vm3  ;;  %vm11109_vm12 = vcmp.eq.s32.totalorder %v11104_v28, %v7722_v62  ;;  %vm11110_vm3 = vcmp.eq.s32.totalorder %v11012_v40, %v8245_v16  ;;  %vm11112_vm9 = vcmp.eq.s32.totalorder %v11111_v24, %v8245_v16  ;;  %v4740_v41 = vunpack.i.h.bf16 %v11113_v14  ;;  %v3088_v28 = vld [vmem:[#allocation2 + $0x18] sm:$0xff]  ;;  %v3087_v21 = vld [vmem:[#allocation2 + $0x10] sm:$0xff] }
 0x2ca   : > { %4538 = vmatpush1.bf16.msk.msra.mxu1 %vm4537_vm7, %v11033_v29  ;;  %vm11108_vm7 = vcmp.eq.s32.totalorder %v11102_v53, %v7722_v62  ;;  %vm4543_vm0 = vmpackc.low %vm11112_vm9, %vm11110_vm3  ;;  %vm11117_vm3 = vcmp.eq.s32.totalorder %v11021_v10, %v8245_v16  ;;  %vm11119_vm9 = vcmp.eq.s32.totalorder %v11016_v35, %v7722_v62 }
 0x2cb   : > { %4540 = vmatprep.subr.msk.bf16.mxu1 %vm4539_vm11, %v11033_v29  ;;  %vm4541_vm15 = vmpackc.low %vm11109_vm12, %vm11108_vm7  ;;  %vm11114_vm12 = vcmp.eq.s32.totalorder %v11012_v40, %v7722_v62  ;;  %vm11116_vm7 = vcmp.eq.s32.totalorder %v11016_v35, %v8245_v16  ;;  %v4745_v40 = vunpack.i.h.bf16 %v8701_v12  ;;  %v11127_v35 = vld [vmem:[#allocation19_spill] sm:$0xff] }
 0x2cc   : > { %3237 = vadd.xlane.f32.xlu0 %v8598_v37  ;;  %3234 = vadd.xlane.f32.xlu1 %v8601_v27  ;;  %v4742_v27 = vunpack.i.l.bf16 %v8701_v12  ;;  %v11118_v37 = vld [vmem:[#allocation64_spill] sm:$0xff]  ;;  %v11151_v12 = vld [vmem:[#allocation33_spill] sm:$0xff] }
 0x2ce   : > { %4542 = vmatpush1.bf16.msk.msra.mxu1 %vm4541_vm15, %v11033_v29  ;;  %vm11115_vm15 = vcmp.eq.s32.totalorder %v11111_v24, %v7722_v62 }
 0x2cf   : > { %4544 = vmatprep.subr.msk.bf16.mxu1 %vm4543_vm0, %v11033_v29  ;;  %vm4545_vm11 = vmpackc.low %vm11115_vm15, %vm11114_vm12  ;;  %vm11120_vm12 = vcmp.eq.s32.totalorder %v11021_v10, %v7722_v62  ;;  %v4750_v10 = vunpack.i.h.bf16 %v8816_v44 }
 0x2d0   : > { %vm4547_vm0 = vmpackc.low %vm11117_vm3, %vm11116_vm7  ;;  %3243 = vadd.xlane.f32.xlu0 %v11118_v37  ;;  %3240 = vadd.xlane.f32.xlu1 %v8624_v5  ;;  %vm11122_vm7 = vcmp.eq.s32.totalorder %v11023_v25, %v8245_v16  ;;  %v4747_v5 = vunpack.i.l.bf16 %v8816_v44  ;;  %v4755_v44 = vunpack.i.h.bf16 %v8902_v46  ;;  %v3089_v37 = vld [vmem:[#allocation2 + $0x20] sm:$0xff] }
 0x2d1   : > { %vm4549_vm15 = vmpackc.low %vm11120_vm12, %vm11119_vm9  ;;  %vm11125_vm9 = vcmp.eq.s32.totalorder %v11023_v25, %v7722_v62  ;;  %v11134_v25 = vld [vmem:[#allocation49_spill] sm:$0xff] }
 0x2d2   : > { %4546 = vmatpush1.bf16.msk.msra.mxu1 %vm4545_vm11, %v11033_v29  ;;  %vm11121_vm11 = vcmp.eq.s32.totalorder %v11022_v59, %v8245_v16  ;;  %v4792_v56 = vunpack.i.h.bf16 %v11134_v25 }
 0x2d3   : > { %4548 = vmatprep.subr.msk.bf16.mxu1 %vm4547_vm0, %v11033_v29  ;;  %vm4551_vm3 = vmpackc.low %vm11122_vm7, %vm11121_vm11  ;;  %vm11124_vm0 = vcmp.eq.s32.totalorder %v11022_v59, %v7722_v62  ;;  %vm11128_vm11 = vcmp.eq.s32.totalorder %v11127_v35, %v8245_v16  ;;  %v11129_v59 = vld [vmem:[#allocation72_spill] sm:$0xff] }
 0x2d4   : > { %3249 = vadd.xlane.f32.xlu0 %v11123_v54  ;;  %3246 = vadd.xlane.f32.xlu1 %v8644_v9  ;;  %vm4553_vm12 = vmpackc.low %vm11125_vm9, %vm11124_vm0  ;;  %v4752_v9 = vunpack.i.l.bf16 %v8902_v46  ;;  %vm11131_vm0 = vcmp.eq.s32.totalorder %v11127_v35, %v7722_v62  ;;  %v11139_v46 = vld [vmem:[#allocation24_spill] sm:$0xff] }
 0x2d5   : > { %2923 = vmatmul.mubr.f32.vlgmr.msra.gmra.mrb[44].mxu1 %v4740_v41  ;;  %v3092_v35 = vld [vmem:[#allocation2 + $0x38] sm:$0xff] }
 0x2d6   : > { %4550 = vmatpush1.bf16.msk.msra.mxu1 %vm4549_vm15, %v11033_v29  ;;  %2928 = vmatprep.mubr.f32.mxu1 %v4742_v27  ;;  %vm11126_vm15 = vcmp.eq.s32.totalorder %v10961_v47, %v8245_v16  ;;  %v3090_v27 = vld [vmem:[#allocation2 + $0x28] sm:$0xff] }
 0x2d7   : > { %4552 = vmatprep.subr.msk.bf16.mxu1 %vm4551_vm3, %v11033_v29  ;;  %vm4555_vm7 = vmpackc.low %vm11128_vm11, %vm11126_vm15  ;;  %vm11130_vm3 = vcmp.eq.s32.totalorder %v10961_v47, %v7722_v62  ;;  %vm11133_vm15 = vcmp.eq.s32.totalorder %v10963_v7, %v8245_v16  ;;  %v11135_v47 = vld [vmem:[#allocation43_spill] sm:$0xff] }
 0x2d8   : > { %3255 = vadd.xlane.f32.xlu0 %v11129_v59  ;;  %3252 = vadd.xlane.f32.xlu1 %v8677_v49  ;;  %vm4557_vm9 = vmpackc.low %vm11131_vm0, %vm11130_vm3  ;;  %v4789_v49 = vunpack.i.l.bf16 %v11134_v25  ;;  %vm11137_vm3 = vcmp.eq.s32.totalorder %v10963_v7, %v7722_v62  ;;  %v11147_v7 = vld [vmem:[#allocation74_spill] sm:$0xff] }
 0x2d9   : > { %2929 = vmatmul.mubr.f32.gmra.mrb[46].mxu1 %v4745_v40 }
 0x2da   : > { %4554 = vmatpush1.bf16.msk.msra.mxu1 %vm4553_vm12, %v11033_v29  ;;  %2934 = vmatprep.mubr.f32.mxu1 %v4747_v5  ;;  %vm11132_vm12 = vcmp.eq.s32.totalorder %v10962_v34, %v8245_v16 }
 0x2db   : > { %4556 = vmatprep.subr.msk.bf16.mxu1 %vm4555_vm7, %v11033_v29  ;;  %vm4559_vm11 = vmpackc.low %vm11133_vm15, %vm11132_vm12  ;;  %vm11136_vm7 = vcmp.eq.s32.totalorder %v10962_v34, %v7722_v62  ;;  %vm11140_vm12 = vcmp.eq.s32.totalorder %v11139_v46, %v8245_v16  ;;  %v11145_v34 = vld [vmem:[#allocation27_spill] sm:$0xff] }
 0x2dc   : > { %3261 = vadd.xlane.f32.xlu0 %v8680_v11  ;;  %3258 = vadd.xlane.f32.xlu1 %v11135_v47  ;;  %vm4561_vm0 = vmpackc.low %vm11137_vm3, %vm11136_vm7  ;;  %v11141_v11 = vld [vmem:[#allocation55_spill] sm:$0xff]  ;;  %vm11143_vm7 = vcmp.eq.s32.totalorder %v11139_v46, %v7722_v62  ;;  %v3094_v47 = vld [vmem:[#allocation2 + $0x48] sm:$0xff] }
 0x2dd   : > { %2935 = vmatmul.mubr.f32.gmra.mrb[48].mxu1 %v4750_v10  ;;  %v3093_v46 = vld [vmem:[#allocation2 + $0x40] sm:$0xff] }
 0x2de   : > { %4558 = vmatpush1.bf16.msk.msra.mxu1 %vm4557_vm9, %v11033_v29  ;;  %2940 = vmatprep.mubr.f32.mxu1 %v4752_v9  ;;  %vm11138_vm9 = vcmp.eq.s32.totalorder %v10965_v52, %v8245_v16  ;;  %v3091_v9 = vld [vmem:[#allocation2 + $0x30] sm:$0xff] }
 0x2df   : > { %4560 = vmatprep.subr.msk.bf16.mxu1 %vm4559_vm11, %v11033_v29  ;;  %vm4563_vm15 = vmpackc.low %vm11140_vm12, %vm11138_vm9  ;;  %vm11142_vm11 = vcmp.eq.s32.totalorder %v10965_v52, %v7722_v62  ;;  %vm11146_vm9 = vcmp.eq.s32.totalorder %v11145_v34, %v8245_v16  ;;  %v11150_v52 = vld [vmem:[#allocation31_spill] sm:$0xff] }
 0x2e0   : > { %3267 = vadd.xlane.f32.xlu0 %v11141_v11  ;;  %3264 = vadd.xlane.f32.xlu1 %v8729_v0  ;;  %vm4565_vm3 = vmpackc.low %vm11143_vm7, %vm11142_vm11  ;;  %vm11149_vm11 = vcmp.eq.s32.totalorder %v11145_v34, %v7722_v62  ;;  %v11153_v0 = vld [vmem:[#allocation79_spill] sm:$0xff] }
 0x2e1   : > { %2941 = vmatmul.mubr.f32.gmra.mrb[50].mxu1 %v4755_v44 }
 0x2e2   : > { %4562 = vmatpush1.bf16.msk.msra.mxu1 %vm4561_vm0, %v11033_v29  ;;  %3011 = vmatprep.mubr.f32.mxu1 %v4789_v49  ;;  %vm11144_vm0 = vcmp.eq.s32.totalorder %v10969_v32, %v8245_v16 }
 0x2e3   : > { %4564 = vmatprep.subr.msk.bf16.mxu1 %vm4563_vm15, %v11033_v29  ;;  %vm4567_vm12 = vmpackc.low %vm11146_vm9, %vm11144_vm0  ;;  %vm11148_vm15 = vcmp.eq.s32.totalorder %v10969_v32, %v7722_v62  ;;  %vm11155_vm9 = vcmp.eq.s32.totalorder %v11150_v52, %v7722_v62  ;;  %v11158_v32 = vld [vmem:[#allocation41_spill] sm:$0xff] }
 0x2e4   : > { %3273 = vadd.xlane.f32.xlu0 %v11147_v7  ;;  %3270 = vadd.xlane.f32.xlu1 %v8749_v48  ;;  %vm4569_vm7 = vmpackc.low %vm11149_vm11, %vm11148_vm15  ;;  %v11154_v48 = vld [vmem:[#allocation80_spill] sm:$0xff]  ;;  %vm11157_vm11 = vcmp.eq.s32.totalorder %v10879_v55, %v8245_v16 }
 0x2e6   : > { %4566 = vmatpush1.bf16.msk.msra.mxu1 %vm4565_vm3, %v11033_v29  ;;  %vm11152_vm3 = vcmp.eq.s32.totalorder %v11151_v12, %v8245_v16 }
 0x2e7   : > { %4568 = vmatprep.subr.msk.bf16.mxu1 %vm4567_vm12, %v11033_v29  ;;  %vm4571_vm0 = vmpackc.low %vm11152_vm3, %vm2371_vm6  ;;  %vm11156_vm12 = vcmp.eq.s32.totalorder %v11151_v12, %v7722_v62  ;;  %vm11159_vm6 = vcmp.eq.s32.totalorder %v11158_v32, %v8245_v16  ;;  %vm11160_vm3 = vcmp.eq.s32.totalorder %v10879_v55, %v7722_v62  ;;  %v11167_v55 = vld [vmem:[#allocation57_spill] sm:$0xff]  ;;  %v3096_v12 = vld [vmem:[#allocation2 + $0x58] sm:$0xff] }
 0x2e8   : > { %3279 = vadd.xlane.f32.xlu0 %v11153_v0  ;;  %3276 = vadd.xlane.f32.xlu1 %v11154_v48  ;;  %vm4573_vm15 = vmpackc.low %vm11156_vm12, %vm11155_vm9  ;;  %vm11162_vm12 = vcmp.eq.s32.totalorder %v10728_v57, %v8245_v16  ;;  %v3095_v0 = vld [vmem:[#allocation2 + $0x50] sm:$0xff] }
 0x2ea   : > { %4570 = vmatpush1.bf16.msk.msra.mxu1 %vm4569_vm7, %v11033_v29  ;;  %vm4575_vm7 = vmpackc.low %vm11159_vm6, %vm11157_vm11  ;;  %vm11165_vm6 = vcmp.eq.s32.totalorder %v10728_v57, %v7722_v62  ;;  %v11176_v57 = vld [vmem:[#allocation139_spill] sm:$0xff] }
 0x2eb   : > { %4572 = vmatprep.subr.msk.bf16.mxu1 %vm4571_vm0, %v11033_v29  ;;  %vm11161_vm0 = vcmp.eq.s32.totalorder %v11158_v32, %v7722_v62 }
 0x2ec   : > { %3285 = vadd.xlane.f32.xlu0 %v8806_v23  ;;  %3282 = vadd.xlane.f32.xlu1 %v8809_v4  ;;  %vm4577_vm9 = vmpackc.low %vm11161_vm0, %vm11160_vm3  ;;  %v11164_v23 = vld [vmem:[#allocation86_spill] sm:$0xff]  ;;  %vm11168_vm0 = vcmp.eq.s32.totalorder %v11167_v55, %v8245_v16  ;;  %v11169_v4 = vld [vmem:[#allocation65_spill] sm:$0xff] }
 0x2ee   : > { %4574 = vmatpush1.bf16.msk.msra.mxu1 %vm4573_vm15, %v11033_v29  ;;  %vm11163_vm15 = vcmp.eq.s32.totalorder %v10881_v1, %v8245_v16 }
 0x2ef   : > { %4576 = vmatprep.subr.msk.bf16.mxu1 %vm4575_vm7, %v11033_v29  ;;  %vm4579_vm11 = vmpackc.low %vm11163_vm15, %vm11162_vm12  ;;  %vm11166_vm7 = vcmp.eq.s32.totalorder %v10881_v1, %v7722_v62  ;;  %vm11173_vm15 = vcmp.eq.s32.totalorder %v11167_v55, %v7722_v62  ;;  %v11178_v1 = vld [vmem:[#allocation88_spill] sm:$0xff] }
 0x2f0   : > { %3291 = vadd.xlane.f32.xlu0 %v11164_v23  ;;  %3288 = vadd.xlane.f32.xlu1 %v8834_v33  ;;  %vm4581_vm3 = vmpackc.low %vm11166_vm7, %vm11165_vm6  ;;  %v11172_v33 = vld [vmem:[#allocation81_spill] sm:$0xff]  ;;  %vm11175_vm7 = vcmp.eq.s32.totalorder %v11074_v15, %v8245_v16 }
 0x2f2   : > { %4578 = vmatpush1.bf16.msk.msra.mxu1 %vm4577_vm9, %v11033_v29  ;;  %vm11170_vm9 = vcmp.eq.s32.totalorder %v11169_v4, %v8245_v16 }
 0x2f3   : > { %4580 = vmatprep.subr.msk.bf16.mxu1 %vm4579_vm11, %v11033_v29  ;;  %vm4583_vm12 = vmpackc.low %vm11170_vm9, %vm11168_vm0  ;;  %vm11174_vm11 = vcmp.eq.s32.totalorder %v11169_v4, %v7722_v62  ;;  %vm11179_vm9 = vcmp.eq.s32.totalorder %v11074_v15, %v7722_v62  ;;  %v11184_v15 = vld [vmem:[#allocation144_spill] sm:$0xff]  ;;  %v3098_v4 = vld [vmem:[#allocation2 + $0x68] sm:$0xff] }
 0x2f4   : > { %3297 = vadd.xlane.f32.xlu0 %v11171_v51  ;;  %3294 = vadd.xlane.f32.xlu1 %v11172_v33  ;;  %vm4585_vm6 = vmpackc.low %vm11174_vm11, %vm11173_vm15  ;;  %v3097_v51 = vld [vmem:[#allocation2 + $0x60] sm:$0xff] }
 0x2f5   : > { %vm4591_vm11 = vmpackc.low %vm2393_vm2, %vm2391_vm4  ;;  %vm11185_vm4 = vcmp.eq.s32.totalorder %v11184_v15, %v7722_v62  ;;  %v3099_v15 = vld [vmem:[#allocation2 + $0x70] sm:$0xff] }
 0x2f6   : > { %4582 = vmatpush1.bf16.msk.msra.mxu1 %vm4581_vm3, %v11033_v29  ;;  %vm11177_vm3 = vcmp.eq.s32.totalorder %v11176_v57, %v8245_v16  ;;  %vm4595_vm2 = vmpackc.low %vm2397_vm5, %vm2395_vm1  ;;  %vm11187_vm1 = vcmp.eq.s32.totalorder %v11054_v20, %v7722_v62  ;;  %vm11188_vm5 = vcmp.eq.s32.totalorder %v11078_v39, %v7722_v62 }
 0x2f7   : > { %4584 = vmatprep.subr.msk.bf16.mxu1 %vm4583_vm12, %v11033_v29  ;;  %vm4587_vm0 = vmpackc.low %vm11177_vm3, %vm11175_vm7  ;;  %vm11180_vm12 = vcmp.eq.s32.totalorder %v11176_v57, %v7722_v62  ;;  %vm11186_vm3 = vcmp.eq.s32.totalorder %v11053_v45, %v7722_v62 }
 0x2f8   : > { %3303 = vadd.xlane.f32.xlu0 %v11178_v1  ;;  %3300 = vadd.xlane.f32.xlu1 %v8887_v50  ;;  %vm4589_vm15 = vmpackc.low %vm11180_vm12, %vm11179_vm9  ;;  %v11182_v50 = vld [vmem:[#allocation94_spill] sm:$0xff]  ;;  %vm11189_vm12 = vcmp.eq.s32.totalorder %v11084_v63, %v8245_v16 }
 0x2f9   : > { %vm4601_vm9 = vmpackc.low %vm11188_vm5, %vm11187_vm1 }
 0x2fa   : > { %4586 = vmatpush1.bf16.msk.msra.mxu1 %vm4585_vm6, %v11033_v29  ;;  %vm11183_vm6 = vcmp.eq.s32.totalorder %v11048_v58, %v7722_v62 }
 0x2fb   : > { %4588 = vmatprep.subr.msk.bf16.mxu1 %vm4587_vm0, %v11033_v29  ;;  %vm4593_vm7 = vmpackc.low %vm11183_vm6, %vm2390_vm14  ;;  %vm11192_vm6 = vcmp.eq.s32.totalorder %v11087_v30, %v8245_v16 }
 0x2fc   : > { %3309 = vadd.xlane.f32.xlu0 %v11181_v13  ;;  %3306 = vadd.xlane.f32.xlu1 %v11182_v50  ;;  %vm4597_vm0 = vmpackc.low %vm11186_vm3, %vm11185_vm4  ;;  %vm11195_vm4 = vcmp.eq.s32.totalorder %v11090_v26, %v7722_v62  ;;  %v3100_v50 = vld [vmem:[#allocation2 + $0x78] sm:$0xff] }
 0x2fd   : > { %vm4599_vm14 = vmpackc.low %vm2401_vm8, %vm2399_vm10  ;;  %vm11190_vm10 = vcmp.eq.s32.totalorder %v11079_v2, %v7722_v62  ;;  %vm11191_vm8 = vcmp.eq.s32.totalorder %v11084_v63, %v7722_v62  ;;  %v11196_v63 = vld [vmem:[#allocation75_spill] sm:$0xff]  ;;  %v11198_v2 = vld [vmem:[#allocation96_spill] sm:$0xff] }
 0x2fe   : > { %4590 = vmatpush1.bf16.msk.msra.mxu1 %vm4589_vm15, %v11033_v29  ;;  %vm4603_vm15 = vmpackc.low %vm11189_vm12, %vm2403_vm13  ;;  %vm11194_vm13 = vcmp.eq.s32.totalorder %v11087_v30, %v7722_v62  ;;  %v4794_v58 = vunpack.i.l.bf16 %v11196_v63  ;;  %v4797_v45 = vunpack.i.h.bf16 %v11196_v63  ;;  %v4804_v30 = vunpack.i.l.bf16 %v11198_v2 }
 0x2ff   : > { %4592 = vmatprep.subr.msk.bf16.mxu1 %vm4591_vm11, %v11033_v29  ;;  %vm4605_vm11 = vmpackc.low %vm11191_vm8, %vm11190_vm10  ;;  %v4807_v62 = vunpack.i.h.bf16 %v11198_v2 }
 0x300   : > { %vm4609_vm3 = vmpackc.low %vm11195_vm4, %vm11194_vm13 }
 0x302   : > { %4594 = vmatpush1.bf16.msk.msra.mxu1 %vm4593_vm7, %v11033_v29  ;;  %vm11193_vm7 = vcmp.eq.s32.totalorder %v11090_v26, %v8245_v16  ;;  %v11197_v16 = vld [vmem:[#allocation83_spill] sm:$0xff]  ;;  %v3085_v26 = vld [vmem:[#allocation2] sm:$0xff] }
 0x303   : > { %4596 = vmatprep.subr.msk.bf16.mxu1 %vm4595_vm2, %v11033_v29  ;;  %vm4607_vm2 = vmpackc.low %vm11193_vm7, %vm11192_vm6  ;;  %v4799_v20 = vunpack.i.l.bf16 %v11197_v16  ;;  %v4802_v39 = vunpack.i.h.bf16 %v11197_v16  ;;  %v3102_v16 = vld [vmem:[#allocation2 + $0x88] sm:$0xff] }
 0x306   : > { %4598 = vmatpush1.bf16.msk.msra.mxu1 %vm4597_vm0, %v11033_v29  ;;  %vm3405_vm0 = vcmask 7168  }
 0x307   : > { %4600 = vmatprep.subr.msk.bf16.mxu1 %vm4599_vm14, %v11033_v29  ;;  %vm3083_vm14 = vcmask 0  }
 0x30a   : > { %4602 = vmatpush1.bf16.msk.msra.mxu1 %vm4601_vm9, %v11033_v29 }
 0x30b   : > { %4604 = vmatprep.subr.msk.bf16.mxu1 %vm4603_vm15, %v11033_v29 }
 0x30e   : > { %4606 = vmatpush1.bf16.msk.msra.mxu1 %vm4605_vm11, %v11033_v29 }
 0x30f   : > { %4608 = vmatprep.subr.msk.bf16.mxu1 %vm4607_vm2, %v11033_v29 }
 0x312   : > { %4610 = vmatpush1.bf16.msk.msra.mxu1 %vm4609_vm3, %v11033_v29  ;;  %v3086_v29 = vld [vmem:[#allocation2 + $0x8] sm:$0xff] }
 0x315   : > { %3012 = vmatmul.mubr.f32.vlgmr.msra.gmra.mrb[44].mxu1 %v4792_v56 }
 0x316   : > { %3017 = vmatprep.mubr.f32.mxu1 %v4794_v58 }
 0x319   : > { %3018 = vmatmul.mubr.f32.gmra.mrb[46].mxu1 %v4797_v45 }
 0x31a   : > { %3023 = vmatprep.mubr.f32.mxu1 %v4799_v20  ;;  %v3101_v20 = vld [vmem:[#allocation2 + $0x80] sm:$0xff] }
 0x31c   : > { %v3154_v61 = vpop.xlane.xlu0 %3153 }
 0x31d   : > { %3024 = vmatmul.mubr.f32.gmra.mrb[48].mxu1 %v4802_v39  ;;  %v3342_v60 = vadd.f32 %v3154_v61, %v3086_v29  ;;  %v3151_v8 = vpop.xlane.xlu1 %3150  ;;  %v3104_v29 = vld [vmem:[#allocation2 + $0x98] sm:$0xff] }
 0x31e   : > { %3029 = vmatprep.mubr.f32.mxu1 %v4804_v30  ;;  %v3341_v53 = vadd.f32 %v3151_v8, %v3085_v26  ;;  %v3103_v26 = vld [vmem:[#allocation2 + $0x90] sm:$0xff] }
 0x31f   : > { %3407 = vst.msk [vmem:[#allocation2 + $0x8] sm:$0xff] %vm3405_vm0, %v3342_v60 }
 0x320   : > { %3406 = vst.msk [vmem:[#allocation2] sm:$0xff] %vm3405_vm0, %v3341_v53  ;;  %v3160_v31 = vpop.xlane.xlu0 %3159 }
 0x321   : > { %3030 = vmatmul.mubr.f32.gmra.mrb[50].mxu1 %v4807_v62  ;;  %v3344_v24 = vadd.f32 %v3160_v31, %v3088_v28  ;;  %v3157_v14 = vpop.xlane.xlu1 %3156  ;;  %v3106_v28 = vld [vmem:[#allocation2 + $0xa8] sm:$0xff] }
 0x322   : > { %v3343_v41 = vadd.f32 %v3157_v14, %v3087_v21  ;;  %v3105_v21 = vld [vmem:[#allocation2 + $0xa0] sm:$0xff] }
 0x323   : > { %3409 = vst.msk [vmem:[#allocation2 + $0x18] sm:$0xff] %vm3405_vm0, %v3344_v24 }
 0x324   : > { %3408 = vst.msk [vmem:[#allocation2 + $0x10] sm:$0xff] %vm3405_vm0, %v3343_v41  ;;  %v3166_v40 = vpop.xlane.xlu0 %3165 }
 0x325   : > { %v3346_v5 = vadd.f32 %v3166_v40, %v3090_v27  ;;  %v3163_v54 = vpop.xlane.xlu1 %3162  ;;  %v3108_v27 = vld [vmem:[#allocation2 + $0xb8] sm:$0xff] }
 0x326   : > { %v3345_v10 = vadd.f32 %v3163_v54, %v3089_v37  ;;  %v3107_v37 = vld [vmem:[#allocation2 + $0xb0] sm:$0xff] }
 0x327   : > { %3411 = vst.msk [vmem:[#allocation2 + $0x28] sm:$0xff] %vm3405_vm0, %v3346_v5 }
 0x328   : > { %3410 = vst.msk [vmem:[#allocation2 + $0x20] sm:$0xff] %vm3405_vm0, %v3345_v10  ;;  %v3172_v59 = vpop.xlane.xlu0 %3171 }
 0x329   : > { %v3348_v44 = vadd.f32 %v3172_v59, %v3092_v35  ;;  %v3169_v25 = vpop.xlane.xlu1 %3168  ;;  %v3110_v35 = vld [vmem:[#allocation2 + $0xc8] sm:$0xff] }
 0x32a   : > { %v3347_v49 = vadd.f32 %v3169_v25, %v3091_v9  ;;  %v3109_v9 = vld [vmem:[#allocation2 + $0xc0] sm:$0xff] }
 0x32b   : > { %3413 = vst.msk [vmem:[#allocation2 + $0x38] sm:$0xff] %vm3405_vm0, %v3348_v44 }
 0x32c   : > { %3412 = vst.msk [vmem:[#allocation2 + $0x30] sm:$0xff] %vm3405_vm0, %v3347_v49  ;;  %v3178_v11 = vpop.xlane.xlu0 %3177 }
 0x32d   : > { %v3350_v34 = vadd.f32 %v3178_v11, %v3094_v47  ;;  %v3175_v7 = vpop.xlane.xlu1 %3174  ;;  %v3112_v47 = vld [vmem:[#allocation2 + $0xd8] sm:$0xff] }
 0x32e   : > { %v3349_v52 = vadd.f32 %v3175_v7, %v3093_v46  ;;  %v3111_v46 = vld [vmem:[#allocation2 + $0xd0] sm:$0xff] }
 0x32f   : > { %3415 = vst.msk [vmem:[#allocation2 + $0x48] sm:$0xff] %vm3405_vm0, %v3350_v34 }
 0x330   : > { %3414 = vst.msk [vmem:[#allocation2 + $0x40] sm:$0xff] %vm3405_vm0, %v3349_v52  ;;  %v3184_v48 = vpop.xlane.xlu0 %3183 }
 0x331   : > { %v3352_v32 = vadd.f32 %v3184_v48, %v3096_v12  ;;  %v3181_v23 = vpop.xlane.xlu1 %3180  ;;  %v3114_v12 = vld [vmem:[#allocation2 + $0xe8] sm:$0xff] }
 0x332   : > { %v3351_v55 = vadd.f32 %v3181_v23, %v3095_v0  ;;  %v3113_v0 = vld [vmem:[#allocation2 + $0xe0] sm:$0xff] }
 0x333   : > { %3417 = vst.msk [vmem:[#allocation2 + $0x58] sm:$0xff] %vm3405_vm0, %v3352_v32 }
 0x334   : > { %3416 = vst.msk [vmem:[#allocation2 + $0x50] sm:$0xff] %vm3405_vm0, %v3351_v55  ;;  %v3190_v33 = vpop.xlane.xlu0 %3189 }
 0x335   : > { %v3354_v57 = vadd.f32 %v3190_v33, %v3098_v4  ;;  %v3187_v1 = vpop.xlane.xlu1 %3186  ;;  %v3116_v4 = vld [vmem:[#allocation2 + $0xf8] sm:$0xff] }
 0x336   : > { %v3353_v13 = vadd.f32 %v3187_v1, %v3097_v51  ;;  %v3115_v51 = vld [vmem:[#allocation2 + $0xf0] sm:$0xff] }
 0x337   : > { %3419 = vst.msk [vmem:[#allocation2 + $0x68] sm:$0xff] %vm3405_vm0, %v3354_v57 }
 0x338   : > { %3418 = vst.msk [vmem:[#allocation2 + $0x60] sm:$0xff] %vm3405_vm0, %v3353_v13 }
 0x339   : > { %v3196_v56 = vpop.xlane.xlu0 %3195  ;;  %v3193_v58 = vpop.xlane.xlu1 %3192 }
 0x33a   : > { %v3356_v63 = vadd.f32 %v3196_v56, %v3100_v50  ;;  %v3355_v45 = vadd.f32 %v3193_v58, %v3099_v15  ;;  %v3118_v50 = vld [vmem:[#allocation2 + $0x108] sm:$0xff]  ;;  %v3117_v15 = vld [vmem:[#allocation2 + $0x100] sm:$0xff] }
 0x33c   : > { %3421 = vst.msk [vmem:[#allocation2 + $0x78] sm:$0xff] %vm3405_vm0, %v3356_v63  ;;  %3420 = vst.msk [vmem:[#allocation2 + $0x70] sm:$0xff] %vm3405_vm0, %v3355_v45 }
 0x33d   : > { %v3202_v39 = vpop.xlane.xlu0 %3201 }
 0x33e   : > { %v3358_v2 = vadd.f32 %v3202_v39, %v3102_v16  ;;  %v3199_v30 = vpop.xlane.xlu1 %3198  ;;  %v3120_v16 = vld [vmem:[#allocation2 + $0x118] sm:$0xff] }
 0x33f   : > { %v3357_v62 = vadd.f32 %v3199_v30, %v3101_v20  ;;  %v3119_v20 = vld [vmem:[#allocation2 + $0x110] sm:$0xff] }
 0x340   : > { %3423 = vst.msk [vmem:[#allocation2 + $0x88] sm:$0xff] %vm3405_vm0, %v3358_v2 }
 0x341   : > { %3422 = vst.msk [vmem:[#allocation2 + $0x80] sm:$0xff] %vm3405_vm0, %v3357_v62  ;;  %v3208_v61 = vpop.xlane.xlu0 %3207 }
 0x342   : > { %v3360_v60 = vadd.f32 %v3208_v61, %v3104_v29  ;;  %v3205_v8 = vpop.xlane.xlu1 %3204  ;;  %v3122_v29 = vld [vmem:[#allocation2 + $0x128] sm:$0xff] }
 0x343   : > { %v3359_v53 = vadd.f32 %v3205_v8, %v3103_v26  ;;  %v3121_v26 = vld [vmem:[#allocation2 + $0x120] sm:$0xff] }
 0x344   : > { %3425 = vst.msk [vmem:[#allocation2 + $0x98] sm:$0xff] %vm3405_vm0, %v3360_v60 }
 0x345   : > { %3424 = vst.msk [vmem:[#allocation2 + $0x90] sm:$0xff] %vm3405_vm0, %v3359_v53 }
 0x347   : > { %v3214_v31 = vpop.xlane.xlu0 %3213 }
 0x348   : > { %v3362_v24 = vadd.f32 %v3214_v31, %v3106_v28  ;;  %v3211_v14 = vpop.xlane.xlu1 %3210  ;;  %v3124_v28 = vld [vmem:[#allocation2 + $0x138] sm:$0xff] }
 0x349   : > { %v3361_v41 = vadd.f32 %v3211_v14, %v3105_v21  ;;  %v3123_v21 = vld [vmem:[#allocation2 + $0x130] sm:$0xff] }
 0x34a   : > { %3427 = vst.msk [vmem:[#allocation2 + $0xa8] sm:$0xff] %vm3405_vm0, %v3362_v24 }
 0x34b   : > { %3426 = vst.msk [vmem:[#allocation2 + $0xa0] sm:$0xff] %vm3405_vm0, %v3361_v41  ;;  %v3220_v40 = vpop.xlane.xlu0 %3219 }
 0x34c   : > { %v3364_v5 = vadd.f32 %v3220_v40, %v3108_v27  ;;  %v3126_v27 = vld [vmem:[#allocation2 + $0x148] sm:$0xff] }
 0x34d   : > { %v3217_v54 = vpop.xlane.xlu1 %3216 }
 0x34e   : > { %v3363_v10 = vadd.f32 %v3217_v54, %v3107_v37  ;;  %3429 = vst.msk [vmem:[#allocation2 + $0xb8] sm:$0xff] %vm3405_vm0, %v3364_v5  ;;  %v3125_v37 = vld [vmem:[#allocation2 + $0x140] sm:$0xff] }
 0x34f   : > { %v3226_v59 = vpop.xlane.xlu0 %3225 }
 0x350   : > { %3428 = vst.msk [vmem:[#allocation2 + $0xb0] sm:$0xff] %vm3405_vm0, %v3363_v10  ;;  %v3366_v44 = vadd.f32 %v3226_v59, %v3110_v35  ;;  %v3128_v35 = vld [vmem:[#allocation2 + $0x158] sm:$0xff] }
 0x351   : > { %v3223_v25 = vpop.xlane.xlu1 %3222 }
 0x352   : > { %v3365_v49 = vadd.f32 %v3223_v25, %v3109_v9  ;;  %3431 = vst.msk [vmem:[#allocation2 + $0xc8] sm:$0xff] %vm3405_vm0, %v3366_v44  ;;  %v3127_v9 = vld [vmem:[#allocation2 + $0x150] sm:$0xff] }
 0x354   : > { %3430 = vst.msk [vmem:[#allocation2 + $0xc0] sm:$0xff] %vm3405_vm0, %v3365_v49 }
 0x355   : > { %v3232_v11 = vpop.xlane.xlu0 %3231  ;;  %v3229_v7 = vpop.xlane.xlu1 %3228 }
 0x356   : > { %v3368_v34 = vadd.f32 %v3232_v11, %v3112_v47  ;;  %v3367_v52 = vadd.f32 %v3229_v7, %v3111_v46  ;;  %v3130_v47 = vld [vmem:[#allocation2 + $0x168] sm:$0xff]  ;;  %v3129_v46 = vld [vmem:[#allocation2 + $0x160] sm:$0xff] }
 0x358   : > { %3433 = vst.msk [vmem:[#allocation2 + $0xd8] sm:$0xff] %vm3405_vm0, %v3368_v34  ;;  %3432 = vst.msk [vmem:[#allocation2 + $0xd0] sm:$0xff] %vm3405_vm0, %v3367_v52 }
 0x359   : > { %v3238_v48 = vpop.xlane.xlu0 %3237  ;;  %v3235_v23 = vpop.xlane.xlu1 %3234 }
 0x35a   : > { %v3370_v32 = vadd.f32 %v3238_v48, %v3114_v12  ;;  %v3369_v55 = vadd.f32 %v3235_v23, %v3113_v0  ;;  %v3132_v12 = vld [vmem:[#allocation2 + $0x178] sm:$0xff]  ;;  %v3131_v0 = vld [vmem:[#allocation2 + $0x170] sm:$0xff] }
 0x35c   : > { %3435 = vst.msk [vmem:[#allocation2 + $0xe8] sm:$0xff] %vm3405_vm0, %v3370_v32  ;;  %3434 = vst.msk [vmem:[#allocation2 + $0xe0] sm:$0xff] %vm3405_vm0, %v3369_v55 }
 0x35d   : > { %v3244_v33 = vpop.xlane.xlu0 %3243  ;;  %v3241_v1 = vpop.xlane.xlu1 %3240 }
 0x35e   : > { %v3372_v57 = vadd.f32 %v3244_v33, %v3116_v4  ;;  %v3371_v13 = vadd.f32 %v3241_v1, %v3115_v51  ;;  %v3134_v4 = vld [vmem:[#allocation2 + $0x188] sm:$0xff]  ;;  %v3133_v51 = vld [vmem:[#allocation2 + $0x180] sm:$0xff] }
 0x360   : > { %3437 = vst.msk [vmem:[#allocation2 + $0xf8] sm:$0xff] %vm3405_vm0, %v3372_v57  ;;  %3436 = vst.msk [vmem:[#allocation2 + $0xf0] sm:$0xff] %vm3405_vm0, %v3371_v13 }
 0x361   : > { %v3250_v56 = vpop.xlane.xlu0 %3249  ;;  %v3247_v58 = vpop.xlane.xlu1 %3246 }
 0x362   : > { %v3374_v63 = vadd.f32 %v3250_v56, %v3118_v50  ;;  %v3373_v45 = vadd.f32 %v3247_v58, %v3117_v15  ;;  %v3136_v50 = vld [vmem:[#allocation2 + $0x198] sm:$0xff]  ;;  %v3135_v15 = vld [vmem:[#allocation2 + $0x190] sm:$0xff] }
 0x364   : > { %3439 = vst.msk [vmem:[#allocation2 + $0x108] sm:$0xff] %vm3405_vm0, %v3374_v63  ;;  %3438 = vst.msk [vmem:[#allocation2 + $0x100] sm:$0xff] %vm3405_vm0, %v3373_v45 }
 0x365   : > { %v3256_v39 = vpop.xlane.xlu0 %3255  ;;  %v3253_v30 = vpop.xlane.xlu1 %3252 }
 0x366   : > { %v3376_v2 = vadd.f32 %v3256_v39, %v3120_v16  ;;  %v3375_v62 = vadd.f32 %v3253_v30, %v3119_v20  ;;  %v3138_v16 = vld [vmem:[#allocation2 + $0x1a8] sm:$0xff]  ;;  %v3137_v20 = vld [vmem:[#allocation2 + $0x1a0] sm:$0xff] }
 0x368   : > { %3441 = vst.msk [vmem:[#allocation2 + $0x118] sm:$0xff] %vm3405_vm0, %v3376_v2  ;;  %3440 = vst.msk [vmem:[#allocation2 + $0x110] sm:$0xff] %vm3405_vm0, %v3375_v62 }
 0x369   : > { %v3262_v61 = vpop.xlane.xlu0 %3261  ;;  %v3259_v8 = vpop.xlane.xlu1 %3258 }
 0x36a   : > { %v3378_v60 = vadd.f32 %v3262_v61, %v3122_v29  ;;  %v3377_v53 = vadd.f32 %v3259_v8, %v3121_v26  ;;  %v4840_v26 = vld [vmem:[%s5205_s18] sm:$0xff]  ;;  %v4841_v8 = vld [vmem:[%s5205_s18 + $0x8] sm:$0xff] }
 0x36c   : > { %3443 = vst.msk [vmem:[#allocation2 + $0x128] sm:$0xff] %vm3405_vm0, %v3378_v60  ;;  %3442 = vst.msk [vmem:[#allocation2 + $0x120] sm:$0xff] %vm3405_vm0, %v3377_v53 }
 0x36d   : > { %v3268_v31 = vpop.xlane.xlu0 %3267  ;;  %v3265_v14 = vpop.xlane.xlu1 %3264 }
 0x36e   : > { %v3380_v24 = vadd.f32 %v3268_v31, %v3124_v28  ;;  %v3379_v41 = vadd.f32 %v3265_v14, %v3123_v21 }
 0x370   : > { %3445 = vst.msk [vmem:[#allocation2 + $0x138] sm:$0xff] %vm3405_vm0, %v3380_v24  ;;  %3444 = vst.msk [vmem:[#allocation2 + $0x130] sm:$0xff] %vm3405_vm0, %v3379_v41  ;;  %v4842_v24 = vld [vmem:[%s5205_s18 + $0x10] sm:$0xff] }
 0x371   : > { %v3274_v40 = vpop.xlane.xlu0 %3273  ;;  %v3271_v54 = vpop.xlane.xlu1 %3270 }
 0x372   : > { %v3382_v5 = vadd.f32 %v3274_v40, %v3126_v27  ;;  %v3381_v10 = vadd.f32 %v3271_v54, %v3125_v37  ;;  %v4843_v27 = vld [vmem:[%s5205_s18 + $0x18] sm:$0xff] }
 0x374   : > { %3447 = vst.msk [vmem:[#allocation2 + $0x148] sm:$0xff] %vm3405_vm0, %v3382_v5  ;;  %3446 = vst.msk [vmem:[#allocation2 + $0x140] sm:$0xff] %vm3405_vm0, %v3381_v10 }
 0x375   : > { %v3280_v59 = vpop.xlane.xlu0 %3279  ;;  %v3277_v25 = vpop.xlane.xlu1 %3276 }
 0x376   : > { %v3384_v44 = vadd.f32 %v3280_v59, %v3128_v35  ;;  %v3383_v49 = vadd.f32 %v3277_v25, %v3127_v9  ;;  %v4844_v35 = vld [vmem:[%s5205_s18 + $0x20] sm:$0xff] }
 0x378   : > { %3449 = vst.msk [vmem:[#allocation2 + $0x158] sm:$0xff] %vm3405_vm0, %v3384_v44  ;;  %3448 = vst.msk [vmem:[#allocation2 + $0x150] sm:$0xff] %vm3405_vm0, %v3383_v49  ;;  %v4845_v44 = vld [vmem:[%s5205_s18 + $0x28] sm:$0xff] }
 0x379   : > { %v3286_v11 = vpop.xlane.xlu0 %3285  ;;  %v3283_v7 = vpop.xlane.xlu1 %3282 }
 0x37a   : > { %v3386_v34 = vadd.f32 %v3286_v11, %v3130_v47  ;;  %v3385_v52 = vadd.f32 %v3283_v7, %v3129_v46 }
 0x37c   : > { %3451 = vst.msk [vmem:[#allocation2 + $0x168] sm:$0xff] %vm3405_vm0, %v3386_v34  ;;  %3450 = vst.msk [vmem:[#allocation2 + $0x160] sm:$0xff] %vm3405_vm0, %v3385_v52  ;;  %v4846_v34 = vld [vmem:[%s5205_s18 + $0x30] sm:$0xff] }
 0x37d   : > { %v3292_v48 = vpop.xlane.xlu0 %3291  ;;  %v3289_v23 = vpop.xlane.xlu1 %3288 }
 0x37e   : > { %v3388_v32 = vadd.f32 %v3292_v48, %v3132_v12  ;;  %v3387_v55 = vadd.f32 %v3289_v23, %v3131_v0  ;;  %v4847_v12 = vld [vmem:[%s5205_s18 + $0x38] sm:$0xff] }
 0x380   : > { %3453 = vst.msk [vmem:[#allocation2 + $0x178] sm:$0xff] %vm3405_vm0, %v3388_v32  ;;  %3452 = vst.msk [vmem:[#allocation2 + $0x170] sm:$0xff] %vm3405_vm0, %v3387_v55 }
 0x381   : > { %v3298_v33 = vpop.xlane.xlu0 %3297  ;;  %v3295_v1 = vpop.xlane.xlu1 %3294 }
 0x382   : > { %v3390_v57 = vadd.f32 %v3298_v33, %v3134_v4  ;;  %v3389_v13 = vadd.f32 %v3295_v1, %v3133_v51  ;;  %v3141_v1 = vld [vmem:[#allocation2 + $0x1c0] sm:$0xff] }
 0x384   : > { %3455 = vst.msk [vmem:[#allocation2 + $0x188] sm:$0xff] %vm3405_vm0, %v3390_v57  ;;  %3454 = vst.msk [vmem:[#allocation2 + $0x180] sm:$0xff] %vm3405_vm0, %v3389_v13 }
 0x385   : > { %v3304_v56 = vpop.xlane.xlu0 %3303  ;;  %v3301_v58 = vpop.xlane.xlu1 %3300 }
 0x386   : > { %v3392_v63 = vadd.f32 %v3304_v56, %v3136_v50  ;;  %v3391_v45 = vadd.f32 %v3301_v58, %v3135_v15  ;;  %v3142_v50 = vld [vmem:[#allocation2 + $0x1c8] sm:$0xff]  ;;  %v3143_v15 = vld [vmem:[#allocation2 + $0x1d0] sm:$0xff] }
 0x388   : > { %3457 = vst.msk [vmem:[#allocation2 + $0x198] sm:$0xff] %vm3405_vm0, %v3392_v63  ;;  %3456 = vst.msk [vmem:[#allocation2 + $0x190] sm:$0xff] %vm3405_vm0, %v3391_v45 }
 0x389   : > { %v3310_v39 = vpop.xlane.xlu0 %3309  ;;  %v3307_v30 = vpop.xlane.xlu1 %3306 }
 0x38a   : > { %v3394_v2 = vadd.f32 %v3310_v39, %v3138_v16  ;;  %v3393_v62 = vadd.f32 %v3307_v30, %v3137_v20  ;;  %v3144_v39 = vld [vmem:[#allocation2 + $0x1d8] sm:$0xff] }
 0x38c   : > { %3459 = vst.msk [vmem:[#allocation2 + $0x1a8] sm:$0xff] %vm3405_vm0, %v3394_v2  ;;  %3458 = vst.msk [vmem:[#allocation2 + $0x1a0] sm:$0xff] %vm3405_vm0, %v3393_v62  ;;  %v3145_v2 = vld [vmem:[#allocation2 + $0x1e0] sm:$0xff] }
 0x3e8   : > { %v3013_v29 = vpop.f32.mrb[44].mxu1 }
 0x3e9   : > { %3036 = vst [vmem:[%s5207_s19] sm:$0xff] %v3013_v29  ;;  %v3044_v61 = vsub.f32 %v4840_v26, %v3013_v29  ;;  %v3015_v60 = vpop.f32.mrb[45].mxu1 }
 0x3ea   : > { %3037 = vst [vmem:[%s5207_s19 + $0x8] sm:$0xff] %v3015_v60  ;;  %v3045_v53 = vsub.f32 %v4841_v8, %v3015_v60  ;;  %v3146_v8 = vld [vmem:[#allocation2 + $0x1e8] sm:$0xff] }
 0x3eb   : > { %v3052_v28 = vmul.f32 %v3044_v61, %v3044_v61 }
 0x3ec   : > { %v3053_v21 = vmul.f32 %v3045_v53, %v3045_v53  ;;  %v3019_v31 = vpop.f32.mrb[46].mxu1  ;;  %v3147_v53 = vld [vmem:[#allocation2 + $0x1f0] sm:$0xff] }
 0x3ed   : > { %3038 = vst [vmem:[%s5207_s19 + $0x10] sm:$0xff] %v3019_v31  ;;  %v3046_v14 = vsub.f32 %v4842_v24, %v3019_v31  ;;  %v3021_v41 = vpop.f32.mrb[47].mxu1 }
 0x3ee   : > { %3039 = vst [vmem:[%s5207_s19 + $0x18] sm:$0xff] %v3021_v41  ;;  %v3047_v37 = vsub.f32 %v4843_v27, %v3021_v41  ;;  %v3061_v40 = vadd.f32 %v3053_v21, %v3052_v28  ;;  %v3060_v21 = vld [vmem:[#allocation3] sm:$0x1] }
 0x3ef   : > { %v3054_v5 = vmul.f32 %v3046_v14, %v3046_v14 }
 0x3f0   : > { %v3055_v54 = vmul.f32 %v3047_v37, %v3047_v37  ;;  %3062 = vadd.xlane.f32.xlu0 %v3061_v40  ;;  %v3025_v10 = vpop.f32.mrb[48].mxu1  ;;  %v3148_v37 = vld [vmem:[#allocation2 + $0x1f8] sm:$0xff] }
 0x3f1   : > { %3040 = vst [vmem:[%s5207_s19 + $0x20] sm:$0xff] %v3025_v10  ;;  %v3048_v9 = vsub.f32 %v4844_v35, %v3025_v10  ;;  %v3027_v59 = vpop.f32.mrb[49].mxu1 }
 0x3f2   : > { %3041 = vst [vmem:[%s5207_s19 + $0x28] sm:$0xff] %v3027_v59  ;;  %v3049_v25 = vsub.f32 %v4845_v44, %v3027_v59  ;;  %v3064_v49 = vadd.f32 %v3055_v54, %v3054_v5  ;;  %v3479_v59 = vld [vmem:[#allocation2 + $0x8] sm:$0xff] (%p283_p13)  ;;  %v3480_v44 = vld [vmem:[#allocation2 + $0x10] sm:$0xff] (%p283_p13) }
 0x3f3   : > { %v3056_v47 = vmul.f32 %v3048_v9, %v3048_v9  ;;  %v3478_v9 = vld [vmem:[#allocation2] sm:$0xff] (%p283_p13) }
 0x3f4   : > { %v3057_v46 = vmul.f32 %v3049_v25, %v3049_v25  ;;  %3315 = vadd.xlane.f32.xlu0 %v9027_v17  ;;  %v3031_v11 = vpop.f32.mrb[50].mxu1  ;;  %3065 = vadd.xlane.f32.xlu1 %v3064_v49  ;;  %v3542_v25 = vmul.f32 (%p283_p13), 0.001953125, %v3478_v9  ;;  %v3543_v49 = vmul.f32 (%p283_p13), 0.001953125, %v3479_v59  ;;  %v3496_v59 = vld [vmem:[#allocation2 + $0x90] sm:$0xff] (%p283_p13) }
 0x3f5   : > { %3042 = vst [vmem:[%s5207_s19 + $0x30] sm:$0xff] %v3031_v11  ;;  %v3050_v7 = vsub.f32 %v4846_v34, %v3031_v11  ;;  %v3033_v52 = vpop.f32.mrb[51].mxu1  ;;  %v3482_v11 = vld [vmem:[#allocation2 + $0x20] sm:$0xff] (%p283_p13) }
 0x3f6   : > { %3043 = vst [vmem:[%s5207_s19 + $0x38] sm:$0xff] %v3033_v52  ;;  %v3051_v0 = vsub.f32 %v4847_v12, %v3033_v52  ;;  %v3067_v48 = vadd.f32 %v3057_v46, %v3056_v47  ;;  %v3481_v47 = vld [vmem:[#allocation2 + $0x18] sm:$0xff] (%p283_p13)  ;;  %v9472_v46 = vmul.f32 (%p283_p13), 0.001953125, %v3480_v44  ;;  %v3606_v34 = vadd.f32 (%p283_p13), 1e-07, %v3542_v25  ;;  %v3483_v12 = vld [vmem:[#allocation2 + $0x28] sm:$0xff] (%p283_p13) }
 0x3f7   : > { %v3058_v32 = vmul.f32 %v3050_v7, %v3050_v7  ;;  %v9474_v7 = vmul.f32 (%p283_p13), 0.001953125, %v3481_v47  ;;  %v3607_v52 = vadd.f32 (%p283_p13), 1e-07, %v3543_v49 }
 0x3f8   : > { %v3059_v23 = vmul.f32 %v3051_v0, %v3051_v0  ;;  %3068 = vadd.xlane.f32.xlu0 %v3067_v48  ;;  %3312 = vadd.xlane.f32.xlu1 %v9029_v6  ;;  %v3140_v6 = vld [vmem:[#allocation2 + $0x1b8] sm:$0xff]  ;;  %v9476_v0 = vmul.f32 (%p283_p13), 0.001953125, %v3482_v11  ;;  %v3608_v48 = vadd.f32 (%p283_p13), 1e-07, %v9472_v46  ;;  %4848 = vlog2.f32 (%p283_p13), %v3606_v34 }
 0x3f9   : > { %4850 = vlog2.f32 (%p283_p13), %v3607_v52  ;;  %v3497_v52 = vld [vmem:[#allocation2 + $0x98] sm:$0xff] (%p283_p13) }
 0x3fa   : > { %v3070_v55 = vadd.f32 %v3059_v23, %v3058_v32  ;;  %v3484_v32 = vld [vmem:[#allocation2 + $0x30] sm:$0xff] (%p283_p13)  ;;  %v9479_v23 = vmul.f32 (%p283_p13), 0.001953125, %v3483_v12  ;;  %4852 = vlog2.f32 (%p283_p13), %v3608_v48 }
 0x3fc   : > { %3071 = vadd.xlane.f32.xlu0 %v3070_v55  ;;  %3318 = vadd.xlane.f32.xlu1 %v9031_v38  ;;  %v3139_v38 = vld [vmem:[#allocation2 + $0x1b0] sm:$0xff]  ;;  %v3609_v55 = vadd.f32 (%p283_p13), 1e-07, %v9474_v7 }
 0x3fe   : > { %4854 = vlog2.f32 (%p283_p13), %v3609_v55 }
 0x400   : > { %3321 = vadd.xlane.f32.xlu0 %v9039_v3  ;;  %3324 = vadd.xlane.f32.xlu1 %v9054_v22 }
 0x404   : > { %3327 = vadd.xlane.f32.xlu0 %v9056_v42  ;;  %3330 = vadd.xlane.f32.xlu1 %v9058_v43 }
 0x408   : > { %3333 = vadd.xlane.f32.xlu0 %v9070_v36  ;;  %3336 = vadd.xlane.f32.xlu1 %v9087_v19 }
 0x40c   : > { %3339 = vadd.xlane.f32.xlu0 %v9089_v18 }
 0x47d   : > { %v3063_v17 = vpop.xlane.xlu0 %3062 }
 0x481   : > { %v3316_v4 = vpop.xlane.xlu0 %3315  ;;  %v3066_v51 = vpop.xlane.xlu1 %3065 }
 0x482   : > { %v3396_v33 = vadd.f32 %v3316_v4, %v3140_v6  ;;  %v3073_v57 = vadd.f32 %v3066_v51, %v3063_v17  ;;  %v3485_v17 = vld [vmem:[#allocation2 + $0x38] sm:$0xff] (%p283_p13)  ;;  %v9482_v6 = vmul.f32 (%p283_p13), 0.001953125, %v3484_v32  ;;  %v3610_v4 = vadd.f32 (%p283_p13), 1e-07, %v9476_v0  ;;  %v3486_v51 = vld [vmem:[#allocation2 + $0x40] sm:$0xff] (%p283_p13) }
 0x484   : > { %3461 = vst.msk [vmem:[#allocation2 + $0x1b8] sm:$0xff] %vm3405_vm0, %v3396_v33  ;;  %v9485_v33 = vmul.f32 (%p283_p13), 0.001953125, %v3485_v17  ;;  %4856 = vlog2.f32 (%p283_p13), %v3610_v4  ;;  %v9524_v4 = vmul.f32 (%p283_p13), 0.001953125, %v3496_v59 }
 0x485   : > { %v3069_v3 = vpop.xlane.xlu0 %3068  ;;  %v3313_v22 = vpop.xlane.xlu1 %3312 }
 0x486   : > { %v3395_v42 = vadd.f32 %v3313_v22, %v3139_v38  ;;  %v3074_v43 = vadd.f32 %v3073_v57, %v3069_v3  ;;  %v3611_v38 = vadd.f32 (%p283_p13), 1e-07, %v9479_v23  ;;  %v3487_v3 = vld [vmem:[#allocation2 + $0x48] sm:$0xff] (%p283_p13)  ;;  %v9488_v22 = vmul.f32 (%p283_p13), 0.001953125, %v3486_v51 }
 0x487   : > { %v3612_v57 = vadd.f32 (%p283_p13), 1e-07, %v9482_v6 }
 0x488   : > { %3460 = vst.msk [vmem:[#allocation2 + $0x1b0] sm:$0xff] %vm3405_vm0, %v3395_v42  ;;  %v3488_v42 = vld [vmem:[#allocation2 + $0x50] sm:$0xff] (%p283_p13)  ;;  %4858 = vlog2.f32 (%p283_p13), %v3611_v38  ;;  %v3498_v38 = vld [vmem:[#allocation2 + $0xa0] sm:$0xff] (%p283_p13) }
 0x489   : > { %v3072_v36 = vpop.xlane.xlu0 %3071  ;;  %v3319_v19 = vpop.xlane.xlu1 %3318  ;;  %4860 = vlog2.f32 (%p283_p13), %v3612_v57 }
 0x48a   : > { %v3075_v13 = vadd.f32 %v3074_v43, %v3072_v36  ;;  %v3397_v18 = vadd.f32 %v3319_v19, %v3141_v1  ;;  %v9491_v1 = vmul.f32 (%p283_p13), 0.001953125, %v3487_v3  ;;  %v3613_v43 = vadd.f32 (%p283_p13), 1e-07, %v9485_v33  ;;  %v4849_v36 = vpop.eup (%p283_p13), %4848  ;;  %v3489_v19 = vld [vmem:[#allocation2 + $0x58] sm:$0xff] (%p283_p13) }
 0x48c   : > { %v3076_v56 = vrot.slane %v3075_v13, 4  ;;  %3462 = vst.msk [vmem:[#allocation2 + $0x1c0] sm:$0xff] %vm3405_vm0, %v3397_v18  ;;  %v9494_v18 = vmul.f32 (%p283_p13), 0.001953125, %v3488_v42  ;;  %4862 = vlog2.f32 (%p283_p13), %v3613_v43 }
 0x48d   : > { %v3322_v63 = vpop.xlane.xlu0 %3321  ;;  %v3325_v58 = vpop.xlane.xlu1 %3324 }
 0x48e   : > { %v3077_v45 = vadd.f32 %v3076_v56, %v3075_v13  ;;  %v3398_v16 = vadd.f32 %v3322_v63, %v3142_v50  ;;  %v3399_v20 = vadd.f32 %v3325_v58, %v3143_v15  ;;  %v4851_v13 = vpop.eup (%p283_p13), %4850  ;;  %v3614_v50 = vadd.f32 (%p283_p13), 1e-07, %v9488_v22  ;;  %v3490_v15 = vld [vmem:[#allocation2 + $0x60] sm:$0xff] (%p283_p13) }
 0x48f   : > { %v4853_v56 = vpop.eup (%p283_p13), %4852  ;;  %v9497_v63 = vmul.f32 (%p283_p13), 0.001953125, %v3489_v19  ;;  %v3615_v58 = vadd.f32 (%p283_p13), 1e-07, %v9491_v1 }
 0x490   : > { %v3078_v30 = vrot.slane %v3077_v45, 2  ;;  %3463 = vst.msk [vmem:[#allocation2 + $0x1c8] sm:$0xff] %vm3405_vm0, %v3398_v16  ;;  %3464 = vst.msk [vmem:[#allocation2 + $0x1d0] sm:$0xff] %vm3405_vm0, %v3399_v20  ;;  %v3491_v16 = vld [vmem:[#allocation2 + $0x68] sm:$0xff] (%p283_p13)  ;;  %v3673_v20 = vmul.f32 (%p283_p13), 0.6931472, %v4851_v13  ;;  %4864 = vlog2.f32 (%p283_p13), %v3614_v50 }
 0x491   : > { %v3328_v62 = vpop.xlane.xlu0 %3327  ;;  %v3331_v29 = vpop.xlane.xlu1 %3330  ;;  %4866 = vlog2.f32 (%p283_p13), %v3615_v58  ;;  %v3499_v13 = vld [vmem:[#allocation2 + $0xa8] sm:$0xff] (%p283_p13) }
 0x492   : > { %v3079_v26 = vadd.f32 %v3078_v30, %v3077_v45  ;;  %v3400_v61 = vadd.f32 %v3328_v62, %v3144_v39  ;;  %v3401_v60 = vadd.f32 %v3331_v29, %v3145_v2  ;;  %v3671_v45 = vmul.f32 (%p283_p13), 0.6931472, %v4849_v36  ;;  %v4855_v39 = vpop.eup (%p283_p13), %4854  ;;  %v3492_v62 = vld [vmem:[#allocation2 + $0x70] sm:$0xff] (%p283_p13) }
 0x493   : > { %v9500_v2 = vmul.f32 (%p283_p13), 0.001953125, %v3490_v15  ;;  %v3616_v30 = vadd.f32 (%p283_p13), 1e-07, %v9494_v18  ;;  %v3675_v29 = vmul.f32 (%p283_p13), 0.6931472, %v4853_v56  ;;  %v9529_v36 = vmul.f32 (%p283_p13), 0.001953125, %v3497_v52 }
 0x494   : > { %v3080_v28 = vrot.slane %v3079_v26, 1  ;;  %3465 = vst.msk [vmem:[#allocation2 + $0x1d8] sm:$0xff] %vm3405_vm0, %v3400_v61  ;;  %3466 = vst.msk [vmem:[#allocation2 + $0x1e0] sm:$0xff] %vm3405_vm0, %v3401_v60  ;;  %v3493_v61 = vld [vmem:[#allocation2 + $0x78] sm:$0xff] (%p283_p13)  ;;  %v9503_v60 = vmul.f32 (%p283_p13), 0.001953125, %v3491_v16 }
 0x495   : > { %v3334_v31 = vpop.xlane.xlu0 %3333  ;;  %v3337_v24 = vpop.xlane.xlu1 %3336  ;;  %4868 = vlog2.f32 (%p283_p13), %v3616_v30 }
 0x496   : > { %v3081_v14 = vadd.f32 %v3080_v28, %v3079_v26  ;;  %v3402_v41 = vadd.f32 %v3334_v31, %v3146_v8  ;;  %v3403_v27 = vadd.f32 %v3337_v24, %v3147_v53  ;;  %3471 = sbr.rel (!%p283_p13) target bundleno = 1386 (0x56a), region = 44  ;;  %v4857_v26 = vpop.eup (%p283_p13), %4856  ;;  %v3617_v8 = vadd.f32 (%p283_p13), 1e-07, %v9497_v63  ;;  %v3494_v28 = vld [vmem:[#allocation2 + $0x80] sm:$0xff] (%p283_p13) }
 0x497   : > { %v3798_v53 = vmul.f32 (%p283_p13), %v3671_v45, %v3542_v25  ;;  %v3799_v31 = vmul.f32 (%p283_p13), %v3673_v20, %v3543_v49  ;;  %v4859_v24 = vpop.eup (%p283_p13), %4858  ;;  %v9534_v45 = vmul.f32 (%p283_p13), 0.001953125, %v3498_v38  ;;  %v3500_v20 = vld [vmem:[#allocation2 + $0xb0] sm:$0xff] (%p283_p13) }
 0x498   : > { %v3082_v40 = vadd.f32 %v3081_v14, %v3060_v21  ;;  %3467 = vst.msk [vmem:[#allocation2 + $0x1e8] sm:$0xff] %vm3405_vm0, %v3402_v41  ;;  %3468 = vst.msk [vmem:[#allocation2 + $0x1f0] sm:$0xff] %vm3405_vm0, %v3403_v27  ;;  %v3677_v21 = vmul.f32 (%p283_p13), 0.6931472, %v4855_v39  ;;  %v9506_v14 = vmul.f32 (%p283_p13), 0.001953125, %v3492_v62  ;;  %v3495_v27 = vld [vmem:[#allocation2 + $0x88] sm:$0xff] (%p283_p13)  ;;  %4870 = vlog2.f32 (%p283_p13), %v3617_v8 }
 0x499   : > { %v3340_v5 = vpop.xlane.xlu0 %3339  ;;  %v3618_v41 = vadd.f32 (%p283_p13), 1e-07, %v9500_v2  ;;  %v3862_v9 = vsel (%p283_p13), %vm3405_vm0, %v3798_v53, 0.0  ;;  %v3681_v44 = vmul.f32 (%p283_p13), 0.6931472, %v4859_v24  ;;  %v3863_v49 = vsel (%p283_p13), %vm3405_vm0, %v3799_v31, 0.0 }
 0x49a   : > { %3084 = vst.msk [vmem:[#allocation3] sm:$0x1] %vm3083_vm14, %v3082_v40  ;;  %v3404_v54 = vadd.f32 %v3340_v5, %v3148_v37  ;;  %v9509_v37 = vmul.f32 (%p283_p13), 0.001953125, %v3493_v61  ;;  %v3679_v40 = vmul.f32 (%p283_p13), 0.6931472, %v4857_v26  ;;  %v3800_v5 = vmul.f32 (%p283_p13), %v3675_v29, %v9472_v46  ;;  %v3501_v8 = vld [vmem:[#allocation2 + $0xb8] sm:$0xff] (%p283_p13) }
 0x49b   : > { %v3801_v25 = vmul.f32 (%p283_p13), %v3677_v21, %v9474_v7  ;;  %v9518_v11 = vmul.f32 (%p283_p13), 0.001953125, %v3495_v27  ;;  %v3620_v34 = vadd.f32 (%p283_p13), 1e-07, %v9506_v14  ;;  %4872 = vlog2.f32 (%p283_p13), %v3618_v41  ;;  %v3502_v27 = vld [vmem:[#allocation2 + $0xc0] sm:$0xff] (%p283_p13) }
 0x49c   : > { %3469 = vst.msk [vmem:[#allocation2 + $0x1f8] sm:$0xff] %vm3405_vm0, %v3404_v54  ;;  %v4861_v54 = vpop.eup (%p283_p13), %4860  ;;  %v3864_v46 = vadd.f32 (%p283_p13), %v3863_v49, %v3862_v9  ;;  %v3621_v12 = vadd.f32 (%p283_p13), 1e-07, %v9509_v37  ;;  %v3802_v32 = vmul.f32 (%p283_p13), %v3679_v40, %v9476_v0  ;;  %v3865_v55 = vsel (%p283_p13), %vm3405_vm0, %v3800_v5, 0.0 }
 0x49d   : > { %v4863_v47 = vpop.eup %4862  ;;  %v3683_v48 = vmul.f32 0.6931472, %v4861_v54  ;;  %v3803_v57 = vmul.f32 %v3681_v44, %v9479_v23  ;;  %v3867_v42 = vsel %vm3405_vm0, %v3801_v25, 0.0  ;;  %v3623_v0 = vadd.f32 1e-07, %v9518_v11  ;;  %v3503_v44 = vld [vmem:[#allocation2 + $0xc8] sm:$0xff] }
 0x49e   : > { %v4865_v17 = vpop.eup %4864  ;;  %v3866_v51 = vadd.f32 %v3865_v55, %v3864_v46  ;;  %v3685_v3 = vmul.f32 0.6931472, %v4863_v47  ;;  %v3869_v56 = vsel %vm3405_vm0, %v3802_v32, 0.0  ;;  %v3624_v23 = vadd.f32 1e-07, %v9524_v4 }
 0x49f   : > { %v4867_v43 = vpop.eup %4866  ;;  %v3687_v50 = vmul.f32 0.6931472, %v4865_v17  ;;  %v3804_v15 = vmul.f32 %v3683_v48, %v9482_v6  ;;  %v3871_v62 = vsel %vm3405_vm0, %v3803_v57, 0.0  ;;  %v9539_v26 = vmul.f32 0.001953125, %v3499_v13  ;;  %v3504_v48 = vld [vmem:[#allocation2 + $0xd0] sm:$0xff] }
 0x4a0   : > { %v3868_v19 = vadd.f32 %v3867_v42, %v3866_v51  ;;  %v4869_v58 = vpop.eup %4868  ;;  %v3689_v39 = vmul.f32 0.6931472, %v4867_v43  ;;  %v3805_v30 = vmul.f32 %v3685_v3, %v9485_v33  ;;  %v3625_v6 = vadd.f32 1e-07, %v9529_v36  ;;  %v3505_v3 = vld [vmem:[#allocation2 + $0xd8] sm:$0xff] }
 0x4a1   : > { %v3472_v10 = vld [vmem:[#allocation3] sm:$0x1]  ;;  %v3691_v53 = vmul.f32 0.6931472, %v4869_v58  ;;  %v3873_v21 = vsel %vm3405_vm0, %v3804_v15, 0.0  ;;  %v9544_v24 = vmul.f32 0.001953125, %v3500_v20 }
 0x4a2   : > { %v3473_v35 = vmul.f32 6.1035156e-05, %v3472_v10  ;;  %v9512_v10 = vmul.f32 0.001953125, %v3494_v28  ;;  %v3870_v16 = vadd.f32 %v3869_v56, %v3868_v19  ;;  %v4871_v29 = vpop.eup %4870  ;;  %v3806_v28 = vmul.f32 %v3687_v50, %v9488_v22  ;;  %v3506_v50 = vld [vmem:[#allocation2 + $0xe0] sm:$0xff] }
 0x4a3   : > { %v3626_v33 = vadd.f32 1e-07, %v9534_v45  ;;  %v3693_v40 = vmul.f32 0.6931472, %v4871_v29  ;;  %v3807_v5 = vmul.f32 %v3689_v39, %v9491_v1  ;;  %v3875_v54 = vsel %vm3405_vm0, %v3805_v30, 0.0  ;;  %v3507_v30 = vld [vmem:[#allocation2 + $0xe8] sm:$0xff] }
 0x4a4   : > { %4623 = vpush %v3473_v35  ;;  %v3619_v35 = vadd.f32 1e-07, %v9503_v60  ;;  %v3622_v7 = vadd.f32 1e-07, %v9512_v10  ;;  %v3872_v61 = vadd.f32 %v3871_v62, %v3870_v16  ;;  %v9549_v9 = vmul.f32 0.001953125, %v3501_v8 }
 0x4a5   : > { %v4873_v31 = vpop.eup %4872  ;;  %v3627_v22 = vadd.f32 1e-07, %v9539_v26  ;;  %v3808_v49 = vmul.f32 %v3691_v53, %v9494_v18  ;;  %v3877_v47 = vsel %vm3405_vm0, %v3806_v28, 0.0  ;;  %v9554_v46 = vmul.f32 0.001953125, %v3502_v27  ;;  %v3508_v28 = vld [vmem:[#allocation2 + $0xf0] sm:$0xff] }
 0x4a6   : > { %4874 = vlog2.f32 %v3619_v35  ;;  %v3874_v41 = vadd.f32 %v3873_v21, %v3872_v61  ;;  %v3695_v25 = vmul.f32 0.6931472, %v4873_v31  ;;  %v3628_v1 = vadd.f32 1e-07, %v9544_v24 }
 0x4a7   : > { %4876 = vlog2.f32 %v3620_v34  ;;  %v3809_v55 = vmul.f32 %v3693_v40, %v9497_v63  ;;  %v3879_v17 = vsel %vm3405_vm0, %v3807_v5, 0.0  ;;  %v9559_v51 = vmul.f32 0.001953125, %v3503_v44 }
 0x4a8   : > { %4878 = vlog2.f32 %v3621_v12  ;;  %v3876_v59 = vadd.f32 %v3875_v54, %v3874_v41  ;;  %v3629_v18 = vadd.f32 1e-07, %v9549_v9  ;;  %v3810_v42 = vmul.f32 %v3695_v25, %v9500_v2  ;;  %v3509_v54 = vld [vmem:[#allocation2 + $0xf8] sm:$0xff] }
 0x4a9   : > { %4880 = vlog2.f32 %v3622_v7  ;;  %v3881_v43 = vsel %vm3405_vm0, %v3808_v49, 0.0  ;;  %v9564_v19 = vmul.f32 0.001953125, %v3504_v48  ;;  %v3630_v63 = vadd.f32 1e-07, %v9554_v46  ;;  %v3510_v49 = vld [vmem:[#allocation2 + $0x100] sm:$0xff] }
 0x4aa   : > { %4882 = vlog2.f32 %v3623_v0  ;;  %v3878_v52 = vadd.f32 %v3877_v47, %v3876_v59  ;;  %v9569_v20 = vmul.f32 0.001953125, %v3505_v3  ;;  %v3631_v2 = vadd.f32 1e-07, %v9559_v51 }
 0x4ab   : > { %4884 = vlog2.f32 %v3624_v23  ;;  %v3883_v23 = vsel %vm3405_vm0, %v3809_v55, 0.0  ;;  %v9574_v8 = vmul.f32 0.001953125, %v3506_v50  ;;  %v9580_v40 = vmul.f32 0.001953125, %v3507_v30  ;;  %v3511_v55 = vld [vmem:[#allocation2 + $0x108] sm:$0xff] }
 0x4ac   : > { %4886 = vlog2.f32 %v3625_v6  ;;  %v3880_v38 = vadd.f32 %v3879_v17, %v3878_v52  ;;  %v3885_v6 = vsel %vm3405_vm0, %v3810_v42, 0.0  ;;  %v9596_v3 = vmul.f32 0.001953125, %v3510_v49  ;;  %v3512_v42 = vld [vmem:[#allocation2 + $0x110] sm:$0xff]  ;;  %v3517_v49 = vld [vmem:[#allocation2 + $0x138] sm:$0xff] }
 0x4ad   : > { %4888 = vlog2.f32 %v3626_v33  ;;  %v3635_v48 = vadd.f32 1e-07, %v9580_v40  ;;  %v9601_v50 = vmul.f32 0.001953125, %v3511_v55 }
 0x4ae   : > { %4890 = vlog2.f32 %v3627_v22  ;;  %v3882_v13 = vadd.f32 %v3881_v43, %v3880_v38 }
 0x4af   : > { %4892 = vlog2.f32 %v3628_v1 }
 0x4b0   : > { %v4875_v35 = vpop.eup %4874  ;;  %4894 = vlog2.f32 %v3629_v18  ;;  %v3884_v39 = vadd.f32 %v3883_v23, %v3882_v13 }
 0x4b1   : > { %v4877_v34 = vpop.eup %4876  ;;  %v3697_v32 = vmul.f32 0.6931472, %v4875_v35  ;;  %4896 = vlog2.f32 %v3630_v63 }
 0x4b2   : > { %v4879_v12 = vpop.eup %4878  ;;  %v3699_v57 = vmul.f32 0.6931472, %v4877_v34  ;;  %v3886_v53 = vadd.f32 %v3885_v6, %v3884_v39  ;;  %4898 = vlog2.f32 %v3631_v2  ;;  %v9606_v39 = vmul.f32 0.001953125, %v3512_v42 }
 0x4b3   : > { %v4881_v7 = vpop.eup %4880  ;;  %v3701_v15 = vmul.f32 0.6931472, %v4879_v12  ;;  %v3811_v58 = vmul.f32 %v3697_v32, %v9503_v60  ;;  %v3632_v60 = vadd.f32 1e-07, %v9564_v19  ;;  %v9591_v12 = vmul.f32 0.001953125, %v3509_v54  ;;  %v3516_v54 = vld [vmem:[#allocation2 + $0x130] sm:$0xff] }
 0x4b4   : > { %v4883_v0 = vpop.eup %4882  ;;  %v3703_v56 = vmul.f32 0.6931472, %v4881_v7  ;;  %v3812_v29 = vmul.f32 %v3699_v57, %v9506_v14  ;;  %v3633_v14 = vadd.f32 1e-07, %v9569_v20 }
 0x4b5   : > { %v4885_v16 = vpop.eup %4884  ;;  %v3705_v62 = vmul.f32 0.6931472, %v4883_v0  ;;  %v3813_v31 = vmul.f32 %v3701_v15, %v9509_v37  ;;  %v3887_v41 = vsel %vm3405_vm0, %v3811_v58, 0.0  ;;  %v9585_v37 = vmul.f32 0.001953125, %v3508_v28 }
 0x4b6   : > { %v4887_v61 = vpop.eup %4886  ;;  %v3707_v21 = vmul.f32 0.6931472, %v4885_v16  ;;  %v3814_v33 = vmul.f32 %v3703_v56, %v9512_v10  ;;  %v3888_v5 = vadd.f32 %v3887_v41, %v3886_v53  ;;  %v3889_v59 = vsel %vm3405_vm0, %v3812_v29, 0.0  ;;  %v3513_v56 = vld [vmem:[#allocation2 + $0x118] sm:$0xff] }
 0x4b7   : > { %v4889_v27 = vpop.eup %4888  ;;  %v3709_v35 = vmul.f32 0.6931472, %v4887_v61  ;;  %v3815_v22 = vmul.f32 %v3705_v62, %v9518_v11  ;;  %v3634_v10 = vadd.f32 1e-07, %v9574_v8  ;;  %4900 = vlog2.f32 %v3632_v60  ;;  %v3514_v62 = vld [vmem:[#allocation2 + $0x120] sm:$0xff] }
 0x4b8   : > { %v4891_v44 = vpop.eup %4890  ;;  %v3890_v25 = vadd.f32 %v3889_v59, %v3888_v5  ;;  %v3711_v47 = vmul.f32 0.6931472, %v4889_v27  ;;  %v3816_v34 = vmul.f32 %v3707_v21, %v9524_v4  ;;  %v3891_v1 = vsel %vm3405_vm0, %v3813_v31, 0.0  ;;  %v3515_v21 = vld [vmem:[#allocation2 + $0x128] sm:$0xff] }
 0x4b9   : > { %v3893_v52 = vsel %vm3405_vm0, %v3814_v33, 0.0  ;;  %v4893_v11 = vpop.eup %4892  ;;  %4902 = vlog2.f32 %v3633_v14  ;;  %v3713_v17 = vmul.f32 0.6931472, %v4891_v44  ;;  %v3817_v7 = vmul.f32 %v3709_v35, %v9529_v36 }
 0x4ba   : > { %v3892_v32 = vadd.f32 %v3891_v1, %v3890_v25  ;;  %v3895_v18 = vsel %vm3405_vm0, %v3815_v22, 0.0  ;;  %v4895_v38 = vpop.eup %4894  ;;  %v3636_v4 = vadd.f32 1e-07, %v9585_v37  ;;  %4904 = vlog2.f32 %v3634_v10 }
 0x4bb   : > { %v3715_v43 = vmul.f32 0.6931472, %v4893_v11  ;;  %v3818_v0 = vmul.f32 %v3711_v47, %v9534_v45  ;;  %v3897_v63 = vsel %vm3405_vm0, %v3816_v34, 0.0  ;;  %v4897_v13 = vpop.eup %4896  ;;  %v3637_v36 = vadd.f32 1e-07, %v9591_v12 }
 0x4bc   : > { %v3894_v57 = vadd.f32 %v3893_v52, %v3892_v32  ;;  %4906 = vlog2.f32 %v3635_v48  ;;  %v3717_v58 = vmul.f32 0.6931472, %v4895_v38  ;;  %v3819_v23 = vmul.f32 %v3713_v17, %v9539_v26  ;;  %v4899_v2 = vpop.eup %4898  ;;  %v3518_v32 = vld [vmem:[#allocation2 + $0x140] sm:$0xff] }
 0x4bd   : > { %v3899_v16 = vsel %vm3405_vm0, %v3817_v7, 0.0  ;;  %v3638_v45 = vadd.f32 1e-07, %v9596_v3  ;;  %4908 = vlog2.f32 %v3636_v4  ;;  %v3719_v29 = vmul.f32 0.6931472, %v4897_v13 }
 0x4be   : > { %v3896_v15 = vadd.f32 %v3895_v18, %v3894_v57  ;;  %v3820_v6 = vmul.f32 %v3715_v43, %v9544_v24  ;;  %v3901_v61 = vsel %vm3405_vm0, %v3818_v0, 0.0  ;;  %v9611_v53 = vmul.f32 0.001953125, %v3513_v56  ;;  %v3519_v57 = vld [vmem:[#allocation2 + $0x148] sm:$0xff] }
 0x4bf   : > { %v3639_v26 = vadd.f32 1e-07, %v9601_v50  ;;  %4910 = vlog2.f32 %v3637_v36  ;;  %v3721_v31 = vmul.f32 0.6931472, %v4899_v2  ;;  %v3821_v33 = vmul.f32 %v3717_v58, %v9549_v9 }
 0x4c0   : > { %v3898_v30 = vadd.f32 %v3897_v63, %v3896_v15  ;;  %v3903_v41 = vsel %vm3405_vm0, %v3819_v23, 0.0  ;;  %v9616_v14 = vmul.f32 0.001953125, %v3514_v62  ;;  %v3640_v24 = vadd.f32 1e-07, %v9606_v39  ;;  %v3520_v15 = vld [vmem:[#allocation2 + $0x150] sm:$0xff] }
 0x4c1   : > { %v4901_v60 = vpop.eup %4900  ;;  %4912 = vlog2.f32 %v3638_v45  ;;  %v3822_v22 = vmul.f32 %v3719_v29, %v9554_v46  ;;  %v3905_v59 = vsel %vm3405_vm0, %v3820_v6, 0.0  ;;  %v9621_v10 = vmul.f32 0.001953125, %v3515_v21 }
 0x4c2   : > { %v3900_v28 = vadd.f32 %v3899_v16, %v3898_v30  ;;  %v3723_v35 = vmul.f32 0.6931472, %v4901_v60  ;;  %v3641_v9 = vadd.f32 1e-07, %v9611_v53  ;;  %4914 = vlog2.f32 %v3639_v26  ;;  %v3521_v30 = vld [vmem:[#allocation2 + $0x158] sm:$0xff] }
 0x4c3   : > { %v4903_v27 = vpop.eup %4902  ;;  %v3823_v34 = vmul.f32 %v3721_v31, %v9559_v51  ;;  %v3907_v1 = vsel %vm3405_vm0, %v3821_v33, 0.0  ;;  %v9626_v11 = vmul.f32 0.001953125, %v3516_v54  ;;  %v3642_v46 = vadd.f32 1e-07, %v9616_v14 }
 0x4c4   : > { %v3902_v5 = vadd.f32 %v3901_v61, %v3900_v28  ;;  %v4905_v44 = vpop.eup %4904  ;;  %v3725_v47 = vmul.f32 0.6931472, %v4903_v27  ;;  %4916 = vlog2.f32 %v3640_v24  ;;  %v3824_v17 = vmul.f32 %v3723_v35, %v9564_v19  ;;  %v3522_v28 = vld [vmem:[#allocation2 + $0x160] sm:$0xff] }
 0x4c5   : > { %v3727_v55 = vmul.f32 0.6931472, %v4905_v44  ;;  %v3909_v7 = vsel %vm3405_vm0, %v3822_v22, 0.0  ;;  %v9631_v38 = vmul.f32 0.001953125, %v3517_v49  ;;  %v3643_v51 = vadd.f32 1e-07, %v9621_v10 }
 0x4c6   : > { %v3904_v25 = vadd.f32 %v3903_v41, %v3902_v5  ;;  %v4907_v52 = vpop.eup %4906  ;;  %4918 = vlog2.f32 %v3641_v9  ;;  %v3825_v43 = vmul.f32 %v3725_v47, %v9569_v20  ;;  %v3911_v0 = vsel %vm3405_vm0, %v3823_v34, 0.0  ;;  %v3523_v5 = vld [vmem:[#allocation2 + $0x168] sm:$0xff] }
 0x4c7   : > { %v4909_v18 = vpop.eup %4908  ;;  %v3729_v42 = vmul.f32 0.6931472, %v4907_v52  ;;  %v9636_v13 = vmul.f32 0.001953125, %v3518_v32  ;;  %v3644_v19 = vadd.f32 1e-07, %v9626_v11  ;;  %4920 = vlog2.f32 %v3642_v46 }
 0x4c8   : > { %v3906_v48 = vadd.f32 %v3905_v59, %v3904_v25  ;;  %v3731_v56 = vmul.f32 0.6931472, %v4909_v18  ;;  %v3826_v58 = vmul.f32 %v3727_v55, %v9574_v8  ;;  %v3913_v23 = vsel %vm3405_vm0, %v3824_v17, 0.0  ;;  %v3524_v25 = vld [vmem:[#allocation2 + $0x170] sm:$0xff] }
 0x4c9   : > { %v4911_v63 = vpop.eup %4910  ;;  %v9641_v2 = vmul.f32 0.001953125, %v3519_v57  ;;  %v3645_v20 = vadd.f32 1e-07, %v9631_v38  ;;  %4922 = vlog2.f32 %v3643_v51  ;;  %v3827_v29 = vmul.f32 %v3729_v42, %v9580_v40 }
 0x4ca   : > { %v3908_v4 = vadd.f32 %v3907_v1, %v3906_v48  ;;  %v3733_v62 = vmul.f32 0.6931472, %v4911_v63  ;;  %v3915_v6 = vsel %vm3405_vm0, %v3825_v43, 0.0  ;;  %v9646_v60 = vmul.f32 0.001953125, %v3520_v15  ;;  %v3525_v48 = vld [vmem:[#allocation2 + $0x178] sm:$0xff] }
 0x4cb   : > { %v4913_v16 = vpop.eup %4912  ;;  %v3646_v8 = vadd.f32 1e-07, %v9636_v13  ;;  %4924 = vlog2.f32 %v3644_v19  ;;  %v3828_v31 = vmul.f32 %v3731_v56, %v9585_v37  ;;  %v3917_v33 = vsel %vm3405_vm0, %v3826_v58, 0.0 }
 0x4cc   : > { %v3910_v36 = vadd.f32 %v3909_v7, %v3908_v4  ;;  %v4915_v61 = vpop.eup %4914  ;;  %v3735_v21 = vmul.f32 0.6931472, %v4913_v16  ;;  %v9651_v27 = vmul.f32 0.001953125, %v3521_v30  ;;  %v3647_v40 = vadd.f32 1e-07, %v9641_v2  ;;  %v3526_v4 = vld [vmem:[#allocation2 + $0x180] sm:$0xff] }
 0x4cd   : > { %4926 = vlog2.f32 %v3645_v20  ;;  %v3737_v54 = vmul.f32 0.6931472, %v4915_v61  ;;  %v3829_v35 = vmul.f32 %v3733_v62, %v9591_v12  ;;  %v3919_v22 = vsel %vm3405_vm0, %v3827_v29, 0.0 }
 0x4ce   : > { %v3912_v45 = vadd.f32 %v3911_v0, %v3910_v36  ;;  %v4917_v41 = vpop.eup %4916  ;;  %v9656_v44 = vmul.f32 0.001953125, %v3522_v28  ;;  %v3648_v37 = vadd.f32 1e-07, %v9646_v60  ;;  %4928 = vlog2.f32 %v3646_v8  ;;  %v3527_v36 = vld [vmem:[#allocation2 + $0x188] sm:$0xff] }
 0x4cf   : > { %v3739_v49 = vmul.f32 0.6931472, %v4917_v41  ;;  %v3830_v47 = vmul.f32 %v3735_v21, %v9596_v3  ;;  %v3921_v34 = vsel %vm3405_vm0, %v3828_v31, 0.0  ;;  %v9661_v52 = vmul.f32 0.001953125, %v3523_v5 }
 0x4d0   : > { %v3914_v26 = vadd.f32 %v3913_v23, %v3912_v45  ;;  %v4919_v59 = vpop.eup %4918  ;;  %v3649_v12 = vadd.f32 1e-07, %v9651_v27  ;;  %4930 = vlog2.f32 %v3647_v40  ;;  %v3831_v55 = vmul.f32 %v3737_v54, %v9601_v50  ;;  %v3528_v45 = vld [vmem:[#allocation2 + $0x190] sm:$0xff] }
 0x4d1   : > { %v4921_v1 = vpop.eup %4920  ;;  %v3741_v32 = vmul.f32 0.6931472, %v4919_v59  ;;  %v3923_v17 = vsel %vm3405_vm0, %v3829_v35, 0.0  ;;  %v9666_v18 = vmul.f32 0.001953125, %v3524_v25  ;;  %v3650_v3 = vadd.f32 1e-07, %v9656_v44 }
 0x4d2   : > { %v3916_v24 = vadd.f32 %v3915_v6, %v3914_v26  ;;  %4932 = vlog2.f32 %v3648_v37  ;;  %v3743_v57 = vmul.f32 0.6931472, %v4921_v1  ;;  %v3832_v42 = vmul.f32 %v3739_v49, %v9606_v39  ;;  %v3529_v26 = vld [vmem:[#allocation2 + $0x198] sm:$0xff] }
 0x4d3   : > { %v4923_v7 = vpop.eup %4922  ;;  %v3925_v43 = vsel %vm3405_vm0, %v3830_v47, 0.0  ;;  %v9671_v63 = vmul.f32 0.001953125, %v3525_v48  ;;  %v3651_v50 = vadd.f32 1e-07, %v9661_v52  ;;  %4934 = vlog2.f32 %v3649_v12 }
 0x4d4   : > { %v3918_v9 = vadd.f32 %v3917_v33, %v3916_v24  ;;  %v3745_v15 = vmul.f32 0.6931472, %v4923_v7  ;;  %v3833_v56 = vmul.f32 %v3741_v32, %v9611_v53  ;;  %v3927_v58 = vsel %vm3405_vm0, %v3831_v55, 0.0  ;;  %v3530_v24 = vld [vmem:[#allocation2 + $0x1a0] sm:$0xff] }
 0x4d5   : > { %s4624_s18 = spop %4623  ;;  %v4925_v0 = vpop.eup %4924  ;;  %v9676_v16 = vmul.f32 0.001953125, %v3526_v4  ;;  %v3652_v39 = vadd.f32 1e-07, %v9666_v18  ;;  %4936 = vlog2.f32 %v3650_v3  ;;  %v3834_v62 = vmul.f32 %v3743_v57, %v9616_v14 }
 0x4d6   : > { %3477 = sst [smem:[#allocation7]] %s4624_s18  ;;  %v3920_v46 = vadd.f32 %v3919_v22, %v3918_v9  ;;  %v3747_v30 = vmul.f32 0.6931472, %v4925_v0  ;;  %v3929_v29 = vsel %vm3405_vm0, %v3832_v42, 0.0  ;;  %v9681_v61 = vmul.f32 0.001953125, %v3527_v36  ;;  %v3531_v9 = vld [vmem:[#allocation2 + $0x1a8] sm:$0xff] }
 0x4d7   : > { %v4927_v23 = vpop.eup %4926  ;;  %v3653_v53 = vadd.f32 1e-07, %v9671_v63  ;;  %4938 = vlog2.f32 %v3651_v50  ;;  %v3835_v21 = vmul.f32 %v3745_v15, %v9621_v10  ;;  %v3931_v31 = vsel %vm3405_vm0, %v3833_v56, 0.0 }
 0x4d8   : > { %v3922_v51 = vadd.f32 %v3921_v34, %v3920_v46  ;;  %v4929_v6 = vpop.eup %4928  ;;  %v3749_v28 = vmul.f32 0.6931472, %v4927_v23  ;;  %v9686_v41 = vmul.f32 0.001953125, %v3528_v45  ;;  %v3654_v14 = vadd.f32 1e-07, %v9676_v16  ;;  %v3532_v46 = vld [vmem:[#allocation2 + $0x1b0] sm:$0xff] }
 0x4d9   : > { %4940 = vlog2.f32 %v3652_v39  ;;  %v3751_v5 = vmul.f32 0.6931472, %v4929_v6  ;;  %v3836_v54 = vmul.f32 %v3747_v30, %v9626_v11  ;;  %v3933_v35 = vsel %vm3405_vm0, %v3834_v62, 0.0 }
 0x4da   : > { %v3924_v19 = vadd.f32 %v3923_v17, %v3922_v51  ;;  %v4931_v33 = vpop.eup %4930  ;;  %v9691_v59 = vmul.f32 0.001953125, %v3529_v26  ;;  %v3655_v10 = vadd.f32 1e-07, %v9681_v61  ;;  %4942 = vlog2.f32 %v3653_v53  ;;  %v3533_v51 = vld [vmem:[#allocation2 + $0x1b8] sm:$0xff] }
 0x4db   : > { %v3753_v25 = vmul.f32 0.6931472, %v4931_v33  ;;  %v3837_v49 = vmul.f32 %v3749_v28, %v9631_v38  ;;  %v3935_v47 = vsel %vm3405_vm0, %v3835_v21, 0.0  ;;  %v9696_v1 = vmul.f32 0.001953125, %v3530_v24 }
 0x4dc   : > { %v3926_v20 = vadd.f32 %v3925_v43, %v3924_v19  ;;  %v4933_v22 = vpop.eup %4932  ;;  %v3656_v11 = vadd.f32 1e-07, %v9686_v41  ;;  %4944 = vlog2.f32 %v3654_v14  ;;  %v3838_v32 = vmul.f32 %v3751_v5, %v9636_v13  ;;  %v3534_v19 = vld [vmem:[#allocation2 + $0x1c0] sm:$0xff] }
 0x4dd   : > { %v4935_v34 = vpop.eup %4934  ;;  %v3755_v48 = vmul.f32 0.6931472, %v4933_v22  ;;  %v3937_v55 = vsel %vm3405_vm0, %v3836_v54, 0.0  ;;  %v9701_v7 = vmul.f32 0.001953125, %v3531_v9  ;;  %v3657_v38 = vadd.f32 1e-07, %v9691_v59 }
 0x4de   : > { %v3928_v8 = vadd.f32 %v3927_v58, %v3926_v20  ;;  %4946 = vlog2.f32 %v3655_v10  ;;  %v3757_v4 = vmul.f32 0.6931472, %v4935_v34  ;;  %v3839_v57 = vmul.f32 %v3753_v25, %v9641_v2  ;;  %v3535_v20 = vld [vmem:[#allocation2 + $0x1c8] sm:$0xff] }
 0x4df   : > { %v4937_v17 = vpop.eup %4936  ;;  %v3939_v42 = vsel %vm3405_vm0, %v3837_v49, 0.0  ;;  %v9706_v0 = vmul.f32 0.001953125, %v3532_v46  ;;  %v3658_v13 = vadd.f32 1e-07, %v9696_v1  ;;  %4948 = vlog2.f32 %v3656_v11 }
 0x4e0   : > { %v3930_v40 = vadd.f32 %v3929_v29, %v3928_v8  ;;  %v3759_v36 = vmul.f32 0.6931472, %v4937_v17  ;;  %v3840_v15 = vmul.f32 %v3755_v48, %v9646_v60  ;;  %v3941_v56 = vsel %vm3405_vm0, %v3838_v32, 0.0  ;;  %v3536_v8 = vld [vmem:[#allocation2 + $0x1d0] sm:$0xff] }
 0x4e1   : > { %v4939_v43 = vpop.eup %4938  ;;  %v9711_v23 = vmul.f32 0.001953125, %v3533_v51  ;;  %v3659_v2 = vadd.f32 1e-07, %v9701_v7  ;;  %4950 = vlog2.f32 %v3657_v38  ;;  %v3841_v30 = vmul.f32 %v3757_v4, %v9651_v27 }
 0x4e2   : > { %v3932_v37 = vadd.f32 %v3931_v31, %v3930_v40  ;;  %v3761_v45 = vmul.f32 0.6931472, %v4939_v43  ;;  %v3943_v62 = vsel %vm3405_vm0, %v3839_v57, 0.0  ;;  %v9716_v6 = vmul.f32 0.001953125, %v3534_v19  ;;  %v3537_v40 = vld [vmem:[#allocation2 + $0x1d8] sm:$0xff] }
 0x4e3   : > { %v4941_v58 = vpop.eup %4940  ;;  %v3660_v60 = vadd.f32 1e-07, %v9706_v0  ;;  %4952 = vlog2.f32 %v3658_v13  ;;  %v3842_v28 = vmul.f32 %v3759_v36, %v9656_v44  ;;  %v3945_v21 = vsel %vm3405_vm0, %v3840_v15, 0.0 }
 0x4e4   : > { %v3934_v12 = vadd.f32 %v3933_v35, %v3932_v37  ;;  %v4943_v29 = vpop.eup %4942  ;;  %v3763_v26 = vmul.f32 0.6931472, %v4941_v58  ;;  %v9721_v33 = vmul.f32 0.001953125, %v3535_v20  ;;  %v3661_v27 = vadd.f32 1e-07, %v9711_v23  ;;  %v3538_v37 = vld [vmem:[#allocation2 + $0x1e0] sm:$0xff] }
 0x4e5   : > { %4954 = vlog2.f32 %v3659_v2  ;;  %v3765_v24 = vmul.f32 0.6931472, %v4943_v29  ;;  %v3843_v5 = vmul.f32 %v3761_v45, %v9661_v52  ;;  %v3947_v54 = vsel %vm3405_vm0, %v3841_v30, 0.0 }
 0x4e6   : > { %v3936_v3 = vadd.f32 %v3935_v47, %v3934_v12  ;;  %v4945_v31 = vpop.eup %4944  ;;  %v9726_v22 = vmul.f32 0.001953125, %v3536_v8  ;;  %v3662_v44 = vadd.f32 1e-07, %v9716_v6  ;;  %4956 = vlog2.f32 %v3660_v60  ;;  %v3539_v12 = vld [vmem:[#allocation2 + $0x1e8] sm:$0xff] }
 0x4e7   : > { %v3767_v9 = vmul.f32 0.6931472, %v4945_v31  ;;  %v3844_v25 = vmul.f32 %v3763_v26, %v9666_v18  ;;  %v3949_v49 = vsel %vm3405_vm0, %v3842_v28, 0.0  ;;  %v9731_v34 = vmul.f32 0.001953125, %v3537_v40 }
 0x4e8   : > { %v3938_v50 = vadd.f32 %v3937_v55, %v3936_v3  ;;  %v4947_v35 = vpop.eup %4946  ;;  %v3663_v52 = vadd.f32 1e-07, %v9721_v33  ;;  %4958 = vlog2.f32 %v3661_v27  ;;  %v3845_v48 = vmul.f32 %v3765_v24, %v9671_v63  ;;  %v3540_v3 = vld [vmem:[#allocation2 + $0x1f0] sm:$0xff] }
 0x4e9   : > { %v4949_v47 = vpop.eup %4948  ;;  %v3769_v46 = vmul.f32 0.6931472, %v4947_v35  ;;  %v3951_v32 = vsel %vm3405_vm0, %v3843_v5, 0.0  ;;  %v9736_v17 = vmul.f32 0.001953125, %v3538_v37  ;;  %v3664_v18 = vadd.f32 1e-07, %v9726_v22 }
 0x4ea   : > { %v3940_v39 = vadd.f32 %v3939_v42, %v3938_v50  ;;  %4960 = vlog2.f32 %v3662_v44  ;;  %v3771_v51 = vmul.f32 0.6931472, %v4949_v47  ;;  %v3846_v4 = vmul.f32 %v3767_v9, %v9676_v16  ;;  %v3541_v50 = vld [vmem:[#allocation2 + $0x1f8] sm:$0xff] }
 0x4eb   : > { %v4951_v55 = vpop.eup %4950  ;;  %v3953_v57 = vsel %vm3405_vm0, %v3844_v25, 0.0  ;;  %v9741_v43 = vmul.f32 0.001953125, %v3539_v12  ;;  %v3665_v63 = vadd.f32 1e-07, %v9731_v34  ;;  %4962 = vlog2.f32 %v3663_v52 }
 0x4ec   : > { %v3942_v53 = vadd.f32 %v3941_v56, %v3940_v39  ;;  %v3773_v19 = vmul.f32 0.6931472, %v4951_v55  ;;  %v3847_v36 = vmul.f32 %v3769_v46, %v9681_v61  ;;  %v3955_v15 = vsel %vm3405_vm0, %v3845_v48, 0.0 }
 0x4ed   : > { %v4953_v42 = vpop.eup %4952  ;;  %v9746_v58 = vmul.f32 0.001953125, %v3540_v3  ;;  %v3666_v16 = vadd.f32 1e-07, %v9736_v17  ;;  %4964 = vlog2.f32 %v3664_v18  ;;  %v3848_v20 = vmul.f32 %v3771_v51, %v9686_v41 }
 0x4ee   : > { %v3944_v14 = vadd.f32 %v3943_v62, %v3942_v53  ;;  %v3775_v39 = vmul.f32 0.6931472, %v4953_v42  ;;  %v3957_v45 = vsel %vm3405_vm0, %v3846_v4, 0.0  ;;  %v9751_v62 = vmul.f32 0.001953125, %v3541_v50 }
 0x4ef   : > { %v4955_v56 = vpop.eup %4954  ;;  %v3667_v29 = vadd.f32 1e-07, %v9741_v43  ;;  %4966 = vlog2.f32 %v3665_v63  ;;  %v3849_v53 = vmul.f32 %v3773_v19, %v9691_v59  ;;  %v3959_v8 = vsel %vm3405_vm0, %v3847_v36, 0.0 }
 0x4f0   : > { %v3946_v10 = vadd.f32 %v3945_v21, %v3944_v14  ;;  %v4957_v30 = vpop.eup %4956  ;;  %v3777_v60 = vmul.f32 0.6931472, %v4955_v56  ;;  %v3668_v28 = vadd.f32 1e-07, %v9746_v58  ;;  %4968 = vlog2.f32 %v3666_v16 }
 0x4f1   : > { %v3779_v41 = vmul.f32 0.6931472, %v4957_v30  ;;  %v3850_v31 = vmul.f32 %v3775_v39, %v9696_v1  ;;  %v3961_v27 = vsel %vm3405_vm0, %v3848_v20, 0.0  ;;  %v3669_v40 = vadd.f32 1e-07, %v9751_v62 }
 0x4f2   : > { %v3948_v11 = vadd.f32 %v3947_v54, %v3946_v10  ;;  %v4959_v26 = vpop.eup %4958  ;;  %4970 = vlog2.f32 %v3667_v29  ;;  %v3851_v59 = vmul.f32 %v3777_v60, %v9701_v7  ;;  %v3963_v54 = vsel %vm3405_vm0, %v3849_v53, 0.0 }
 0x4f3   : > { %v3781_v5 = vmul.f32 0.6931472, %v4959_v26  ;;  %4972 = vlog2.f32 %v3668_v28  ;;  %v3852_v37 = vmul.f32 %v3779_v41, %v9706_v0  ;;  %v3965_v1 = vsel %vm3405_vm0, %v3850_v31, 0.0 }
 0x4f4   : > { %v3950_v38 = vadd.f32 %v3949_v49, %v3948_v11  ;;  %v4961_v14 = vpop.eup %4960  ;;  %4974 = vlog2.f32 %v3669_v40  ;;  %v3967_v52 = vsel %vm3405_vm0, %v3851_v59, 0.0 }
 0x4f5   : > { %v4963_v35 = vpop.eup %4962  ;;  %v3783_v10 = vmul.f32 0.6931472, %v4961_v14  ;;  %v3853_v47 = vmul.f32 %v3781_v5, %v9711_v23  ;;  %v3969_v48 = vsel %vm3405_vm0, %v3852_v37, 0.0 }
 0x4f6   : > { %v3952_v13 = vadd.f32 %v3951_v32, %v3950_v38  ;;  %v3785_v49 = vmul.f32 0.6931472, %v4963_v35 }
 0x4f7   : > { %v4965_v9 = vpop.eup %4964  ;;  %v3854_v46 = vmul.f32 %v3783_v10, %v9716_v6  ;;  %v3971_v38 = vsel %vm3405_vm0, %v3853_v47, 0.0 }
 0x4f8   : > { %v3954_v2 = vadd.f32 %v3953_v57, %v3952_v13  ;;  %v3787_v12 = vmul.f32 0.6931472, %v4965_v9  ;;  %v3855_v18 = vmul.f32 %v3785_v49, %v9721_v33 }
 0x4f9   : > { %v4967_v11 = vpop.eup %4966  ;;  %v3973_v57 = vsel %vm3405_vm0, %v3854_v46, 0.0 }
 0x4fa   : > { %v3956_v61 = vadd.f32 %v3955_v15, %v3954_v2  ;;  %v4969_v32 = vpop.eup %4968  ;;  %v3789_v0 = vmul.f32 0.6931472, %v4967_v11  ;;  %v3856_v23 = vmul.f32 %v3787_v12, %v9726_v22  ;;  %v3975_v50 = vsel %vm3405_vm0, %v3855_v18, 0.0 }
 0x4fb   : > { %v3791_v4 = vmul.f32 0.6931472, %v4969_v32 }
 0x4fc   : > { %v3958_v21 = vadd.f32 %v3957_v45, %v3956_v61  ;;  %v4971_v3 = vpop.eup %4970  ;;  %v3857_v6 = vmul.f32 %v3789_v0, %v9731_v34  ;;  %v3977_v56 = vsel %vm3405_vm0, %v3856_v23, 0.0 }
 0x4fd   : > { %v4973_v42 = vpop.eup %4972  ;;  %v3793_v13 = vmul.f32 0.6931472, %v4971_v3  ;;  %v3858_v33 = vmul.f32 %v3791_v4, %v9736_v17 }
 0x4fe   : > { %v3960_v24 = vadd.f32 %v3959_v8, %v3958_v21  ;;  %v4975_v19 = vpop.eup %4974  ;;  %v3795_v15 = vmul.f32 0.6931472, %v4973_v42  ;;  %v3979_v39 = vsel %vm3405_vm0, %v3857_v6, 0.0 }
 0x4ff   : > { %v3797_v2 = vmul.f32 0.6931472, %v4975_v19  ;;  %v3859_v22 = vmul.f32 %v3793_v13, %v9741_v43  ;;  %v3981_v34 = vsel %vm3405_vm0, %v3858_v33, 0.0 }
 0x500   : > { %v3962_v44 = vadd.f32 %v3961_v27, %v3960_v24  ;;  %v3860_v45 = vmul.f32 %v3795_v15, %v9746_v58 }
 0x501   : > { %v3861_v29 = vmul.f32 %v3797_v2, %v9751_v62  ;;  %v3983_v61 = vsel %vm3405_vm0, %v3859_v22, 0.0 }
 0x502   : > { %v3964_v25 = vadd.f32 %v3963_v54, %v3962_v44  ;;  %v3985_v17 = vsel %vm3405_vm0, %v3860_v45, 0.0 }
 0x503   : > { %v3987_v8 = vsel %vm3405_vm0, %v3861_v29, 0.0 }
 0x504   : > { %v3966_v7 = vadd.f32 %v3965_v1, %v3964_v25 }
 0x506   : > { %v3968_v55 = vadd.f32 %v3967_v52, %v3966_v7 }
 0x508   : > { %v3970_v51 = vadd.f32 %v3969_v48, %v3968_v55 }
 0x50a   : > { %v3972_v63 = vadd.f32 %v3971_v38, %v3970_v51 }
 0x50c   : > { %v3974_v36 = vadd.f32 %v3973_v57, %v3972_v63 }
 0x50e   : > { %v3976_v16 = vadd.f32 %v3975_v50, %v3974_v36 }
 0x510   : > { %v3978_v20 = vadd.f32 %v3977_v56, %v3976_v16 }
 0x512   : > { %v3980_v30 = vadd.f32 %v3979_v39, %v3978_v20 }
 0x514   : > { %v3982_v60 = vadd.f32 %v3981_v34, %v3980_v30 }
 0x516   : > { %v3984_v53 = vadd.f32 %v3983_v61, %v3982_v60 }
 0x518   : > { %v3986_v26 = vadd.f32 %v3985_v17, %v3984_v53 }
 0x51a   : > { %v3988_v43 = vadd.f32 %v3987_v8, %v3986_v26 }
 0x51c   : > { %v3989_v28 = vrot.slane %v3988_v43, 4 }
 0x51e   : > { %v3990_v21 = vadd.f32 %v3989_v28, %v3988_v43 }
 0x520   : > { %v3991_v41 = vrot.slane %v3990_v21, 2 }
 0x522   : > { %v3992_v31 = vadd.f32 %v3991_v41, %v3990_v21 }
 0x524   : > { %v3993_v58 = vrot.slane %v3992_v31, 1 }
 0x526   : > { %v3994_v27 = vadd.f32 %v3993_v58, %v3992_v31 }
 0x528   : > { %v3995_v14 = vsub.f32 0.0, %v3994_v27 }
 0x52a   : > { %v3996_v40 = vmul.f32 1.442695, %v3995_v14 }
 0x52c   : > { %4976 = vpow2.f32 %v3996_v40 }
 0x536   : > { %v4977_v62 = vpop.eup %4976 }
 0x537   : > { %4625 = vpush %v4977_v62 }
 0x568   : > { %s4626_s20 = spop %4625 }
 0x569   : > { %4001 = sst [smem:[#allocation8]] %s4626_s20 }
 0x56a PF: > { %s4482_s27 = sshll.u32 %s5080_s24, 10  ;;  %s4018_s13 = sshll.u32 %s5207_s19, 4  ;;  %s9791_s13 = int_to_ptr.vmem [resolvable:$true] %s4018_s13 }
 0x56b   : > { %s9788_s9 = scalar_lea.hbm %s9885_s4, %s4482_s27  ;;  %s9795_s14 = scalar_lea.sflag [#allocation5], %s260_s12 }
 0x56c   : > { %s4978_s15 = scalar_lea.vmem %s9791_s13, 1024  ;;  %s5094_s24 = smov [#allocation4]  }
 0x56d   : > { %p4979_p0 = scmp.ne.s32.totalorder %s9791_s13, %s4978_s15  ;;  %s4982_s16 = sshll.u32 %s5094_s24, 4  ;;  %s4983_s16 = int_to_ptr.vmem [resolvable:$false] %s4982_s16 }
 0x56e   : > { %s4984_s17 = scalar_lea.vmem %s4983_s16, 2048  ;;  %p4985_p5 = scmp.lt.s32.totalorder %s9791_s13, %s4983_s16 }
 0x56f   : > { %p4980_p1 = pnand %p4979_p0, %p5180_p4  ;;  %p4986_p6 = scmp.lt.s32.totalorder %s4984_s17, %s4978_s15 }
 0x571   : > { %p4981_p3 = pneg %p4980_p1  ;;  %p4987_p7 = por %p4986_p6, %p4985_p5 }
 0x573   : > { %p4988_p9 = pnand %p4987_p7, %p4981_p3 }
 0x575   : > { %4991 = shalt.err (!%p4988_p9)
}
 0x576   : > { %s4992_s12 = scalar_lea.hbm %s9788_s9, 1024  ;;  %s4996_s20 = scalar_lea.hbm %s9885_s4, 2048 }
 0x577   : > { %p4993_p10 = scmp.ne.s32.totalorder %s9788_s9, %s4992_s12  ;;  %p4997_p13 = scmp.lt.u32.totalorder %s9788_s9, %s9885_s4 }
 0x578   : > { %p4998_p0 = scmp.lt.u32.totalorder %s4996_s20, %s4992_s12  ;;  %p5000_p3 = scmp.lt.u32.totalorder %s4992_s12, %s9788_s9 }
 0x579   : > { %p4994_p11 = pnand %p4993_p10, %p5180_p4 }
 0x57a   : > { %p4999_p1 = por %p4998_p0, %p4997_p13 }
 0x57b   : > { %p4995_p12 = pneg %p4994_p11 }
 0x57c   : > { %p5001_p5 = por %p5000_p3, %p4999_p1 }
 0x57e   : > { %p5002_p6 = pnand %p5001_p5, %p4995_p12 }
 0x580   : > { %5005 = shalt.err (!%p5002_p6)
}
 0x581   : > { %s5095_s30 = smov 256   ;;  %s5096_s15 = smov 16  }
 0x582   : > { %4627 = dma.vmem_to_hbm [thread:$0]  (%p5180_p4), %s9791_s13, 1024, %s9788_s9, %s9795_s14, %s5095_s30, %s5095_s30, %s5096_s15  }
 0x583   : > { %s5006_s17 = scalar_lea.hbm %s9886_s5, 16 }
 0x584   : > { %p5007_p7 = scmp.ne.s32.totalorder %s9886_s5, %s5006_s17  ;;  %p5012_p11 = scmp.lt.u32.totalorder %s5006_s17, %s9886_s5 }
 0x586   : > { %p5008_p9 = pnand %p5007_p7, %p5170_p2 }
 0x588   : > { %p5009_p10 = pneg %p5008_p9 }
 0x58a   : > { %p5014_p12 = pnand %p5012_p11, %p5009_p10 }
 0x58c   : > { %5017 = shalt.err (!%p5014_p12)
}
 0x58d   : > { %s5097_s27 = smov [#allocation7]   ;;  %s5018_s28 = scalar_lea.hbm %s9887_s6, 16 }
 0x58e   : > { %4629 = dma.smem_to_hbm (%p5170_p2), %s5097_s27, 16, %s9886_s5, [#allocation6]  }
 0x58f   : > { %p5019_p4 = scmp.ne.s32.totalorder %s9887_s6, %s5018_s28  ;;  %p5024_p1 = scmp.lt.u32.totalorder %s5018_s28, %s9887_s6 }
 0x591   : > { %p5020_p13 = pnand %p5019_p4, %p5170_p2 }
 0x593   : > { %p5021_p0 = pneg %p5020_p13 }
 0x595   : > { %p5026_p3 = pnand %p5024_p1, %p5021_p0 }
 0x597   : > { %5029 = shalt.err (!%p5026_p3)
}
 0x598   : > { %s5098_s17 = smov [#allocation8]  }
 0x599   : > { %4631 = dma.smem_to_hbm (%p5170_p2), %s5098_s17, 16, %s9887_s6, [#allocation9]  }
 0x59a   : > { %5055 = dma.done.wait (%p5170_p2), [#allocation6], 16  }
 0x59b   : > { %5057 = vsyncadd (%p5170_p2), [#allocation6], 4294967280 }
 0x59c   : > { %5059 = dma.done.wait (%p5170_p2), [#allocation9], 16  }
 0x59d   : > { %5061 = vsyncadd (%p5170_p2), [#allocation9], 4294967280 }
 0x59e   : > { %4051 = sfence }
 0x59f PF: > { %p4645_p5 = scmp.ge.s32.totalorder %s5088_s26, 2  ;;  %s4060_s12 = sand.u32 1, %s5068_s21  }
 0x5a0   : > { %s4061_s20 = scalar_lea.sflag [#allocation5], %s4060_s12 }
 0x5a1   : > { %p4638_p6 = pnand %p4645_p5, %p5187_p8 }
 0x5a3   : > { %5063 = dma.done.wait (!%p4638_p6), %s4061_s20, 1024  }
 0x5a4   : > { %5065 = vsyncadd (!%p4638_p6), %s4061_s20, 4294966272  ;;  %s22_s26 = sadd.s32 1, %s5088_s26   ;;  %s11199_s21 = smov %s5072_s22 }
 0x5a5   : > { %p19_p7 = scmp.ge.s32.totalorder %s22_s26, 4   ;;  %s11200_s22 = smov %s5076_s23 }
 0x5a6   : > { %s11201_s23 = smov %s5193_s11  ;;  %s11202_s24 = smov %s5084_s25 }
 0x5a7   : > { %s11203_s25 = smov %s11205_s29  ;;  %21 = sbr.rel (!%p19_p7) target bundleno = 6 (0x6), region = 98 }
 0x5ae   :  { %4066 = vsyncpa [#allocation5], 1 }
 0x5af   :  { %4068 = vsyncpa [#allocation5 + $0x1], 1 }
 0x5b0   :  { %4069 = vsyncpa [#allocation6], 1 }
 0x5b1   :  { %4071 = vsyncpa [#allocation6 + $0x1], 1 }
 0x5b2   :  { %4072 = vsyncpa [#allocation9], 1 }

</bundles_post_ra>
